<compile_context>
chip_gen: v7x
topology: tpu7x:2x2x1
jax: 0.10.0
libtpu: 0.0.40
codegen_flags: <defaults>
</compile_context>

<pallas_src>
import functools

import jax
import jax.numpy as jnp
from jax.experimental import pallas as pl
from jax.experimental.pallas import tpu as pltpu


# ----------------------------------------------------------------------------
# BlockSpec helpers
# ----------------------------------------------------------------------------
def _batch_spec(shape):
    """Per-batch block (leading axis indexed by grid axis 0), rest full."""
    return pl.BlockSpec((1,) + tuple(shape[1:]), lambda b, c: (b, 0, 0))


def _stacked_spec(shape):
    """Per-block weight: leading axis indexed by grid axis 1, rest full."""
    nd = len(shape)
    return pl.BlockSpec((1,) + tuple(shape[1:]),
                        lambda b, c, _nd=nd: (c,) + (0,) * (_nd - 1))


# ----------------------------------------------------------------------------
# Fused decoder-stack kernel: for each batch row (grid axis 0) run
#   3 shared blocks -> 5 component blocks -> alpha combine -> vocab projection
# along grid axis 1, with x and the component accumulator in VMEM scratch.
# ----------------------------------------------------------------------------
def _decoder_stack_kernel(*refs, treedef, num_heads, n_shared, n_comp, eps):
    n_w = treedef.num_leaves
    x_ref, img_ref, txt_ref, ent_ref, alpha_ref = refs[:5]
    w_refs = refs[5:5 + n_w]
    wout_ref, bout_ref = refs[5 + n_w], refs[6 + n_w]
    o_ref = refs[7 + n_w]
    x_cur, comp_acc = refs[8 + n_w], refs[9 + n_w]

    p = jax.tree_util.tree_unflatten(treedef, w_refs)
    b = pl.program_id(0)
    c = pl.program_id(1)
    n_blocks = n_shared + n_comp

    # Load this batch's embedded tokens into the carried scratch once.
    @pl.when(c == 0)
    def _():
        x_cur[...] = x_ref[0].astype(jnp.float32)

    x = x_cur[...]                                            # (T, E)

    def layer_norm(v, g_ref, b_ref):
        g = g_ref[0].astype(jnp.float32)                      # (1, E)
        bb = b_ref[0].astype(jnp.float32)
        mu = jnp.mean(v, axis=-1, keepdims=True)
        var = jnp.mean(jnp.square(v - mu), axis=-1, keepdims=True)
        return (v - mu) * jax.lax.rsqrt(var + eps) * g + bb

    def mha(q_in, ctx_ref, pm):
        # q_in: (T, E); ctx: (L, C).  Head-fused Q / KV / O projections,
        # per-head score and PV dots (head_dim is tiny at these shapes).
        ctx = ctx_ref[0].astype(jnp.float32)                  # (L, C)
        hd = pm["wq"].shape[-1]                               # H * head_dim (== E)
        d = hd // num_heads
        scale = 1.0 / (float(d) ** 0.5)
        q = jnp.dot(q_in, pm["wq"][0],
                    preferred_element_type=jnp.float32) + pm["bq"][0]   # (T, hd)
        kv = jnp.dot(ctx, pm["wkv"][0],
                     preferred_element_type=jnp.float32) + pm["bkv"][0]  # (L, 2hd)
        k, v = kv[:, :hd], kv[:, hd:]
        # TODO(synk): key_padding_mask ('*_mask') not folded into the scores.
        heads = []
        for h in range(num_heads):
            qh = q[:, h * d:(h + 1) * d]                      # (T, d)
            kh = k[:, h * d:(h + 1) * d]                      # (L, d)
            vh = v[:, h * d:(h + 1) * d]                      # (L, d)
            s = jax.lax.dot_general(qh, kh, (((1,), (1,)), ((), ())),
                                    preferred_element_type=jnp.float32)
            s = s * scale
            s = s - jnp.max(s, axis=-1, keepdims=True)
            pr = jnp.exp(s)
            pr = pr * pl.reciprocal(jnp.sum(pr, axis=-1, keepdims=True),
                                    approx=True)
            heads.append(jnp.dot(pr, vh, preferred_element_type=jnp.float32))
        o = jnp.concatenate(heads, axis=-1)                   # (T, hd)
        return jnp.dot(o, pm["wo"][0],
                       preferred_element_type=jnp.float32) + pm["bo"][0]

    q_ln = layer_norm(x, p["ln1_g"], p["ln1_b"])

    # proj over concat([img, txt, ent]) == sum of three partial matmuls,
    # accumulated right after each attention (short live ranges).
    a = mha(q_ln, img_ref, p["attn_img"])
    proj = jnp.dot(a, p["proj_w_img"][0],
                   preferred_element_type=jnp.float32) + p["proj_b"][0]
    a = mha(q_ln, txt_ref, p["attn_txt"])
    proj = proj + jnp.dot(a, p["proj_w_txt"][0],
                          preferred_element_type=jnp.float32)
    a = mha(q_ln, ent_ref, p["attn_ent"])
    proj = proj + jnp.dot(a, p["proj_w_ent"][0],
                          preferred_element_type=jnp.float32)

    y = x + proj                                              # dropout = identity (eval)
    y = layer_norm(y, p["ln2_g"], p["ln2_b"])
    h1 = jnp.maximum(
        jnp.dot(y, p["ff1_w"][0], preferred_element_type=jnp.float32)
        + p["ff1_b"][0], 0.0)
    y = y + jnp.dot(h1, p["ff2_w"][0],
                    preferred_element_type=jnp.float32) + p["ff2_b"][0]

    # Route the block output.
    @pl.when(c < n_shared)
    def _():                                  # shared block: feed the next block
        x_cur[...] = y

    @pl.when(c == n_shared)
    def _():                                  # first component block
        comp_acc[...] = alpha_ref[b, 0] * y

    @pl.when(c > n_shared)
    def _():                                  # remaining component blocks
        comp_acc[...] = comp_acc[...] + alpha_ref[b, c - n_shared] * y

    # Epilogue: mean of alpha-weighted components + vocab projection.
    @pl.when(c == n_blocks - 1)
    def _():
        final = comp_acc[...] * (1.0 / n_comp)
        logits = jnp.dot(final, wout_ref[...],
                         preferred_element_type=jnp.float32) + bout_ref[...]
        o_ref[0] = logits.astype(o_ref.dtype)


# ----------------------------------------------------------------------------
# Model forward (only the embedding gather + final un-pad stay in XLA)
# ----------------------------------------------------------------------------
def template_guided_decoder_forward(params, tgt_tokens, contexts, alpha, *,
                                    num_heads, vocab_size,
                                    n_shared=3, n_comp=5, eps=1e-5):
    B, T = tgt_tokens.shape
    E = params["embed"].shape[1]
    img, txt, ent = contexts["image"], contexts["text"], contexts["entity"]

    # TODO(synk): embedding lookup stays as an XLA gather (no DMA-gather kernel).
    x = jnp.take(params["embed"], tgt_tokens.reshape(-1), axis=0).reshape(B, T, E)

    flat_w, treedef = jax.tree_util.tree_flatten(params["blocks"])
    n_blocks = n_shared + n_comp
    wout, bout = params["out_w_pad"], params["out_b_pad"]      # padded at init
    Vpad = wout.shape[1]

    kernel = functools.partial(_decoder_stack_kernel, treedef=treedef,
                               num_heads=num_heads, n_shared=n_shared,
                               n_comp=n_comp, eps=eps)

    in_specs = ([_batch_spec(x.shape), _batch_spec(img.shape),
                 _batch_spec(txt.shape), _batch_spec(ent.shape),
                 pl.BlockSpec(memory_space=pltpu.MemorySpace.SMEM)]   # alpha
                + [_stacked_spec(w.shape) for w in flat_w]
                + [pl.BlockSpec(wout.shape, lambda b, c: (0, 0)),
                   pl.BlockSpec(bout.shape, lambda b, c: (0, 0))])

    logits_pad = pl.pallas_call(
        kernel,
        out_shape=jax.ShapeDtypeStruct((B, T, Vpad), jnp.float32),
        grid=(B, n_blocks),
        in_specs=in_specs,
        out_specs=pl.BlockSpec((1, T, Vpad), lambda b, c: (b, 0, 0)),
        scratch_shapes=[pltpu.VMEM((T, E), jnp.float32),   # carried x
                        pltpu.VMEM((T, E), jnp.float32)],  # component accumulator
        compiler_params=pltpu.CompilerParams(
            dimension_semantics=("parallel", "arbitrary")),
    )(x, img, txt, ent, alpha, *flat_w, wout, bout)

    return logits_pad[:, :, :vocab_size]


# ----------------------------------------------------------------------------
# Deterministic synthetic parameters (head-fused weight layout, leading block
# axis of n_shared + n_comp; vocab weight padded to 128 lanes at init).
# ----------------------------------------------------------------------------
def _nrm(key, shape, scale=0.05):
    return jax.random.normal(key, shape, jnp.float32) * scale


def _init_mha_params(key, nc, E, C):
    ks = jax.random.split(key, 6)
    return dict(
        wq=_nrm(ks[0], (nc, E, E)),      bq=_nrm(ks[1], (nc, 1, E)),
        wkv=_nrm(ks[2], (nc, C, 2 * E)), bkv=_nrm(ks[3], (nc, 1, 2 * E)),
        wo=_nrm(ks[4], (nc, E, E)),      bo=_nrm(ks[5], (nc, 1, E)),
    )


def _init_block_params(key, nc, E, Cimg, Ctxt, Cent, F):
    ks = jax.random.split(key, 11)
    return dict(
        ln1_g=jnp.ones((nc, 1, E), jnp.float32),
        ln1_b=jnp.zeros((nc, 1, E), jnp.float32),
        attn_img=_init_mha_params(ks[0], nc, E, Cimg),
        attn_txt=_init_mha_params(ks[1], nc, E, Ctxt),
        attn_ent=_init_mha_params(ks[2], nc, E, Cent),
        proj_w_img=_nrm(ks[3], (nc, E, E)),
        proj_w_txt=_nrm(ks[4], (nc, E, E)),
        proj_w_ent=_nrm(ks[5], (nc, E, E)),
        proj_b=_nrm(ks[6], (nc, 1, E)),
        ln2_g=jnp.ones((nc, 1, E), jnp.float32),
        ln2_b=jnp.zeros((nc, 1, E), jnp.float32),
        ff1_w=_nrm(ks[7], (nc, E, F)), ff1_b=_nrm(ks[8], (nc, 1, F)),
        ff2_w=_nrm(ks[9], (nc, F, E)), ff2_b=_nrm(ks[10], (nc, 1, E)),
    )


def init_params(key, vocab_size, E, Cimg, Ctxt, Cent, F, n_shared=3, n_comp=5):
    ks = jax.random.split(key, 5)
    embed = _nrm(ks[0], (vocab_size, E))
    shared = _init_block_params(ks[1], n_shared, E, Cimg, Ctxt, Cent, F)
    components = _init_block_params(ks[2], n_comp, E, Cimg, Ctxt, Cent, F)
    blocks = jax.tree_util.tree_map(
        lambda a, b: jnp.concatenate([a, b], axis=0), shared, components)

    Vpad = ((vocab_size + 127) // 128) * 128
    out_w = _nrm(ks[3], (E, vocab_size))
    out_b = _nrm(ks[4], (vocab_size,))
    out_w_pad = jnp.pad(out_w, ((0, 0), (0, Vpad - vocab_size)))
    out_b_pad = jnp.pad(out_b, (0, Vpad - vocab_size)).reshape(1, Vpad)
    return dict(embed=embed, blocks=blocks,
                out_w_pad=out_w_pad, out_b_pad=out_b_pad)


# ----------------------------------------------------------------------------
# Driver
# ----------------------------------------------------------------------------
if __name__ == "__main__":
    vocab_size = 50
    embed_dim = 32
    img_dim = 64
    text_dim = 32
    ne_dim = 32
    num_heads = 4      # head_dim = 8
    ff_dim = 64

    B, T = 2, 8
    L_img, L_txt, L_ent = 5, 7, 4

    root = jax.random.PRNGKey(0)
    kp, kt, ki, kx, ke, ka = jax.random.split(root, 6)

    params = init_params(kp, vocab_size, embed_dim, img_dim, text_dim, ne_dim,
                         ff_dim)

    tgt_tokens = jax.random.randint(kt, (B, T), 0, vocab_size, dtype=jnp.int32)
    contexts = {
        "image": jax.random.normal(ki, (B, L_img, img_dim), jnp.float32),
        "text": jax.random.normal(kx, (B, L_txt, text_dim), jnp.float32),
        "entity": jax.random.normal(ke, (B, L_ent, ne_dim), jnp.float32),
        # TODO(synk): key_padding_mask support (contexts['*_mask']) is not
        # wired into the attention scores; masks are treated as None here.
    }
    alpha = jax.nn.sigmoid(jax.random.normal(ka, (B, 5), jnp.float32))

    fwd = jax.jit(functools.partial(template_guided_decoder_forward,
                                    num_heads=num_heads,
                                    vocab_size=vocab_size))
    logits = fwd(params, tgt_tokens, contexts, alpha)
    jax.block_until_ready(logits)

    assert logits.shape == (B, T, vocab_size), logits.shape
    assert bool(jnp.all(jnp.isfinite(logits)))
    print("KERNEL_OK")
</pallas_src>

<mosaic_0001>
module attributes {stable_mosaic.version = 11 : i64} {
  func.func @_decoder_stack_kernel(%arg0: i32, %arg1: i32, %arg2: memref<1x8x32xf32, #tpu.memory_space<vmem>>, %arg3: memref<1x5x64xf32, #tpu.memory_space<vmem>>, %arg4: memref<1x7x32xf32, #tpu.memory_space<vmem>>, %arg5: memref<1x4x32xf32, #tpu.memory_space<vmem>>, %arg6: memref<2x5xf32, #tpu.memory_space<smem>>, %arg7: memref<1x1x64xf32, #tpu.memory_space<vmem>>, %arg8: memref<1x1x32xf32, #tpu.memory_space<vmem>>, %arg9: memref<1x1x32xf32, #tpu.memory_space<vmem>>, %arg10: memref<1x32x64xf32, #tpu.memory_space<vmem>>, %arg11: memref<1x32x32xf32, #tpu.memory_space<vmem>>, %arg12: memref<1x32x32xf32, #tpu.memory_space<vmem>>, %arg13: memref<1x1x64xf32, #tpu.memory_space<vmem>>, %arg14: memref<1x1x32xf32, #tpu.memory_space<vmem>>, %arg15: memref<1x1x32xf32, #tpu.memory_space<vmem>>, %arg16: memref<1x64x64xf32, #tpu.memory_space<vmem>>, %arg17: memref<1x32x32xf32, #tpu.memory_space<vmem>>, %arg18: memref<1x32x32xf32, #tpu.memory_space<vmem>>, %arg19: memref<1x1x64xf32, #tpu.memory_space<vmem>>, %arg20: memref<1x1x32xf32, #tpu.memory_space<vmem>>, %arg21: memref<1x1x32xf32, #tpu.memory_space<vmem>>, %arg22: memref<1x32x64xf32, #tpu.memory_space<vmem>>, %arg23: memref<1x32x32xf32, #tpu.memory_space<vmem>>, %arg24: memref<1x32x32xf32, #tpu.memory_space<vmem>>, %arg25: memref<1x1x64xf32, #tpu.memory_space<vmem>>, %arg26: memref<1x32x64xf32, #tpu.memory_space<vmem>>, %arg27: memref<1x1x32xf32, #tpu.memory_space<vmem>>, %arg28: memref<1x64x32xf32, #tpu.memory_space<vmem>>, %arg29: memref<1x1x32xf32, #tpu.memory_space<vmem>>, %arg30: memref<1x1x32xf32, #tpu.memory_space<vmem>>, %arg31: memref<1x1x32xf32, #tpu.memory_space<vmem>>, %arg32: memref<1x1x32xf32, #tpu.memory_space<vmem>>, %arg33: memref<1x1x32xf32, #tpu.memory_space<vmem>>, %arg34: memref<1x32x32xf32, #tpu.memory_space<vmem>>, %arg35: memref<1x32x32xf32, #tpu.memory_space<vmem>>, %arg36: memref<1x32x32xf32, #tpu.memory_space<vmem>>, %arg37: memref<32x128xf32, #tpu.memory_space<vmem>>, %arg38: memref<1x128xf32, #tpu.memory_space<vmem>>, %arg39: memref<1x8x128xf32, #tpu.memory_space<vmem>>, %arg40: memref<8x32xf32, #tpu.memory_space<vmem>>, %arg41: memref<8x32xf32, #tpu.memory_space<vmem>>) attributes {dimension_semantics = [#tpu.dimension_semantics<parallel>, #tpu.dimension_semantics<arbitrary>], iteration_bounds = array<i64: 2, 8>, scalar_prefetch = 0 : i64, scratch_operands = 2 : i64, tpu.core_type = #tpu.core_type<tc>, window_params = [{transform_indices = @transform_0, window_bounds = array<i64: 1, 8, 32>}, {transform_indices = @transform_1, window_bounds = array<i64: 1, 5, 64>}, {transform_indices = @transform_2, window_bounds = array<i64: 1, 7, 32>}, {transform_indices = @transform_3, window_bounds = array<i64: 1, 4, 32>}, {transform_indices = @transform_4, window_bounds = array<i64: 2, 5>}, {transform_indices = @transform_5, window_bounds = array<i64: 1, 1, 64>}, {transform_indices = @transform_6, window_bounds = array<i64: 1, 1, 32>}, {transform_indices = @transform_7, window_bounds = array<i64: 1, 1, 32>}, {transform_indices = @transform_8, window_bounds = array<i64: 1, 32, 64>}, {transform_indices = @transform_9, window_bounds = array<i64: 1, 32, 32>}, {transform_indices = @transform_10, window_bounds = array<i64: 1, 32, 32>}, {transform_indices = @transform_11, window_bounds = array<i64: 1, 1, 64>}, {transform_indices = @transform_12, window_bounds = array<i64: 1, 1, 32>}, {transform_indices = @transform_13, window_bounds = array<i64: 1, 1, 32>}, {transform_indices = @transform_14, window_bounds = array<i64: 1, 64, 64>}, {transform_indices = @transform_15, window_bounds = array<i64: 1, 32, 32>}, {transform_indices = @transform_16, window_bounds = array<i64: 1, 32, 32>}, {transform_indices = @transform_17, window_bounds = array<i64: 1, 1, 64>}, {transform_indices = @transform_18, window_bounds = array<i64: 1, 1, 32>}, {transform_indices = @transform_19, window_bounds = array<i64: 1, 1, 32>}, {transform_indices = @transform_20, window_bounds = array<i64: 1, 32, 64>}, {transform_indices = @transform_21, window_bounds = array<i64: 1, 32, 32>}, {transform_indices = @transform_22, window_bounds = array<i64: 1, 32, 32>}, {transform_indices = @transform_23, window_bounds = array<i64: 1, 1, 64>}, {transform_indices = @transform_24, window_bounds = array<i64: 1, 32, 64>}, {transform_indices = @transform_25, window_bounds = array<i64: 1, 1, 32>}, {transform_indices = @transform_26, window_bounds = array<i64: 1, 64, 32>}, {transform_indices = @transform_27, window_bounds = array<i64: 1, 1, 32>}, {transform_indices = @transform_28, window_bounds = array<i64: 1, 1, 32>}, {transform_indices = @transform_29, window_bounds = array<i64: 1, 1, 32>}, {transform_indices = @transform_30, window_bounds = array<i64: 1, 1, 32>}, {transform_indices = @transform_31, window_bounds = array<i64: 1, 1, 32>}, {transform_indices = @transform_32, window_bounds = array<i64: 1, 32, 32>}, {transform_indices = @transform_33, window_bounds = array<i64: 1, 32, 32>}, {transform_indices = @transform_34, window_bounds = array<i64: 1, 32, 32>}, {pipeline_mode = #tpu.pipeline_mode<synchronous>, transform_indices = @transform_35, window_bounds = array<i64: 32, 128>}, {pipeline_mode = #tpu.pipeline_mode<synchronous>, transform_indices = @transform_36, window_bounds = array<i64: 1, 128>}, {transform_indices = @transform_37, window_bounds = array<i64: 1, 8, 128>}]} {
    %c0_i32 = arith.constant 0 : i32
    %0 = arith.cmpi eq, %arg1, %c0_i32 : i32
    %1 = arith.extui %0 : i1 to i32
    %c0_i32_0 = arith.constant 0 : i32
    %2 = arith.cmpi ne, %1, %c0_i32_0 : i32
    scf.if %2 {
      %c0_191 = arith.constant 0 : index
      %c0_192 = arith.constant 0 : index
      %c0_193 = arith.constant 0 : index
      %383 = vector.load %arg2[%c0_191, %c0_192, %c0_193] : memref<1x8x32xf32, #tpu.memory_space<vmem>>, vector<1x8x32xf32>
      %384 = vector.shape_cast %383 : vector<1x8x32xf32> to vector<8x32xf32>
      %c0_194 = arith.constant 0 : index
      %c0_195 = arith.constant 0 : index
      %385 = vector.load %arg40[%c0_194, %c0_195] : memref<8x32xf32, #tpu.memory_space<vmem>>, vector<8x32xf32>
      tpu.vector_store %arg40[%c0_194, %c0_195], %384 {strides = array<i32>} : memref<8x32xf32, #tpu.memory_space<vmem>>, vector<8x32xf32>,
    } else {
    }
    %c0 = arith.constant 0 : index
    %c0_1 = arith.constant 0 : index
    %3 = vector.load %arg40[%c0, %c0_1] : memref<8x32xf32, #tpu.memory_space<vmem>>, vector<8x32xf32>
    %c0_2 = arith.constant 0 : index
    %c0_3 = arith.constant 0 : index
    %c0_4 = arith.constant 0 : index
    %4 = vector.load %arg30[%c0_2, %c0_3, %c0_4] : memref<1x1x32xf32, #tpu.memory_space<vmem>>, vector<1x1x32xf32>
    %5 = vector.shape_cast %4 : vector<1x1x32xf32> to vector<1x32xf32>
    %c0_5 = arith.constant 0 : index
    %c0_6 = arith.constant 0 : index
    %c0_7 = arith.constant 0 : index
    %6 = vector.load %arg29[%c0_5, %c0_6, %c0_7] : memref<1x1x32xf32, #tpu.memory_space<vmem>>, vector<1x1x32xf32>
    %7 = vector.shape_cast %6 : vector<1x1x32xf32> to vector<1x32xf32>
    %cst = arith.constant dense<0.000000e+00> : vector<8xf32>
    %8 = vector.multi_reduction <add>, %3, %cst [1] : vector<8x32xf32> to vector<8xf32>
    %9 = vector.shape_cast %8 : vector<8xf32> to vector<8x1xf32>
    %cst_8 = arith.constant 3.200000e+01 : f32
    %10 = vector.broadcast %cst_8 : f32 to vector<8x1xf32>
    %11 = arith.divf %9, %10 : vector<8x1xf32>
    %12 = vector.broadcast %11 : vector<8x1xf32> to vector<8x32xf32>
    %13 = arith.subf %3, %12 : vector<8x32xf32>
    %14 = arith.mulf %13, %13 : vector<8x32xf32>
    %cst_9 = arith.constant dense<0.000000e+00> : vector<8xf32>
    %15 = vector.multi_reduction <add>, %14, %cst_9 [1] : vector<8x32xf32> to vector<8xf32>
    %16 = vector.shape_cast %15 : vector<8xf32> to vector<8x1xf32>
    %cst_10 = arith.constant 3.200000e+01 : f32
    %17 = vector.broadcast %cst_10 : f32 to vector<8x1xf32>
    %18 = arith.divf %16, %17 : vector<8x1xf32>
    %19 = vector.broadcast %11 : vector<8x1xf32> to vector<8x32xf32>
    %20 = arith.subf %3, %19 : vector<8x32xf32>
    %cst_11 = arith.constant 9.99999974E-6 : f32
    %21 = vector.broadcast %cst_11 : f32 to vector<8x1xf32>
    %22 = arith.addf %18, %21 : vector<8x1xf32>
    %23 = math.rsqrt %22 : vector<8x1xf32>
    %24 = vector.broadcast %23 : vector<8x1xf32> to vector<8x32xf32>
    %25 = arith.mulf %20, %24 : vector<8x32xf32>
    %26 = vector.broadcast %5 : vector<1x32xf32> to vector<8x32xf32>
    %27 = arith.mulf %25, %26 : vector<8x32xf32>
    %28 = vector.broadcast %7 : vector<1x32xf32> to vector<8x32xf32>
    %29 = arith.addf %27, %28 : vector<8x32xf32>
    %c0_12 = arith.constant 0 : index
    %c0_13 = arith.constant 0 : index
    %c0_14 = arith.constant 0 : index
    %30 = vector.load %arg3[%c0_12, %c0_13, %c0_14] : memref<1x5x64xf32, #tpu.memory_space<vmem>>, vector<1x5x64xf32>
    %31 = vector.shape_cast %30 : vector<1x5x64xf32> to vector<5x64xf32>
    %c0_15 = arith.constant 0 : index
    %c0_16 = arith.constant 0 : index
    %c0_17 = arith.constant 0 : index
    %32 = vector.load %arg18[%c0_15, %c0_16, %c0_17] : memref<1x32x32xf32, #tpu.memory_space<vmem>>, vector<1x32x32xf32>
    %33 = vector.shape_cast %32 : vector<1x32x32xf32> to vector<32x32xf32>
    %cst_18 = arith.constant dense<0.000000e+00> : vector<8x32xf32>
    %34 = tpu.matmul %29, %33, %cst_18 {dimension_numbers = #tpu.dot_dimension_numbers<[1], [0], [0], [1], [0, 0, 1, 1], [], []>} : vector<8x32xf32>, vector<32x32xf32>, vector<8x32xf32> -> vector<8x32xf32>
    %c0_19 = arith.constant 0 : index
    %c0_20 = arith.constant 0 : index
    %c0_21 = arith.constant 0 : index
    %35 = vector.load %arg15[%c0_19, %c0_20, %c0_21] : memref<1x1x32xf32, #tpu.memory_space<vmem>>, vector<1x1x32xf32>
    %36 = vector.shape_cast %35 : vector<1x1x32xf32> to vector<1x32xf32>
    %37 = vector.broadcast %36 : vector<1x32xf32> to vector<8x32xf32>
    %38 = arith.addf %34, %37 : vector<8x32xf32>
    %c0_22 = arith.constant 0 : index
    %c0_23 = arith.constant 0 : index
    %c0_24 = arith.constant 0 : index
    %39 = vector.load %arg16[%c0_22, %c0_23, %c0_24] : memref<1x64x64xf32, #tpu.memory_space<vmem>>, vector<1x64x64xf32>
    %40 = vector.shape_cast %39 : vector<1x64x64xf32> to vector<64x64xf32>
    %cst_25 = arith.constant dense<0.000000e+00> : vector<5x64xf32>
    %41 = tpu.matmul %31, %40, %cst_25 {dimension_numbers = #tpu.dot_dimension_numbers<[1], [0], [0], [1], [0, 0, 1, 1], [], []>} : vector<5x64xf32>, vector<64x64xf32>, vector<5x64xf32> -> vector<5x64xf32>
    %c0_26 = arith.constant 0 : index
    %c0_27 = arith.constant 0 : index
    %c0_28 = arith.constant 0 : index
    %42 = vector.load %arg13[%c0_26, %c0_27, %c0_28] : memref<1x1x64xf32, #tpu.memory_space<vmem>>, vector<1x1x64xf32>
    %43 = vector.shape_cast %42 : vector<1x1x64xf32> to vector<1x64xf32>
    %44 = vector.broadcast %43 : vector<1x64xf32> to vector<5x64xf32>
    %45 = arith.addf %41, %44 : vector<5x64xf32>
    %46 = vector.extract_strided_slice %45 {offsets = [0, 0], sizes = [5, 32], strides = [1, 1]} : vector<5x64xf32> to vector<5x32xf32>
    %47 = vector.extract_strided_slice %45 {offsets = [0, 32], sizes = [5, 32], strides = [1, 1]} : vector<5x64xf32> to vector<5x32xf32>
    %48 = vector.extract_strided_slice %38 {offsets = [0, 0], sizes = [8, 8], strides = [1, 1]} : vector<8x32xf32> to vector<8x8xf32>
    %49 = vector.extract_strided_slice %46 {offsets = [0, 0], sizes = [5, 8], strides = [1, 1]} : vector<5x32xf32> to vector<5x8xf32>
    %50 = vector.extract_strided_slice %47 {offsets = [0, 0], sizes = [5, 8], strides = [1, 1]} : vector<5x32xf32> to vector<5x8xf32>
    %cst_29 = arith.constant dense<0.000000e+00> : vector<8x5xf32>
    %51 = tpu.matmul %48, %49, %cst_29 {dimension_numbers = #tpu.dot_dimension_numbers<[1], [1], [0], [0], [0, 0, 1, 0], [], []>} : vector<8x8xf32>, vector<5x8xf32>, vector<8x5xf32> -> vector<8x5xf32>
    %cst_30 = arith.constant 0.353553385 : f32
    %52 = vector.broadcast %cst_30 : f32 to vector<8x5xf32>
    %53 = arith.mulf %51, %52 : vector<8x5xf32>
    %cst_31 = arith.constant dense<0xFF800000> : vector<8xf32>
    %54 = vector.multi_reduction <maximumf>, %53, %cst_31 [1] : vector<8x5xf32> to vector<8xf32>
    %55 = vector.shape_cast %54 : vector<8xf32> to vector<8x1xf32>
    %56 = vector.broadcast %55 : vector<8x1xf32> to vector<8x5xf32>
    %57 = arith.subf %53, %56 : vector<8x5xf32>
    %58 = math.exp %57 : vector<8x5xf32>
    %cst_32 = arith.constant dense<0.000000e+00> : vector<8xf32>
    %59 = vector.multi_reduction <add>, %58, %cst_32 [1] : vector<8x5xf32> to vector<8xf32>
    %60 = vector.shape_cast %59 : vector<8xf32> to vector<8x1xf32>
    %61 = tpu.reciprocal %60 {approx = true} : vector<8x1xf32> -> vector<8x1xf32>
    %62 = vector.broadcast %61 : vector<8x1xf32> to vector<8x5xf32>
    %63 = arith.mulf %58, %62 : vector<8x5xf32>
    %cst_33 = arith.constant dense<0.000000e+00> : vector<8x8xf32>
    %64 = tpu.matmul %63, %50, %cst_33 {dimension_numbers = #tpu.dot_dimension_numbers<[1], [0], [0], [1], [0, 0, 1, 1], [], []>} : vector<8x5xf32>, vector<5x8xf32>, vector<8x8xf32> -> vector<8x8xf32>
    %65 = vector.extract_strided_slice %38 {offsets = [0, 8], sizes = [8, 8], strides = [1, 1]} : vector<8x32xf32> to vector<8x8xf32>
    %66 = vector.extract_strided_slice %46 {offsets = [0, 8], sizes = [5, 8], strides = [1, 1]} : vector<5x32xf32> to vector<5x8xf32>
    %67 = vector.extract_strided_slice %47 {offsets = [0, 8], sizes = [5, 8], strides = [1, 1]} : vector<5x32xf32> to vector<5x8xf32>
    %cst_34 = arith.constant dense<0.000000e+00> : vector<8x5xf32>
    %68 = tpu.matmul %65, %66, %cst_34 {dimension_numbers = #tpu.dot_dimension_numbers<[1], [1], [0], [0], [0, 0, 1, 0], [], []>} : vector<8x8xf32>, vector<5x8xf32>, vector<8x5xf32> -> vector<8x5xf32>
    %cst_35 = arith.constant 0.353553385 : f32
    %69 = vector.broadcast %cst_35 : f32 to vector<8x5xf32>
    %70 = arith.mulf %68, %69 : vector<8x5xf32>
    %cst_36 = arith.constant dense<0xFF800000> : vector<8xf32>
    %71 = vector.multi_reduction <maximumf>, %70, %cst_36 [1] : vector<8x5xf32> to vector<8xf32>
    %72 = vector.shape_cast %71 : vector<8xf32> to vector<8x1xf32>
    %73 = vector.broadcast %72 : vector<8x1xf32> to vector<8x5xf32>
    %74 = arith.subf %70, %73 : vector<8x5xf32>
    %75 = math.exp %74 : vector<8x5xf32>
    %cst_37 = arith.constant dense<0.000000e+00> : vector<8xf32>
    %76 = vector.multi_reduction <add>, %75, %cst_37 [1] : vector<8x5xf32> to vector<8xf32>
    %77 = vector.shape_cast %76 : vector<8xf32> to vector<8x1xf32>
    %78 = tpu.reciprocal %77 {approx = true} : vector<8x1xf32> -> vector<8x1xf32>
    %79 = vector.broadcast %78 : vector<8x1xf32> to vector<8x5xf32>
    %80 = arith.mulf %75, %79 : vector<8x5xf32>
    %cst_38 = arith.constant dense<0.000000e+00> : vector<8x8xf32>
    %81 = tpu.matmul %80, %67, %cst_38 {dimension_numbers = #tpu.dot_dimension_numbers<[1], [0], [0], [1], [0, 0, 1, 1], [], []>} : vector<8x5xf32>, vector<5x8xf32>, vector<8x8xf32> -> vector<8x8xf32>
    %82 = vector.extract_strided_slice %38 {offsets = [0, 16], sizes = [8, 8], strides = [1, 1]} : vector<8x32xf32> to vector<8x8xf32>
    %83 = vector.extract_strided_slice %46 {offsets = [0, 16], sizes = [5, 8], strides = [1, 1]} : vector<5x32xf32> to vector<5x8xf32>
    %84 = vector.extract_strided_slice %47 {offsets = [0, 16], sizes = [5, 8], strides = [1, 1]} : vector<5x32xf32> to vector<5x8xf32>
    %cst_39 = arith.constant dense<0.000000e+00> : vector<8x5xf32>
    %85 = tpu.matmul %82, %83, %cst_39 {dimension_numbers = #tpu.dot_dimension_numbers<[1], [1], [0], [0], [0, 0, 1, 0], [], []>} : vector<8x8xf32>, vector<5x8xf32>, vector<8x5xf32> -> vector<8x5xf32>
    %cst_40 = arith.constant 0.353553385 : f32
    %86 = vector.broadcast %cst_40 : f32 to vector<8x5xf32>
    %87 = arith.mulf %85, %86 : vector<8x5xf32>
    %cst_41 = arith.constant dense<0xFF800000> : vector<8xf32>
    %88 = vector.multi_reduction <maximumf>, %87, %cst_41 [1] : vector<8x5xf32> to vector<8xf32>
    %89 = vector.shape_cast %88 : vector<8xf32> to vector<8x1xf32>
    %90 = vector.broadcast %89 : vector<8x1xf32> to vector<8x5xf32>
    %91 = arith.subf %87, %90 : vector<8x5xf32>
    %92 = math.exp %91 : vector<8x5xf32>
    %cst_42 = arith.constant dense<0.000000e+00> : vector<8xf32>
    %93 = vector.multi_reduction <add>, %92, %cst_42 [1] : vector<8x5xf32> to vector<8xf32>
    %94 = vector.shape_cast %93 : vector<8xf32> to vector<8x1xf32>
    %95 = tpu.reciprocal %94 {approx = true} : vector<8x1xf32> -> vector<8x1xf32>
    %96 = vector.broadcast %95 : vector<8x1xf32> to vector<8x5xf32>
    %97 = arith.mulf %92, %96 : vector<8x5xf32>
    %cst_43 = arith.constant dense<0.000000e+00> : vector<8x8xf32>
    %98 = tpu.matmul %97, %84, %cst_43 {dimension_numbers = #tpu.dot_dimension_numbers<[1], [0], [0], [1], [0, 0, 1, 1], [], []>} : vector<8x5xf32>, vector<5x8xf32>, vector<8x8xf32> -> vector<8x8xf32>
    %99 = vector.extract_strided_slice %38 {offsets = [0, 24], sizes = [8, 8], strides = [1, 1]} : vector<8x32xf32> to vector<8x8xf32>
    %100 = vector.extract_strided_slice %46 {offsets = [0, 24], sizes = [5, 8], strides = [1, 1]} : vector<5x32xf32> to vector<5x8xf32>
    %101 = vector.extract_strided_slice %47 {offsets = [0, 24], sizes = [5, 8], strides = [1, 1]} : vector<5x32xf32> to vector<5x8xf32>
    %cst_44 = arith.constant dense<0.000000e+00> : vector<8x5xf32>
    %102 = tpu.matmul %99, %100, %cst_44 {dimension_numbers = #tpu.dot_dimension_numbers<[1], [1], [0], [0], [0, 0, 1, 0], [], []>} : vector<8x8xf32>, vector<5x8xf32>, vector<8x5xf32> -> vector<8x5xf32>
    %cst_45 = arith.constant 0.353553385 : f32
    %103 = vector.broadcast %cst_45 : f32 to vector<8x5xf32>
    %104 = arith.mulf %102, %103 : vector<8x5xf32>
    %cst_46 = arith.constant dense<0xFF800000> : vector<8xf32>
    %105 = vector.multi_reduction <maximumf>, %104, %cst_46 [1] : vector<8x5xf32> to vector<8xf32>
    %106 = vector.shape_cast %105 : vector<8xf32> to vector<8x1xf32>
    %107 = vector.broadcast %106 : vector<8x1xf32> to vector<8x5xf32>
    %108 = arith.subf %104, %107 : vector<8x5xf32>
    %109 = math.exp %108 : vector<8x5xf32>
    %cst_47 = arith.constant dense<0.000000e+00> : vector<8xf32>
    %110 = vector.multi_reduction <add>, %109, %cst_47 [1] : vector<8x5xf32> to vector<8xf32>
    %111 = vector.shape_cast %110 : vector<8xf32> to vector<8x1xf32>
    %112 = tpu.reciprocal %111 {approx = true} : vector<8x1xf32> -> vector<8x1xf32>
    %113 = vector.broadcast %112 : vector<8x1xf32> to vector<8x5xf32>
    %114 = arith.mulf %109, %113 : vector<8x5xf32>
    %cst_48 = arith.constant dense<0.000000e+00> : vector<8x8xf32>
    %115 = tpu.matmul %114, %101, %cst_48 {dimension_numbers = #tpu.dot_dimension_numbers<[1], [0], [0], [1], [0, 0, 1, 1], [], []>} : vector<8x5xf32>, vector<5x8xf32>, vector<8x8xf32> -> vector<8x8xf32>
    %116 = tpu.concatenate %64, %81, %98, %115 in 1 : vector<8x8xf32>, vector<8x8xf32>, vector<8x8xf32>, vector<8x8xf32> -> vector<8x32xf32>
    %c0_49 = arith.constant 0 : index
    %c0_50 = arith.constant 0 : index
    %c0_51 = arith.constant 0 : index
    %117 = vector.load %arg17[%c0_49, %c0_50, %c0_51] : memref<1x32x32xf32, #tpu.memory_space<vmem>>, vector<1x32x32xf32>
    %118 = vector.shape_cast %117 : vector<1x32x32xf32> to vector<32x32xf32>
    %cst_52 = arith.constant dense<0.000000e+00> : vector<8x32xf32>
    %119 = tpu.matmul %116, %118, %cst_52 {dimension_numbers = #tpu.dot_dimension_numbers<[1], [0], [0], [1], [0, 0, 1, 1], [], []>} : vector<8x32xf32>, vector<32x32xf32>, vector<8x32xf32> -> vector<8x32xf32>
    %c0_53 = arith.constant 0 : index
    %c0_54 = arith.constant 0 : index
    %c0_55 = arith.constant 0 : index
    %120 = vector.load %arg14[%c0_53, %c0_54, %c0_55] : memref<1x1x32xf32, #tpu.memory_space<vmem>>, vector<1x1x32xf32>
    %121 = vector.shape_cast %120 : vector<1x1x32xf32> to vector<1x32xf32>
    %122 = vector.broadcast %121 : vector<1x32xf32> to vector<8x32xf32>
    %123 = arith.addf %119, %122 : vector<8x32xf32>
    %c0_56 = arith.constant 0 : index
    %c0_57 = arith.constant 0 : index
    %c0_58 = arith.constant 0 : index
    %124 = vector.load %arg35[%c0_56, %c0_57, %c0_58] : memref<1x32x32xf32, #tpu.memory_space<vmem>>, vector<1x32x32xf32>
    %125 = vector.shape_cast %124 : vector<1x32x32xf32> to vector<32x32xf32>
    %cst_59 = arith.constant dense<0.000000e+00> : vector<8x32xf32>
    %126 = tpu.matmul %123, %125, %cst_59 {dimension_numbers = #tpu.dot_dimension_numbers<[1], [0], [0], [1], [0, 0, 1, 1], [], []>} : vector<8x32xf32>, vector<32x32xf32>, vector<8x32xf32> -> vector<8x32xf32>
    %c0_60 = arith.constant 0 : index
    %c0_61 = arith.constant 0 : index
    %c0_62 = arith.constant 0 : index
    %127 = vector.load %arg33[%c0_60, %c0_61, %c0_62] : memref<1x1x32xf32, #tpu.memory_space<vmem>>, vector<1x1x32xf32>
    %128 = vector.shape_cast %127 : vector<1x1x32xf32> to vector<1x32xf32>
    %129 = vector.broadcast %128 : vector<1x32xf32> to vector<8x32xf32>
    %130 = arith.addf %126, %129 : vector<8x32xf32>
    %c0_63 = arith.constant 0 : index
    %c0_64 = arith.constant 0 : index
    %c0_65 = arith.constant 0 : index
    %131 = vector.load %arg4[%c0_63, %c0_64, %c0_65] : memref<1x7x32xf32, #tpu.memory_space<vmem>>, vector<1x7x32xf32>
    %132 = vector.shape_cast %131 : vector<1x7x32xf32> to vector<7x32xf32>
    %c0_66 = arith.constant 0 : index
    %c0_67 = arith.constant 0 : index
    %c0_68 = arith.constant 0 : index
    %133 = vector.load %arg24[%c0_66, %c0_67, %c0_68] : memref<1x32x32xf32, #tpu.memory_space<vmem>>, vector<1x32x32xf32>
    %134 = vector.shape_cast %133 : vector<1x32x32xf32> to vector<32x32xf32>
    %cst_69 = arith.constant dense<0.000000e+00> : vector<8x32xf32>
    %135 = tpu.matmul %29, %134, %cst_69 {dimension_numbers = #tpu.dot_dimension_numbers<[1], [0], [0], [1], [0, 0, 1, 1], [], []>} : vector<8x32xf32>, vector<32x32xf32>, vector<8x32xf32> -> vector<8x32xf32>
    %c0_70 = arith.constant 0 : index
    %c0_71 = arith.constant 0 : index
    %c0_72 = arith.constant 0 : index
    %136 = vector.load %arg21[%c0_70, %c0_71, %c0_72] : memref<1x1x32xf32, #tpu.memory_space<vmem>>, vector<1x1x32xf32>
    %137 = vector.shape_cast %136 : vector<1x1x32xf32> to vector<1x32xf32>
    %138 = vector.broadcast %137 : vector<1x32xf32> to vector<8x32xf32>
    %139 = arith.addf %135, %138 : vector<8x32xf32>
    %c0_73 = arith.constant 0 : index
    %c0_74 = arith.constant 0 : index
    %c0_75 = arith.constant 0 : index
    %140 = vector.load %arg22[%c0_73, %c0_74, %c0_75] : memref<1x32x64xf32, #tpu.memory_space<vmem>>, vector<1x32x64xf32>
    %141 = vector.shape_cast %140 : vector<1x32x64xf32> to vector<32x64xf32>
    %cst_76 = arith.constant dense<0.000000e+00> : vector<7x64xf32>
    %142 = tpu.matmul %132, %141, %cst_76 {dimension_numbers = #tpu.dot_dimension_numbers<[1], [0], [0], [1], [0, 0, 1, 1], [], []>} : vector<7x32xf32>, vector<32x64xf32>, vector<7x64xf32> -> vector<7x64xf32>
    %c0_77 = arith.constant 0 : index
    %c0_78 = arith.constant 0 : index
    %c0_79 = arith.constant 0 : index
    %143 = vector.load %arg19[%c0_77, %c0_78, %c0_79] : memref<1x1x64xf32, #tpu.memory_space<vmem>>, vector<1x1x64xf32>
    %144 = vector.shape_cast %143 : vector<1x1x64xf32> to vector<1x64xf32>
    %145 = vector.broadcast %144 : vector<1x64xf32> to vector<7x64xf32>
    %146 = arith.addf %142, %145 : vector<7x64xf32>
    %147 = vector.extract_strided_slice %146 {offsets = [0, 0], sizes = [7, 32], strides = [1, 1]} : vector<7x64xf32> to vector<7x32xf32>
    %148 = vector.extract_strided_slice %146 {offsets = [0, 32], sizes = [7, 32], strides = [1, 1]} : vector<7x64xf32> to vector<7x32xf32>
    %149 = vector.extract_strided_slice %139 {offsets = [0, 0], sizes = [8, 8], strides = [1, 1]} : vector<8x32xf32> to vector<8x8xf32>
    %150 = vector.extract_strided_slice %147 {offsets = [0, 0], sizes = [7, 8], strides = [1, 1]} : vector<7x32xf32> to vector<7x8xf32>
    %151 = vector.extract_strided_slice %148 {offsets = [0, 0], sizes = [7, 8], strides = [1, 1]} : vector<7x32xf32> to vector<7x8xf32>
    %cst_80 = arith.constant dense<0.000000e+00> : vector<8x7xf32>
    %152 = tpu.matmul %149, %150, %cst_80 {dimension_numbers = #tpu.dot_dimension_numbers<[1], [1], [0], [0], [0, 0, 1, 0], [], []>} : vector<8x8xf32>, vector<7x8xf32>, vector<8x7xf32> -> vector<8x7xf32>
    %cst_81 = arith.constant 0.353553385 : f32
    %153 = vector.broadcast %cst_81 : f32 to vector<8x7xf32>
    %154 = arith.mulf %152, %153 : vector<8x7xf32>
    %cst_82 = arith.constant dense<0xFF800000> : vector<8xf32>
    %155 = vector.multi_reduction <maximumf>, %154, %cst_82 [1] : vector<8x7xf32> to vector<8xf32>
    %156 = vector.shape_cast %155 : vector<8xf32> to vector<8x1xf32>
    %157 = vector.broadcast %156 : vector<8x1xf32> to vector<8x7xf32>
    %158 = arith.subf %154, %157 : vector<8x7xf32>
    %159 = math.exp %158 : vector<8x7xf32>
    %cst_83 = arith.constant dense<0.000000e+00> : vector<8xf32>
    %160 = vector.multi_reduction <add>, %159, %cst_83 [1] : vector<8x7xf32> to vector<8xf32>
    %161 = vector.shape_cast %160 : vector<8xf32> to vector<8x1xf32>
    %162 = tpu.reciprocal %161 {approx = true} : vector<8x1xf32> -> vector<8x1xf32>
    %163 = vector.broadcast %162 : vector<8x1xf32> to vector<8x7xf32>
    %164 = arith.mulf %159, %163 : vector<8x7xf32>
    %cst_84 = arith.constant dense<0.000000e+00> : vector<8x8xf32>
    %165 = tpu.matmul %164, %151, %cst_84 {dimension_numbers = #tpu.dot_dimension_numbers<[1], [0], [0], [1], [0, 0, 1, 1], [], []>} : vector<8x7xf32>, vector<7x8xf32>, vector<8x8xf32> -> vector<8x8xf32>
    %166 = vector.extract_strided_slice %139 {offsets = [0, 8], sizes = [8, 8], strides = [1, 1]} : vector<8x32xf32> to vector<8x8xf32>
    %167 = vector.extract_strided_slice %147 {offsets = [0, 8], sizes = [7, 8], strides = [1, 1]} : vector<7x32xf32> to vector<7x8xf32>
    %168 = vector.extract_strided_slice %148 {offsets = [0, 8], sizes = [7, 8], strides = [1, 1]} : vector<7x32xf32> to vector<7x8xf32>
    %cst_85 = arith.constant dense<0.000000e+00> : vector<8x7xf32>
    %169 = tpu.matmul %166, %167, %cst_85 {dimension_numbers = #tpu.dot_dimension_numbers<[1], [1], [0], [0], [0, 0, 1, 0], [], []>} : vector<8x8xf32>, vector<7x8xf32>, vector<8x7xf32> -> vector<8x7xf32>
    %cst_86 = arith.constant 0.353553385 : f32
    %170 = vector.broadcast %cst_86 : f32 to vector<8x7xf32>
    %171 = arith.mulf %169, %170 : vector<8x7xf32>
    %cst_87 = arith.constant dense<0xFF800000> : vector<8xf32>
    %172 = vector.multi_reduction <maximumf>, %171, %cst_87 [1] : vector<8x7xf32> to vector<8xf32>
    %173 = vector.shape_cast %172 : vector<8xf32> to vector<8x1xf32>
    %174 = vector.broadcast %173 : vector<8x1xf32> to vector<8x7xf32>
    %175 = arith.subf %171, %174 : vector<8x7xf32>
    %176 = math.exp %175 : vector<8x7xf32>
    %cst_88 = arith.constant dense<0.000000e+00> : vector<8xf32>
    %177 = vector.multi_reduction <add>, %176, %cst_88 [1] : vector<8x7xf32> to vector<8xf32>
    %178 = vector.shape_cast %177 : vector<8xf32> to vector<8x1xf32>
    %179 = tpu.reciprocal %178 {approx = true} : vector<8x1xf32> -> vector<8x1xf32>
    %180 = vector.broadcast %179 : vector<8x1xf32> to vector<8x7xf32>
    %181 = arith.mulf %176, %180 : vector<8x7xf32>
    %cst_89 = arith.constant dense<0.000000e+00> : vector<8x8xf32>
    %182 = tpu.matmul %181, %168, %cst_89 {dimension_numbers = #tpu.dot_dimension_numbers<[1], [0], [0], [1], [0, 0, 1, 1], [], []>} : vector<8x7xf32>, vector<7x8xf32>, vector<8x8xf32> -> vector<8x8xf32>
    %183 = vector.extract_strided_slice %139 {offsets = [0, 16], sizes = [8, 8], strides = [1, 1]} : vector<8x32xf32> to vector<8x8xf32>
    %184 = vector.extract_strided_slice %147 {offsets = [0, 16], sizes = [7, 8], strides = [1, 1]} : vector<7x32xf32> to vector<7x8xf32>
    %185 = vector.extract_strided_slice %148 {offsets = [0, 16], sizes = [7, 8], strides = [1, 1]} : vector<7x32xf32> to vector<7x8xf32>
    %cst_90 = arith.constant dense<0.000000e+00> : vector<8x7xf32>
    %186 = tpu.matmul %183, %184, %cst_90 {dimension_numbers = #tpu.dot_dimension_numbers<[1], [1], [0], [0], [0, 0, 1, 0], [], []>} : vector<8x8xf32>, vector<7x8xf32>, vector<8x7xf32> -> vector<8x7xf32>
    %cst_91 = arith.constant 0.353553385 : f32
    %187 = vector.broadcast %cst_91 : f32 to vector<8x7xf32>
    %188 = arith.mulf %186, %187 : vector<8x7xf32>
    %cst_92 = arith.constant dense<0xFF800000> : vector<8xf32>
    %189 = vector.multi_reduction <maximumf>, %188, %cst_92 [1] : vector<8x7xf32> to vector<8xf32>
    %190 = vector.shape_cast %189 : vector<8xf32> to vector<8x1xf32>
    %191 = vector.broadcast %190 : vector<8x1xf32> to vector<8x7xf32>
    %192 = arith.subf %188, %191 : vector<8x7xf32>
    %193 = math.exp %192 : vector<8x7xf32>
    %cst_93 = arith.constant dense<0.000000e+00> : vector<8xf32>
    %194 = vector.multi_reduction <add>, %193, %cst_93 [1] : vector<8x7xf32> to vector<8xf32>
    %195 = vector.shape_cast %194 : vector<8xf32> to vector<8x1xf32>
    %196 = tpu.reciprocal %195 {approx = true} : vector<8x1xf32> -> vector<8x1xf32>
    %197 = vector.broadcast %196 : vector<8x1xf32> to vector<8x7xf32>
    %198 = arith.mulf %193, %197 : vector<8x7xf32>
    %cst_94 = arith.constant dense<0.000000e+00> : vector<8x8xf32>
    %199 = tpu.matmul %198, %185, %cst_94 {dimension_numbers = #tpu.dot_dimension_numbers<[1], [0], [0], [1], [0, 0, 1, 1], [], []>} : vector<8x7xf32>, vector<7x8xf32>, vector<8x8xf32> -> vector<8x8xf32>
    %200 = vector.extract_strided_slice %139 {offsets = [0, 24], sizes = [8, 8], strides = [1, 1]} : vector<8x32xf32> to vector<8x8xf32>
    %201 = vector.extract_strided_slice %147 {offsets = [0, 24], sizes = [7, 8], strides = [1, 1]} : vector<7x32xf32> to vector<7x8xf32>
    %202 = vector.extract_strided_slice %148 {offsets = [0, 24], sizes = [7, 8], strides = [1, 1]} : vector<7x32xf32> to vector<7x8xf32>
    %cst_95 = arith.constant dense<0.000000e+00> : vector<8x7xf32>
    %203 = tpu.matmul %200, %201, %cst_95 {dimension_numbers = #tpu.dot_dimension_numbers<[1], [1], [0], [0], [0, 0, 1, 0], [], []>} : vector<8x8xf32>, vector<7x8xf32>, vector<8x7xf32> -> vector<8x7xf32>
    %cst_96 = arith.constant 0.353553385 : f32
    %204 = vector.broadcast %cst_96 : f32 to vector<8x7xf32>
    %205 = arith.mulf %203, %204 : vector<8x7xf32>
    %cst_97 = arith.constant dense<0xFF800000> : vector<8xf32>
    %206 = vector.multi_reduction <maximumf>, %205, %cst_97 [1] : vector<8x7xf32> to vector<8xf32>
    %207 = vector.shape_cast %206 : vector<8xf32> to vector<8x1xf32>
    %208 = vector.broadcast %207 : vector<8x1xf32> to vector<8x7xf32>
    %209 = arith.subf %205, %208 : vector<8x7xf32>
    %210 = math.exp %209 : vector<8x7xf32>
    %cst_98 = arith.constant dense<0.000000e+00> : vector<8xf32>
    %211 = vector.multi_reduction <add>, %210, %cst_98 [1] : vector<8x7xf32> to vector<8xf32>
    %212 = vector.shape_cast %211 : vector<8xf32> to vector<8x1xf32>
    %213 = tpu.reciprocal %212 {approx = true} : vector<8x1xf32> -> vector<8x1xf32>
    %214 = vector.broadcast %213 : vector<8x1xf32> to vector<8x7xf32>
    %215 = arith.mulf %210, %214 : vector<8x7xf32>
    %cst_99 = arith.constant dense<0.000000e+00> : vector<8x8xf32>
    %216 = tpu.matmul %215, %202, %cst_99 {dimension_numbers = #tpu.dot_dimension_numbers<[1], [0], [0], [1], [0, 0, 1, 1], [], []>} : vector<8x7xf32>, vector<7x8xf32>, vector<8x8xf32> -> vector<8x8xf32>
    %217 = tpu.concatenate %165, %182, %199, %216 in 1 : vector<8x8xf32>, vector<8x8xf32>, vector<8x8xf32>, vector<8x8xf32> -> vector<8x32xf32>
    %c0_100 = arith.constant 0 : index
    %c0_101 = arith.constant 0 : index
    %c0_102 = arith.constant 0 : index
    %218 = vector.load %arg23[%c0_100, %c0_101, %c0_102] : memref<1x32x32xf32, #tpu.memory_space<vmem>>, vector<1x32x32xf32>
    %219 = vector.shape_cast %218 : vector<1x32x32xf32> to vector<32x32xf32>
    %cst_103 = arith.constant dense<0.000000e+00> : vector<8x32xf32>
    %220 = tpu.matmul %217, %219, %cst_103 {dimension_numbers = #tpu.dot_dimension_numbers<[1], [0], [0], [1], [0, 0, 1, 1], [], []>} : vector<8x32xf32>, vector<32x32xf32>, vector<8x32xf32> -> vector<8x32xf32>
    %c0_104 = arith.constant 0 : index
    %c0_105 = arith.constant 0 : index
    %c0_106 = arith.constant 0 : index
    %221 = vector.load %arg20[%c0_104, %c0_105, %c0_106] : memref<1x1x32xf32, #tpu.memory_space<vmem>>, vector<1x1x32xf32>
    %222 = vector.shape_cast %221 : vector<1x1x32xf32> to vector<1x32xf32>
    %223 = vector.broadcast %222 : vector<1x32xf32> to vector<8x32xf32>
    %224 = arith.addf %220, %223 : vector<8x32xf32>
    %c0_107 = arith.constant 0 : index
    %c0_108 = arith.constant 0 : index
    %c0_109 = arith.constant 0 : index
    %225 = vector.load %arg36[%c0_107, %c0_108, %c0_109] : memref<1x32x32xf32, #tpu.memory_space<vmem>>, vector<1x32x32xf32>
    %226 = vector.shape_cast %225 : vector<1x32x32xf32> to vector<32x32xf32>
    %cst_110 = arith.constant dense<0.000000e+00> : vector<8x32xf32>
    %227 = tpu.matmul %224, %226, %cst_110 {dimension_numbers = #tpu.dot_dimension_numbers<[1], [0], [0], [1], [0, 0, 1, 1], [], []>} : vector<8x32xf32>, vector<32x32xf32>, vector<8x32xf32> -> vector<8x32xf32>
    %228 = arith.addf %130, %227 : vector<8x32xf32>
    %c0_111 = arith.constant 0 : index
    %c0_112 = arith.constant 0 : index
    %c0_113 = arith.constant 0 : index
    %229 = vector.load %arg5[%c0_111, %c0_112, %c0_113] : memref<1x4x32xf32, #tpu.memory_space<vmem>>, vector<1x4x32xf32>
    %230 = vector.shape_cast %229 : vector<1x4x32xf32> to vector<4x32xf32>
    %c0_114 = arith.constant 0 : index
    %c0_115 = arith.constant 0 : index
    %c0_116 = arith.constant 0 : index
    %231 = vector.load %arg12[%c0_114, %c0_115, %c0_116] : memref<1x32x32xf32, #tpu.memory_space<vmem>>, vector<1x32x32xf32>
    %232 = vector.shape_cast %231 : vector<1x32x32xf32> to vector<32x32xf32>
    %cst_117 = arith.constant dense<0.000000e+00> : vector<8x32xf32>
    %233 = tpu.matmul %29, %232, %cst_117 {dimension_numbers = #tpu.dot_dimension_numbers<[1], [0], [0], [1], [0, 0, 1, 1], [], []>} : vector<8x32xf32>, vector<32x32xf32>, vector<8x32xf32> -> vector<8x32xf32>
    %c0_118 = arith.constant 0 : index
    %c0_119 = arith.constant 0 : index
    %c0_120 = arith.constant 0 : index
    %234 = vector.load %arg9[%c0_118, %c0_119, %c0_120] : memref<1x1x32xf32, #tpu.memory_space<vmem>>, vector<1x1x32xf32>
    %235 = vector.shape_cast %234 : vector<1x1x32xf32> to vector<1x32xf32>
    %236 = vector.broadcast %235 : vector<1x32xf32> to vector<8x32xf32>
    %237 = arith.addf %233, %236 : vector<8x32xf32>
    %c0_121 = arith.constant 0 : index
    %c0_122 = arith.constant 0 : index
    %c0_123 = arith.constant 0 : index
    %238 = vector.load %arg10[%c0_121, %c0_122, %c0_123] : memref<1x32x64xf32, #tpu.memory_space<vmem>>, vector<1x32x64xf32>
    %239 = vector.shape_cast %238 : vector<1x32x64xf32> to vector<32x64xf32>
    %cst_124 = arith.constant dense<0.000000e+00> : vector<4x64xf32>
    %240 = tpu.matmul %230, %239, %cst_124 {dimension_numbers = #tpu.dot_dimension_numbers<[1], [0], [0], [1], [0, 0, 1, 1], [], []>} : vector<4x32xf32>, vector<32x64xf32>, vector<4x64xf32> -> vector<4x64xf32>
    %c0_125 = arith.constant 0 : index
    %c0_126 = arith.constant 0 : index
    %c0_127 = arith.constant 0 : index
    %241 = vector.load %arg7[%c0_125, %c0_126, %c0_127] : memref<1x1x64xf32, #tpu.memory_space<vmem>>, vector<1x1x64xf32>
    %242 = vector.shape_cast %241 : vector<1x1x64xf32> to vector<1x64xf32>
    %243 = vector.broadcast %242 : vector<1x64xf32> to vector<4x64xf32>
    %244 = arith.addf %240, %243 : vector<4x64xf32>
    %245 = vector.extract_strided_slice %244 {offsets = [0, 0], sizes = [4, 32], strides = [1, 1]} : vector<4x64xf32> to vector<4x32xf32>
    %246 = vector.extract_strided_slice %244 {offsets = [0, 32], sizes = [4, 32], strides = [1, 1]} : vector<4x64xf32> to vector<4x32xf32>
    %247 = vector.extract_strided_slice %237 {offsets = [0, 0], sizes = [8, 8], strides = [1, 1]} : vector<8x32xf32> to vector<8x8xf32>
    %248 = vector.extract_strided_slice %245 {offsets = [0, 0], sizes = [4, 8], strides = [1, 1]} : vector<4x32xf32> to vector<4x8xf32>
    %249 = vector.extract_strided_slice %246 {offsets = [0, 0], sizes = [4, 8], strides = [1, 1]} : vector<4x32xf32> to vector<4x8xf32>
    %cst_128 = arith.constant dense<0.000000e+00> : vector<8x4xf32>
    %250 = tpu.matmul %247, %248, %cst_128 {dimension_numbers = #tpu.dot_dimension_numbers<[1], [1], [0], [0], [0, 0, 1, 0], [], []>} : vector<8x8xf32>, vector<4x8xf32>, vector<8x4xf32> -> vector<8x4xf32>
    %cst_129 = arith.constant 0.353553385 : f32
    %251 = vector.broadcast %cst_129 : f32 to vector<8x4xf32>
    %252 = arith.mulf %250, %251 : vector<8x4xf32>
    %cst_130 = arith.constant dense<0xFF800000> : vector<8xf32>
    %253 = vector.multi_reduction <maximumf>, %252, %cst_130 [1] : vector<8x4xf32> to vector<8xf32>
    %254 = vector.shape_cast %253 : vector<8xf32> to vector<8x1xf32>
    %255 = vector.broadcast %254 : vector<8x1xf32> to vector<8x4xf32>
    %256 = arith.subf %252, %255 : vector<8x4xf32>
    %257 = math.exp %256 : vector<8x4xf32>
    %cst_131 = arith.constant dense<0.000000e+00> : vector<8xf32>
    %258 = vector.multi_reduction <add>, %257, %cst_131 [1] : vector<8x4xf32> to vector<8xf32>
    %259 = vector.shape_cast %258 : vector<8xf32> to vector<8x1xf32>
    %260 = tpu.reciprocal %259 {approx = true} : vector<8x1xf32> -> vector<8x1xf32>
    %261 = vector.broadcast %260 : vector<8x1xf32> to vector<8x4xf32>
    %262 = arith.mulf %257, %261 : vector<8x4xf32>
    %cst_132 = arith.constant dense<0.000000e+00> : vector<8x8xf32>
    %263 = tpu.matmul %262, %249, %cst_132 {dimension_numbers = #tpu.dot_dimension_numbers<[1], [0], [0], [1], [0, 0, 1, 1], [], []>} : vector<8x4xf32>, vector<4x8xf32>, vector<8x8xf32> -> vector<8x8xf32>
    %264 = vector.extract_strided_slice %237 {offsets = [0, 8], sizes = [8, 8], strides = [1, 1]} : vector<8x32xf32> to vector<8x8xf32>
    %265 = vector.extract_strided_slice %245 {offsets = [0, 8], sizes = [4, 8], strides = [1, 1]} : vector<4x32xf32> to vector<4x8xf32>
    %266 = vector.extract_strided_slice %246 {offsets = [0, 8], sizes = [4, 8], strides = [1, 1]} : vector<4x32xf32> to vector<4x8xf32>
    %cst_133 = arith.constant dense<0.000000e+00> : vector<8x4xf32>
    %267 = tpu.matmul %264, %265, %cst_133 {dimension_numbers = #tpu.dot_dimension_numbers<[1], [1], [0], [0], [0, 0, 1, 0], [], []>} : vector<8x8xf32>, vector<4x8xf32>, vector<8x4xf32> -> vector<8x4xf32>
    %cst_134 = arith.constant 0.353553385 : f32
    %268 = vector.broadcast %cst_134 : f32 to vector<8x4xf32>
    %269 = arith.mulf %267, %268 : vector<8x4xf32>
    %cst_135 = arith.constant dense<0xFF800000> : vector<8xf32>
    %270 = vector.multi_reduction <maximumf>, %269, %cst_135 [1] : vector<8x4xf32> to vector<8xf32>
    %271 = vector.shape_cast %270 : vector<8xf32> to vector<8x1xf32>
    %272 = vector.broadcast %271 : vector<8x1xf32> to vector<8x4xf32>
    %273 = arith.subf %269, %272 : vector<8x4xf32>
    %274 = math.exp %273 : vector<8x4xf32>
    %cst_136 = arith.constant dense<0.000000e+00> : vector<8xf32>
    %275 = vector.multi_reduction <add>, %274, %cst_136 [1] : vector<8x4xf32> to vector<8xf32>
    %276 = vector.shape_cast %275 : vector<8xf32> to vector<8x1xf32>
    %277 = tpu.reciprocal %276 {approx = true} : vector<8x1xf32> -> vector<8x1xf32>
    %278 = vector.broadcast %277 : vector<8x1xf32> to vector<8x4xf32>
    %279 = arith.mulf %274, %278 : vector<8x4xf32>
    %cst_137 = arith.constant dense<0.000000e+00> : vector<8x8xf32>
    %280 = tpu.matmul %279, %266, %cst_137 {dimension_numbers = #tpu.dot_dimension_numbers<[1], [0], [0], [1], [0, 0, 1, 1], [], []>} : vector<8x4xf32>, vector<4x8xf32>, vector<8x8xf32> -> vector<8x8xf32>
    %281 = vector.extract_strided_slice %237 {offsets = [0, 16], sizes = [8, 8], strides = [1, 1]} : vector<8x32xf32> to vector<8x8xf32>
    %282 = vector.extract_strided_slice %245 {offsets = [0, 16], sizes = [4, 8], strides = [1, 1]} : vector<4x32xf32> to vector<4x8xf32>
    %283 = vector.extract_strided_slice %246 {offsets = [0, 16], sizes = [4, 8], strides = [1, 1]} : vector<4x32xf32> to vector<4x8xf32>
    %cst_138 = arith.constant dense<0.000000e+00> : vector<8x4xf32>
    %284 = tpu.matmul %281, %282, %cst_138 {dimension_numbers = #tpu.dot_dimension_numbers<[1], [1], [0], [0], [0, 0, 1, 0], [], []>} : vector<8x8xf32>, vector<4x8xf32>, vector<8x4xf32> -> vector<8x4xf32>
    %cst_139 = arith.constant 0.353553385 : f32
    %285 = vector.broadcast %cst_139 : f32 to vector<8x4xf32>
    %286 = arith.mulf %284, %285 : vector<8x4xf32>
    %cst_140 = arith.constant dense<0xFF800000> : vector<8xf32>
    %287 = vector.multi_reduction <maximumf>, %286, %cst_140 [1] : vector<8x4xf32> to vector<8xf32>
    %288 = vector.shape_cast %287 : vector<8xf32> to vector<8x1xf32>
    %289 = vector.broadcast %288 : vector<8x1xf32> to vector<8x4xf32>
    %290 = arith.subf %286, %289 : vector<8x4xf32>
    %291 = math.exp %290 : vector<8x4xf32>
    %cst_141 = arith.constant dense<0.000000e+00> : vector<8xf32>
    %292 = vector.multi_reduction <add>, %291, %cst_141 [1] : vector<8x4xf32> to vector<8xf32>
    %293 = vector.shape_cast %292 : vector<8xf32> to vector<8x1xf32>
    %294 = tpu.reciprocal %293 {approx = true} : vector<8x1xf32> -> vector<8x1xf32>
    %295 = vector.broadcast %294 : vector<8x1xf32> to vector<8x4xf32>
    %296 = arith.mulf %291, %295 : vector<8x4xf32>
    %cst_142 = arith.constant dense<0.000000e+00> : vector<8x8xf32>
    %297 = tpu.matmul %296, %283, %cst_142 {dimension_numbers = #tpu.dot_dimension_numbers<[1], [0], [0], [1], [0, 0, 1, 1], [], []>} : vector<8x4xf32>, vector<4x8xf32>, vector<8x8xf32> -> vector<8x8xf32>
    %298 = vector.extract_strided_slice %237 {offsets = [0, 24], sizes = [8, 8], strides = [1, 1]} : vector<8x32xf32> to vector<8x8xf32>
    %299 = vector.extract_strided_slice %245 {offsets = [0, 24], sizes = [4, 8], strides = [1, 1]} : vector<4x32xf32> to vector<4x8xf32>
    %300 = vector.extract_strided_slice %246 {offsets = [0, 24], sizes = [4, 8], strides = [1, 1]} : vector<4x32xf32> to vector<4x8xf32>
    %cst_143 = arith.constant dense<0.000000e+00> : vector<8x4xf32>
    %301 = tpu.matmul %298, %299, %cst_143 {dimension_numbers = #tpu.dot_dimension_numbers<[1], [1], [0], [0], [0, 0, 1, 0], [], []>} : vector<8x8xf32>, vector<4x8xf32>, vector<8x4xf32> -> vector<8x4xf32>
    %cst_144 = arith.constant 0.353553385 : f32
    %302 = vector.broadcast %cst_144 : f32 to vector<8x4xf32>
    %303 = arith.mulf %301, %302 : vector<8x4xf32>
    %cst_145 = arith.constant dense<0xFF800000> : vector<8xf32>
    %304 = vector.multi_reduction <maximumf>, %303, %cst_145 [1] : vector<8x4xf32> to vector<8xf32>
    %305 = vector.shape_cast %304 : vector<8xf32> to vector<8x1xf32>
    %306 = vector.broadcast %305 : vector<8x1xf32> to vector<8x4xf32>
    %307 = arith.subf %303, %306 : vector<8x4xf32>
    %308 = math.exp %307 : vector<8x4xf32>
    %cst_146 = arith.constant dense<0.000000e+00> : vector<8xf32>
    %309 = vector.multi_reduction <add>, %308, %cst_146 [1] : vector<8x4xf32> to vector<8xf32>
    %310 = vector.shape_cast %309 : vector<8xf32> to vector<8x1xf32>
    %311 = tpu.reciprocal %310 {approx = true} : vector<8x1xf32> -> vector<8x1xf32>
    %312 = vector.broadcast %311 : vector<8x1xf32> to vector<8x4xf32>
    %313 = arith.mulf %308, %312 : vector<8x4xf32>
    %cst_147 = arith.constant dense<0.000000e+00> : vector<8x8xf32>
    %314 = tpu.matmul %313, %300, %cst_147 {dimension_numbers = #tpu.dot_dimension_numbers<[1], [0], [0], [1], [0, 0, 1, 1], [], []>} : vector<8x4xf32>, vector<4x8xf32>, vector<8x8xf32> -> vector<8x8xf32>
    %315 = tpu.concatenate %263, %280, %297, %314 in 1 : vector<8x8xf32>, vector<8x8xf32>, vector<8x8xf32>, vector<8x8xf32> -> vector<8x32xf32>
    %c0_148 = arith.constant 0 : index
    %c0_149 = arith.constant 0 : index
    %c0_150 = arith.constant 0 : index
    %316 = vector.load %arg11[%c0_148, %c0_149, %c0_150] : memref<1x32x32xf32, #tpu.memory_space<vmem>>, vector<1x32x32xf32>
    %317 = vector.shape_cast %316 : vector<1x32x32xf32> to vector<32x32xf32>
    %cst_151 = arith.constant dense<0.000000e+00> : vector<8x32xf32>
    %318 = tpu.matmul %315, %317, %cst_151 {dimension_numbers = #tpu.dot_dimension_numbers<[1], [0], [0], [1], [0, 0, 1, 1], [], []>} : vector<8x32xf32>, vector<32x32xf32>, vector<8x32xf32> -> vector<8x32xf32>
    %c0_152 = arith.constant 0 : index
    %c0_153 = arith.constant 0 : index
    %c0_154 = arith.constant 0 : index
    %319 = vector.load %arg8[%c0_152, %c0_153, %c0_154] : memref<1x1x32xf32, #tpu.memory_space<vmem>>, vector<1x1x32xf32>
    %320 = vector.shape_cast %319 : vector<1x1x32xf32> to vector<1x32xf32>
    %321 = vector.broadcast %320 : vector<1x32xf32> to vector<8x32xf32>
    %322 = arith.addf %318, %321 : vector<8x32xf32>
    %c0_155 = arith.constant 0 : index
    %c0_156 = arith.constant 0 : index
    %c0_157 = arith.constant 0 : index
    %323 = vector.load %arg34[%c0_155, %c0_156, %c0_157] : memref<1x32x32xf32, #tpu.memory_space<vmem>>, vector<1x32x32xf32>
    %324 = vector.shape_cast %323 : vector<1x32x32xf32> to vector<32x32xf32>
    %cst_158 = arith.constant dense<0.000000e+00> : vector<8x32xf32>
    %325 = tpu.matmul %322, %324, %cst_158 {dimension_numbers = #tpu.dot_dimension_numbers<[1], [0], [0], [1], [0, 0, 1, 1], [], []>} : vector<8x32xf32>, vector<32x32xf32>, vector<8x32xf32> -> vector<8x32xf32>
    %326 = arith.addf %228, %325 : vector<8x32xf32>
    %327 = arith.addf %3, %326 : vector<8x32xf32>
    %c0_159 = arith.constant 0 : index
    %c0_160 = arith.constant 0 : index
    %c0_161 = arith.constant 0 : index
    %328 = vector.load %arg32[%c0_159, %c0_160, %c0_161] : memref<1x1x32xf32, #tpu.memory_space<vmem>>, vector<1x1x32xf32>
    %329 = vector.shape_cast %328 : vector<1x1x32xf32> to vector<1x32xf32>
    %c0_162 = arith.constant 0 : index
    %c0_163 = arith.constant 0 : index
    %c0_164 = arith.constant 0 : index
    %330 = vector.load %arg31[%c0_162, %c0_163, %c0_164] : memref<1x1x32xf32, #tpu.memory_space<vmem>>, vector<1x1x32xf32>
    %331 = vector.shape_cast %330 : vector<1x1x32xf32> to vector<1x32xf32>
    %cst_165 = arith.constant dense<0.000000e+00> : vector<8xf32>
    %332 = vector.multi_reduction <add>, %327, %cst_165 [1] : vector<8x32xf32> to vector<8xf32>
    %333 = vector.shape_cast %332 : vector<8xf32> to vector<8x1xf32>
    %cst_166 = arith.constant 3.200000e+01 : f32
    %334 = vector.broadcast %cst_166 : f32 to vector<8x1xf32>
    %335 = arith.divf %333, %334 : vector<8x1xf32>
    %336 = vector.broadcast %335 : vector<8x1xf32> to vector<8x32xf32>
    %337 = arith.subf %327, %336 : vector<8x32xf32>
    %338 = arith.mulf %337, %337 : vector<8x32xf32>
    %cst_167 = arith.constant dense<0.000000e+00> : vector<8xf32>
    %339 = vector.multi_reduction <add>, %338, %cst_167 [1] : vector<8x32xf32> to vector<8xf32>
    %340 = vector.shape_cast %339 : vector<8xf32> to vector<8x1xf32>
    %cst_168 = arith.constant 3.200000e+01 : f32
    %341 = vector.broadcast %cst_168 : f32 to vector<8x1xf32>
    %342 = arith.divf %340, %341 : vector<8x1xf32>
    %343 = vector.broadcast %335 : vector<8x1xf32> to vector<8x32xf32>
    %344 = arith.subf %327, %343 : vector<8x32xf32>
    %cst_169 = arith.constant 9.99999974E-6 : f32
    %345 = vector.broadcast %cst_169 : f32 to vector<8x1xf32>
    %346 = arith.addf %342, %345 : vector<8x1xf32>
    %347 = math.rsqrt %346 : vector<8x1xf32>
    %348 = vector.broadcast %347 : vector<8x1xf32> to vector<8x32xf32>
    %349 = arith.mulf %344, %348 : vector<8x32xf32>
    %350 = vector.broadcast %329 : vector<1x32xf32> to vector<8x32xf32>
    %351 = arith.mulf %349, %350 : vector<8x32xf32>
    %352 = vector.broadcast %331 : vector<1x32xf32> to vector<8x32xf32>
    %353 = arith.addf %351, %352 : vector<8x32xf32>
    %c0_170 = arith.constant 0 : index
    %c0_171 = arith.constant 0 : index
    %c0_172 = arith.constant 0 : index
    %354 = vector.load %arg26[%c0_170, %c0_171, %c0_172] : memref<1x32x64xf32, #tpu.memory_space<vmem>>, vector<1x32x64xf32>
    %355 = vector.shape_cast %354 : vector<1x32x64xf32> to vector<32x64xf32>
    %cst_173 = arith.constant dense<0.000000e+00> : vector<8x64xf32>
    %356 = tpu.matmul %353, %355, %cst_173 {dimension_numbers = #tpu.dot_dimension_numbers<[1], [0], [0], [1], [0, 0, 1, 1], [], []>} : vector<8x32xf32>, vector<32x64xf32>, vector<8x64xf32> -> vector<8x64xf32>
    %c0_174 = arith.constant 0 : index
    %c0_175 = arith.constant 0 : index
    %c0_176 = arith.constant 0 : index
    %357 = vector.load %arg25[%c0_174, %c0_175, %c0_176] : memref<1x1x64xf32, #tpu.memory_space<vmem>>, vector<1x1x64xf32>
    %358 = vector.shape_cast %357 : vector<1x1x64xf32> to vector<1x64xf32>
    %359 = vector.broadcast %358 : vector<1x64xf32> to vector<8x64xf32>
    %360 = arith.addf %356, %359 : vector<8x64xf32>
    %cst_177 = arith.constant 0.000000e+00 : f32
    %361 = vector.broadcast %cst_177 : f32 to vector<8x64xf32>
    %362 = arith.maximumf %360, %361 : vector<8x64xf32>
    %c0_178 = arith.constant 0 : index
    %c0_179 = arith.constant 0 : index
    %c0_180 = arith.constant 0 : index
    %363 = vector.load %arg28[%c0_178, %c0_179, %c0_180] : memref<1x64x32xf32, #tpu.memory_space<vmem>>, vector<1x64x32xf32>
    %364 = vector.shape_cast %363 : vector<1x64x32xf32> to vector<64x32xf32>
    %cst_181 = arith.constant dense<0.000000e+00> : vector<8x32xf32>
    %365 = tpu.matmul %362, %364, %cst_181 {dimension_numbers = #tpu.dot_dimension_numbers<[1], [0], [0], [1], [0, 0, 1, 1], [], []>} : vector<8x64xf32>, vector<64x32xf32>, vector<8x32xf32> -> vector<8x32xf32>
    %366 = arith.addf %353, %365 : vector<8x32xf32>
    %c0_182 = arith.constant 0 : index
    %c0_183 = arith.constant 0 : index
    %c0_184 = arith.constant 0 : index
    %367 = vector.load %arg27[%c0_182, %c0_183, %c0_184] : memref<1x1x32xf32, #tpu.memory_space<vmem>>, vector<1x1x32xf32>
    %368 = vector.shape_cast %367 : vector<1x1x32xf32> to vector<1x32xf32>
    %369 = vector.broadcast %368 : vector<1x32xf32> to vector<8x32xf32>
    %370 = arith.addf %366, %369 : vector<8x32xf32>
    %c3_i32 = arith.constant 3 : i32
    %371 = arith.cmpi slt, %arg1, %c3_i32 : i32
    %372 = arith.extui %371 : i1 to i32
    %c0_i32_185 = arith.constant 0 : i32
    %373 = arith.cmpi ne, %372, %c0_i32_185 : i32
    scf.if %373 {
      %c0_191 = arith.constant 0 : index
      %c0_192 = arith.constant 0 : index
      %383 = vector.load %arg40[%c0_191, %c0_192] : memref<8x32xf32, #tpu.memory_space<vmem>>, vector<8x32xf32>
      tpu.vector_store %arg40[%c0_191, %c0_192], %370 {strides = array<i32>} : memref<8x32xf32, #tpu.memory_space<vmem>>, vector<8x32xf32>,
    } else {
    }
    %c3_i32_186 = arith.constant 3 : i32
    %374 = arith.cmpi eq, %arg1, %c3_i32_186 : i32
    %375 = arith.extui %374 : i1 to i32
    %c0_i32_187 = arith.constant 0 : i32
    %376 = arith.cmpi ne, %375, %c0_i32_187 : i32
    scf.if %376 {
      %383 = arith.index_cast %arg0 : i32 to index
      %c0_191 = arith.constant 0 : index
      %384 = memref.load %arg6[%383, %c0_191] : memref<2x5xf32, #tpu.memory_space<smem>>
      %385 = vector.broadcast %384 : f32 to vector<8x32xf32>
      %386 = arith.mulf %385, %370 : vector<8x32xf32>
      %c0_192 = arith.constant 0 : index
      %c0_193 = arith.constant 0 : index
      %387 = vector.load %arg41[%c0_192, %c0_193] : memref<8x32xf32, #tpu.memory_space<vmem>>, vector<8x32xf32>
      tpu.vector_store %arg41[%c0_192, %c0_193], %386 {strides = array<i32>} : memref<8x32xf32, #tpu.memory_space<vmem>>, vector<8x32xf32>,
    } else {
    }
    %c3_i32_188 = arith.constant 3 : i32
    %377 = arith.cmpi sgt, %arg1, %c3_i32_188 : i32
    %378 = arith.extui %377 : i1 to i32
    %c0_i32_189 = arith.constant 0 : i32
    %379 = arith.cmpi ne, %378, %c0_i32_189 : i32
    scf.if %379 {
      %c0_191 = arith.constant 0 : index
      %c0_192 = arith.constant 0 : index
      %383 = vector.load %arg41[%c0_191, %c0_192] : memref<8x32xf32, #tpu.memory_space<vmem>>, vector<8x32xf32>
      %c3_i32_193 = arith.constant 3 : i32
      %384 = arith.subi %arg1, %c3_i32_193 : i32
      %385 = arith.index_cast %arg0 : i32 to index
      %386 = arith.index_cast %384 : i32 to index
      %387 = memref.load %arg6[%385, %386] : memref<2x5xf32, #tpu.memory_space<smem>>
      %388 = vector.broadcast %387 : f32 to vector<8x32xf32>
      %389 = arith.mulf %388, %370 : vector<8x32xf32>
      %390 = arith.addf %383, %389 : vector<8x32xf32>
      %c0_194 = arith.constant 0 : index
      %c0_195 = arith.constant 0 : index
      %391 = vector.load %arg41[%c0_194, %c0_195] : memref<8x32xf32, #tpu.memory_space<vmem>>, vector<8x32xf32>
      tpu.vector_store %arg41[%c0_194, %c0_195], %390 {strides = array<i32>} : memref<8x32xf32, #tpu.memory_space<vmem>>, vector<8x32xf32>,
    } else {
    }
    %c7_i32 = arith.constant 7 : i32
    %380 = arith.cmpi eq, %arg1, %c7_i32 : i32
    %381 = arith.extui %380 : i1 to i32
    %c0_i32_190 = arith.constant 0 : i32
    %382 = arith.cmpi ne, %381, %c0_i32_190 : i32
    scf.if %382 {
      %c0_191 = arith.constant 0 : index
      %c0_192 = arith.constant 0 : index
      %383 = vector.load %arg41[%c0_191, %c0_192] : memref<8x32xf32, #tpu.memory_space<vmem>>, vector<8x32xf32>
      %cst_193 = arith.constant 2.000000e-01 : f32
      %384 = vector.broadcast %cst_193 : f32 to vector<8x32xf32>
      %385 = arith.mulf %383, %384 : vector<8x32xf32>
      %c0_194 = arith.constant 0 : index
      %c0_195 = arith.constant 0 : index
      %386 = vector.load %arg37[%c0_194, %c0_195] : memref<32x128xf32, #tpu.memory_space<vmem>>, vector<32x128xf32>
      %cst_196 = arith.constant dense<0.000000e+00> : vector<8x128xf32>
      %387 = tpu.matmul %385, %386, %cst_196 {dimension_numbers = #tpu.dot_dimension_numbers<[1], [0], [0], [1], [0, 0, 1, 1], [], []>} : vector<8x32xf32>, vector<32x128xf32>, vector<8x128xf32> -> vector<8x128xf32>
      %c0_197 = arith.constant 0 : index
      %c0_198 = arith.constant 0 : index
      %388 = vector.load %arg38[%c0_197, %c0_198] : memref<1x128xf32, #tpu.memory_space<vmem>>, vector<1x128xf32>
      %389 = vector.broadcast %388 : vector<1x128xf32> to vector<8x128xf32>
      %390 = arith.addf %387, %389 : vector<8x128xf32>
      %c0_199 = arith.constant 0 : index
      %c0_200 = arith.constant 0 : index
      %c0_201 = arith.constant 0 : index
      %391 = vector.load %arg39[%c0_199, %c0_200, %c0_201] : memref<1x8x128xf32, #tpu.memory_space<vmem>>, vector<1x8x128xf32>
      %392 = vector.shape_cast %391 : vector<1x8x128xf32> to vector<8x128xf32>
      %393 = vector.shape_cast %390 : vector<8x128xf32> to vector<1x8x128xf32>
      tpu.vector_store %arg39[%c0_199, %c0_200, %c0_201], %393 {strides = array<i32>} : memref<1x8x128xf32, #tpu.memory_space<vmem>>, vector<1x8x128xf32>,
    } else {
    }
    return
  }
  func.func @transform_0(%arg0: i32, %arg1: i32) -> (i32, i32, i32) {
    %c0_i32 = arith.constant 0 : i32
    %c0_i32_0 = arith.constant 0 : i32
    %c0_i32_1 = arith.constant 0 : i32
    return %arg0, %c0_i32, %c0_i32_0 : i32, i32, i32
  }
  func.func @transform_1(%arg0: i32, %arg1: i32) -> (i32, i32, i32) {
    %c0_i32 = arith.constant 0 : i32
    %c0_i32_0 = arith.constant 0 : i32
    %c0_i32_1 = arith.constant 0 : i32
    return %arg0, %c0_i32, %c0_i32_0 : i32, i32, i32
  }
  func.func @transform_2(%arg0: i32, %arg1: i32) -> (i32, i32, i32) {
    %c0_i32 = arith.constant 0 : i32
    %c0_i32_0 = arith.constant 0 : i32
    %c0_i32_1 = arith.constant 0 : i32
    return %arg0, %c0_i32, %c0_i32_0 : i32, i32, i32
  }
  func.func @transform_3(%arg0: i32, %arg1: i32) -> (i32, i32, i32) {
    %c0_i32 = arith.constant 0 : i32
    %c0_i32_0 = arith.constant 0 : i32
    %c0_i32_1 = arith.constant 0 : i32
    return %arg0, %c0_i32, %c0_i32_0 : i32, i32, i32
  }
  func.func @transform_4(%arg0: i32, %arg1: i32) -> (i32, i32) {
    %c0_i32 = arith.constant 0 : i32
    %c0_i32_0 = arith.constant 0 : i32
    %c0_i32_1 = arith.constant 0 : i32
    return %c0_i32, %c0_i32_0 : i32, i32
  }
  func.func @transform_5(%arg0: i32, %arg1: i32) -> (i32, i32, i32) {
    %c0_i32 = arith.constant 0 : i32
    %c0_i32_0 = arith.constant 0 : i32
    %c0_i32_1 = arith.constant 0 : i32
    return %arg1, %c0_i32, %c0_i32_0 : i32, i32, i32
  }
  func.func @transform_6(%arg0: i32, %arg1: i32) -> (i32, i32, i32) {
    %c0_i32 = arith.constant 0 : i32
    %c0_i32_0 = arith.constant 0 : i32
    %c0_i32_1 = arith.constant 0 : i32
    return %arg1, %c0_i32, %c0_i32_0 : i32, i32, i32
  }
  func.func @transform_7(%arg0: i32, %arg1: i32) -> (i32, i32, i32) {
    %c0_i32 = arith.constant 0 : i32
    %c0_i32_0 = arith.constant 0 : i32
    %c0_i32_1 = arith.constant 0 : i32
    return %arg1, %c0_i32, %c0_i32_0 : i32, i32, i32
  }
  func.func @transform_8(%arg0: i32, %arg1: i32) -> (i32, i32, i32) {
    %c0_i32 = arith.constant 0 : i32
    %c0_i32_0 = arith.constant 0 : i32
    %c0_i32_1 = arith.constant 0 : i32
    return %arg1, %c0_i32, %c0_i32_0 : i32, i32, i32
  }
  func.func @transform_9(%arg0: i32, %arg1: i32) -> (i32, i32, i32) {
    %c0_i32 = arith.constant 0 : i32
    %c0_i32_0 = arith.constant 0 : i32
    %c0_i32_1 = arith.constant 0 : i32
    return %arg1, %c0_i32, %c0_i32_0 : i32, i32, i32
  }
  func.func @transform_10(%arg0: i32, %arg1: i32) -> (i32, i32, i32) {
    %c0_i32 = arith.constant 0 : i32
    %c0_i32_0 = arith.constant 0 : i32
    %c0_i32_1 = arith.constant 0 : i32
    return %arg1, %c0_i32, %c0_i32_0 : i32, i32, i32
  }
  func.func @transform_11(%arg0: i32, %arg1: i32) -> (i32, i32, i32) {
    %c0_i32 = arith.constant 0 : i32
    %c0_i32_0 = arith.constant 0 : i32
    %c0_i32_1 = arith.constant 0 : i32
    return %arg1, %c0_i32, %c0_i32_0 : i32, i32, i32
  }
  func.func @transform_12(%arg0: i32, %arg1: i32) -> (i32, i32, i32) {
    %c0_i32 = arith.constant 0 : i32
    %c0_i32_0 = arith.constant 0 : i32
    %c0_i32_1 = arith.constant 0 : i32
    return %arg1, %c0_i32, %c0_i32_0 : i32, i32, i32
  }
  func.func @transform_13(%arg0: i32, %arg1: i32) -> (i32, i32, i32) {
    %c0_i32 = arith.constant 0 : i32
    %c0_i32_0 = arith.constant 0 : i32
    %c0_i32_1 = arith.constant 0 : i32
    return %arg1, %c0_i32, %c0_i32_0 : i32, i32, i32
  }
  func.func @transform_14(%arg0: i32, %arg1: i32) -> (i32, i32, i32) {
    %c0_i32 = arith.constant 0 : i32
    %c0_i32_0 = arith.constant 0 : i32
    %c0_i32_1 = arith.constant 0 : i32
    return %arg1, %c0_i32, %c0_i32_0 : i32, i32, i32
  }
  func.func @transform_15(%arg0: i32, %arg1: i32) -> (i32, i32, i32) {
    %c0_i32 = arith.constant 0 : i32
    %c0_i32_0 = arith.constant 0 : i32
    %c0_i32_1 = arith.constant 0 : i32
    return %arg1, %c0_i32, %c0_i32_0 : i32, i32, i32
  }
  func.func @transform_16(%arg0: i32, %arg1: i32) -> (i32, i32, i32) {
    %c0_i32 = arith.constant 0 : i32
    %c0_i32_0 = arith.constant 0 : i32
    %c0_i32_1 = arith.constant 0 : i32
    return %arg1, %c0_i32, %c0_i32_0 : i32, i32, i32
  }
  func.func @transform_17(%arg0: i32, %arg1: i32) -> (i32, i32, i32) {
    %c0_i32 = arith.constant 0 : i32
    %c0_i32_0 = arith.constant 0 : i32
    %c0_i32_1 = arith.constant 0 : i32
    return %arg1, %c0_i32, %c0_i32_0 : i32, i32, i32
  }
  func.func @transform_18(%arg0: i32, %arg1: i32) -> (i32, i32, i32) {
    %c0_i32 = arith.constant 0 : i32
    %c0_i32_0 = arith.constant 0 : i32
    %c0_i32_1 = arith.constant 0 : i32
    return %arg1, %c0_i32, %c0_i32_0 : i32, i32, i32
  }
  func.func @transform_19(%arg0: i32, %arg1: i32) -> (i32, i32, i32) {
    %c0_i32 = arith.constant 0 : i32
    %c0_i32_0 = arith.constant 0 : i32
    %c0_i32_1 = arith.constant 0 : i32
    return %arg1, %c0_i32, %c0_i32_0 : i32, i32, i32
  }
  func.func @transform_20(%arg0: i32, %arg1: i32) -> (i32, i32, i32) {
    %c0_i32 = arith.constant 0 : i32
    %c0_i32_0 = arith.constant 0 : i32
    %c0_i32_1 = arith.constant 0 : i32
    return %arg1, %c0_i32, %c0_i32_0 : i32, i32, i32
  }
  func.func @transform_21(%arg0: i32, %arg1: i32) -> (i32, i32, i32) {
    %c0_i32 = arith.constant 0 : i32
    %c0_i32_0 = arith.constant 0 : i32
    %c0_i32_1 = arith.constant 0 : i32
    return %arg1, %c0_i32, %c0_i32_0 : i32, i32, i32
  }
  func.func @transform_22(%arg0: i32, %arg1: i32) -> (i32, i32, i32) {
    %c0_i32 = arith.constant 0 : i32
    %c0_i32_0 = arith.constant 0 : i32
    %c0_i32_1 = arith.constant 0 : i32
    return %arg1, %c0_i32, %c0_i32_0 : i32, i32, i32
  }
  func.func @transform_23(%arg0: i32, %arg1: i32) -> (i32, i32, i32) {
    %c0_i32 = arith.constant 0 : i32
    %c0_i32_0 = arith.constant 0 : i32
    %c0_i32_1 = arith.constant 0 : i32
    return %arg1, %c0_i32, %c0_i32_0 : i32, i32, i32
  }
  func.func @transform_24(%arg0: i32, %arg1: i32) -> (i32, i32, i32) {
    %c0_i32 = arith.constant 0 : i32
    %c0_i32_0 = arith.constant 0 : i32
    %c0_i32_1 = arith.constant 0 : i32
    return %arg1, %c0_i32, %c0_i32_0 : i32, i32, i32
  }
  func.func @transform_25(%arg0: i32, %arg1: i32) -> (i32, i32, i32) {
    %c0_i32 = arith.constant 0 : i32
    %c0_i32_0 = arith.constant 0 : i32
    %c0_i32_1 = arith.constant 0 : i32
    return %arg1, %c0_i32, %c0_i32_0 : i32, i32, i32
  }
  func.func @transform_26(%arg0: i32, %arg1: i32) -> (i32, i32, i32) {
    %c0_i32 = arith.constant 0 : i32
    %c0_i32_0 = arith.constant 0 : i32
    %c0_i32_1 = arith.constant 0 : i32
    return %arg1, %c0_i32, %c0_i32_0 : i32, i32, i32
  }
  func.func @transform_27(%arg0: i32, %arg1: i32) -> (i32, i32, i32) {
    %c0_i32 = arith.constant 0 : i32
    %c0_i32_0 = arith.constant 0 : i32
    %c0_i32_1 = arith.constant 0 : i32
    return %arg1, %c0_i32, %c0_i32_0 : i32, i32, i32
  }
  func.func @transform_28(%arg0: i32, %arg1: i32) -> (i32, i32, i32) {
    %c0_i32 = arith.constant 0 : i32
    %c0_i32_0 = arith.constant 0 : i32
    %c0_i32_1 = arith.constant 0 : i32
    return %arg1, %c0_i32, %c0_i32_0 : i32, i32, i32
  }
  func.func @transform_29(%arg0: i32, %arg1: i32) -> (i32, i32, i32) {
    %c0_i32 = arith.constant 0 : i32
    %c0_i32_0 = arith.constant 0 : i32
    %c0_i32_1 = arith.constant 0 : i32
    return %arg1, %c0_i32, %c0_i32_0 : i32, i32, i32
  }
  func.func @transform_30(%arg0: i32, %arg1: i32) -> (i32, i32, i32) {
    %c0_i32 = arith.constant 0 : i32
    %c0_i32_0 = arith.constant 0 : i32
    %c0_i32_1 = arith.constant 0 : i32
    return %arg1, %c0_i32, %c0_i32_0 : i32, i32, i32
  }
  func.func @transform_31(%arg0: i32, %arg1: i32) -> (i32, i32, i32) {
    %c0_i32 = arith.constant 0 : i32
    %c0_i32_0 = arith.constant 0 : i32
    %c0_i32_1 = arith.constant 0 : i32
    return %arg1, %c0_i32, %c0_i32_0 : i32, i32, i32
  }
  func.func @transform_32(%arg0: i32, %arg1: i32) -> (i32, i32, i32) {
    %c0_i32 = arith.constant 0 : i32
    %c0_i32_0 = arith.constant 0 : i32
    %c0_i32_1 = arith.constant 0 : i32
    return %arg1, %c0_i32, %c0_i32_0 : i32, i32, i32
  }
  func.func @transform_33(%arg0: i32, %arg1: i32) -> (i32, i32, i32) {
    %c0_i32 = arith.constant 0 : i32
    %c0_i32_0 = arith.constant 0 : i32
    %c0_i32_1 = arith.constant 0 : i32
    return %arg1, %c0_i32, %c0_i32_0 : i32, i32, i32
  }
  func.func @transform_34(%arg0: i32, %arg1: i32) -> (i32, i32, i32) {
    %c0_i32 = arith.constant 0 : i32
    %c0_i32_0 = arith.constant 0 : i32
    %c0_i32_1 = arith.constant 0 : i32
    return %arg1, %c0_i32, %c0_i32_0 : i32, i32, i32
  }
  func.func @transform_35(%arg0: i32, %arg1: i32) -> (i32, i32) {
    %c0_i32 = arith.constant 0 : i32
    %c0_i32_0 = arith.constant 0 : i32
    %c0_i32_1 = arith.constant 0 : i32
    return %c0_i32, %c0_i32_0 : i32, i32
  }
  func.func @transform_36(%arg0: i32, %arg1: i32) -> (i32, i32) {
    %c0_i32 = arith.constant 0 : i32
    %c0_i32_0 = arith.constant 0 : i32
    %c0_i32_1 = arith.constant 0 : i32
    return %c0_i32, %c0_i32_0 : i32, i32
  }
  func.func @transform_37(%arg0: i32, %arg1: i32) -> (i32, i32, i32) {
    %c0_i32 = arith.constant 0 : i32
    %c0_i32_0 = arith.constant 0 : i32
    %c0_i32_1 = arith.constant 0 : i32
    return %arg0, %c0_i32, %c0_i32_0 : i32, i32, i32
  }
}

</mosaic_0001>

<bundles_post_ra>
// kernel: template_guided_decoder_forward.1
= control target key start
LH: loop header
LB: loop body
LE: loop exit
PB: predicated region body
PF: predicated region fallthrough
CT: control target
= control target key end

     0   :  { %s7687_s6 = smov 1   ;;  %s7688_s10 = smov 2   ;;  %s9192_s0 = inlined_call_operand.smem [shape: u32[38], index: -1, kind: input, shape index: {}] }
   0x1   :  { %s7769_s5 = sld [smem:[%s9192_s0]]   ;;  %s7689_s14 = smov 3  }
   0x2   :  { %s7774_s9 = sld [smem:[%s9192_s0 + %s7687_s6]]   ;;  %s7690_s18 = smov 4  }
   0x3   :  { %s7779_s13 = sld [smem:[%s9192_s0 + %s7688_s10]]   ;;  %s7691_s22 = smov 5  }
   0x4   :  { %s7784_s17 = sld [smem:[%s9192_s0 + %s7689_s14]]   ;;  %s7692_s26 = smov 6  }
   0x5   :  { %s7789_s21 = sld [smem:[%s9192_s0 + %s7690_s18]]   ;;  %s7693_s30 = smov 7  }
   0x6   :  { %s7794_s25 = sld [smem:[%s9192_s0 + %s7691_s22]]   ;;  %s7694_s4 = smov 8  }
   0x7   :  { %9264 = sst [smem:[#allocation45_spill]] %s7769_s5  ;;  %s7695_s10 = smov 9  }
   0x8   :  { %9265 = sst [smem:[#allocation46_spill]] %s7774_s9  ;;  %s7696_s15 = smov 10  }
   0x9   :  { %9266 = sst [smem:[#allocation47_spill]] %s7779_s13  ;;  %s7697_s20 = smov 11  }
   0xa   :  { %9267 = sst [smem:[#allocation48_spill]] %s7784_s17  ;;  %s7699_s1 = smov 13  }
   0xb   :  { %9268 = sst [smem:[#allocation49_spill]] %s7789_s21  ;;  %s7700_s7 = smov 14  }
   0xc   :  { %9269 = sst [smem:[#allocation50_spill]] %s7794_s25  ;;  %s7702_s22 = smov 16  }
   0xd   :  { %s7799_s29 = sld [smem:[%s9192_s0 + %s7692_s26]]   ;;  %s7698_s26 = smov 12  }
   0xe   :  { %s7804_s3 = sld [smem:[%s9192_s0 + %s7693_s30]]   ;;  %s7703_s28 = smov 17  }
   0xf   :  { %s7809_s8 = sld [smem:[%s9192_s0 + %s7694_s4]]  }
  0x10   :  { %s7814_s14 = sld [smem:[%s9192_s0 + %s7695_s10]]  }
  0x11   :  { %s7819_s19 = sld [smem:[%s9192_s0 + %s7696_s15]]   ;;  %s7701_s15 = smov 15  }
  0x12   :  { %s7824_s24 = sld [smem:[%s9192_s0 + %s7697_s20]]  }
  0x13   :  { %9270 = sst [smem:[#allocation51_spill]] %s7799_s29 }
  0x14   :  { %9271 = sst [smem:[#allocation52_spill]] %s7804_s3 }
  0x15   :  { %9272 = sst [smem:[#allocation53_spill]] %s7809_s8 }
  0x16   :  { %9273 = sst [smem:[#allocation54_spill]] %s7814_s14 }
  0x17   :  { %9274 = sst [smem:[#allocation55_spill]] %s7819_s19 }
  0x18   :  { %9275 = sst [smem:[#allocation56_spill]] %s7824_s24 }
  0x19   :  { %s7829_s30 = sld [smem:[%s9192_s0 + %s7698_s26]]  }
  0x1a   :  { %s7834_s6 = sld [smem:[%s9192_s0 + %s7699_s1]]  }
  0x1b   :  { %s7839_s12 = sld [smem:[%s9192_s0 + %s7700_s7]]   ;;  %s7704_s7 = smov 18  }
  0x1c   :  { %s7844_s20 = sld [smem:[%s9192_s0 + %s7701_s15]]   ;;  %s7705_s15 = smov 19  }
  0x1d   :  { %s7849_s27 = sld [smem:[%s9192_s0 + %s7702_s22]]   ;;  %s7706_s22 = smov 20  }
  0x1e   :  { %s7854_s4 = sld [smem:[%s9192_s0 + %s7703_s28]]   ;;  %s7707_s28 = smov 21  }
  0x1f   :  { %9276 = sst [smem:[#allocation57_spill]] %s7829_s30 }
  0x20   :  { %9277 = sst [smem:[#allocation58_spill]] %s7834_s6 }
  0x21   :  { %9278 = sst [smem:[#allocation59_spill]] %s7839_s12 }
  0x22   :  { %9279 = sst [smem:[#allocation60_spill]] %s7844_s20 }
  0x23   :  { %9280 = sst [smem:[#allocation61_spill]] %s7849_s27 }
  0x24   :  { %9281 = sst [smem:[#allocation62_spill]] %s7854_s4 }
  0x25   :  { %s7859_s12 = sld [smem:[%s9192_s0 + %s7704_s7]]   ;;  %s7708_s7 = smov 22  }
  0x26   :  { %s7864_s6 = sld [smem:[%s9192_s0 + %s7705_s15]]   ;;  %s7709_s15 = smov 23  }
  0x27   :  { %s7869_s30 = sld [smem:[%s9192_s0 + %s7706_s22]]   ;;  %s7710_s22 = smov 24  }
  0x28   :  { %s7874_s4 = sld [smem:[%s9192_s0 + %s7707_s28]]   ;;  %s7711_s28 = smov 25  }
  0x29   :  { %s7889_s24 = sld [smem:[%s9192_s0 + %s7710_s22]]   ;;  %s7714_s22 = smov 28  }
  0x2a   :  { %s7894_s8 = sld [smem:[%s9192_s0 + %s7711_s28]]   ;;  %s7715_s28 = smov 29  }
  0x2b   :  { %9282 = sst [smem:[#allocation63_spill]] %s7859_s12 }
  0x2c   :  { %9283 = sst [smem:[#allocation64_spill]] %s7864_s6 }
  0x2d   :  { %9284 = sst [smem:[#allocation65_spill]] %s7869_s30 }
  0x2e   :  { %9285 = sst [smem:[#allocation66_spill]] %s7874_s4 }
  0x2f   :  { %s7879_s12 = sld [smem:[%s9192_s0 + %s7708_s7]]   ;;  %s7712_s7 = smov 26  }
  0x30   :  { %s7884_s6 = sld [smem:[%s9192_s0 + %s7709_s15]]   ;;  %s7713_s15 = smov 27  }
  0x31   :  { %9288 = sst [smem:[#allocation69_spill]] %s7889_s24 }
  0x32   :  { %9289 = sst [smem:[#allocation70_spill]] %s7894_s8 }
  0x33   :  { %s7899_s3 = sld [smem:[%s9192_s0 + %s7712_s7]]   ;;  %s7716_s7 = smov 30  }
  0x34   :  { %s7904_s29 = sld [smem:[%s9192_s0 + %s7713_s15]]   ;;  %s7717_s15 = smov 31  }
  0x35   :  { %9286 = sst [smem:[#allocation67_spill]] %s7879_s12 }
  0x36   :  { %9287 = sst [smem:[#allocation68_spill]] %s7884_s6 }
  0x37   :  { %s7909_s25 = sld [smem:[%s9192_s0 + %s7714_s22]]   ;;  %s7718_s22 = smov 32  }
  0x38   :  { %s7914_s17 = sld [smem:[%s9192_s0 + %s7715_s28]]   ;;  %s7719_s28 = smov 33  }
  0x39   :  { %9290 = sst [smem:[#allocation71_spill]] %s7899_s3 }
  0x3a   :  { %9291 = sst [smem:[#allocation72_spill]] %s7904_s29 }
  0x3b   :  { %s7919_s3 = sld [smem:[%s9192_s0 + %s7716_s7]]   ;;  %s7720_s7 = smov 34  }
  0x3c   :  { %s7924_s13 = sld [smem:[%s9192_s0 + %s7717_s15]]   ;;  %s7721_s15 = smov 35  }
  0x3d   :  { %9292 = sst [smem:[#allocation73_spill]] %s7909_s25 }
  0x3e   :  { %9293 = sst [smem:[#allocation74_spill]] %s7914_s17 }
  0x3f   :  { %s7929_s9 = sld [smem:[%s9192_s0 + %s7718_s22]]   ;;  %s7722_s22 = smov 36  }
  0x40   :  { %s7934_s5 = sld [smem:[%s9192_s0 + %s7719_s28]]   ;;  %s7723_s28 = smov 37  }
  0x41   :  { %9294 = sst [smem:[#allocation75_spill]] %s7919_s3 }
  0x42   :  { %9295 = sst [smem:[#allocation76_spill]] %s7924_s13 }
  0x43   :  { %s7939_s17 = sld [smem:[%s9192_s0 + %s7720_s7]]  }
  0x44   :  { %s7944_s13 = sld [smem:[%s9192_s0 + %s7721_s15]]  }
  0x45   :  { %9296 = sst [smem:[#allocation77_spill]] %s7929_s9 }
  0x46   :  { %9297 = sst [smem:[#allocation78_spill]] %s7934_s5 }
  0x47   :  { %s7949_s9 = sld [smem:[%s9192_s0 + %s7722_s22]]  }
  0x48   :  { %s7954_s29 = sld [smem:[%s9192_s0 + %s7723_s28]]  }
  0x49   :  { %9298 = sst [smem:[#allocation79_spill]] %s7939_s17 }
  0x4a   :  { %9299 = sst [smem:[#allocation80_spill]] %s7944_s13 }
  0x4d   :  { %9300 = sst [smem:[#allocation81_spill]] %s7949_s9 }
  0x4e   :  { %9301 = sst [smem:[#allocation82_spill]] %s7954_s29 }
  0x4f   :  { %80 = vsyncpa [#allocation7], 0 }
  0x50   :  { %81 = vsyncpa [#allocation5], 0 }
  0x51   :  { %83 = vsyncpa [#allocation5 + $0x1], 0 }
  0x52   :  { %84 = vsyncpa [#allocation10], 0 }
  0x53   :  { %86 = vsyncpa [#allocation10 + $0x1], 0 }
  0x54   :  { %87 = vsyncpa [#allocation13], 0 }
  0x55   :  { %89 = vsyncpa [#allocation13 + $0x1], 0 }
  0x56   :  { %90 = vsyncpa [#allocation16], 0 }
  0x57   :  { %92 = vsyncpa [#allocation16 + $0x1], 0 }
  0x58   :  { %93 = vsyncpa [#allocation19], 0 }
  0x59   :  { %95 = vsyncpa [#allocation19 + $0x1], 0 }
  0x5a   :  { %96 = vsyncpa [#allocation22], 0 }
  0x5b   :  { %98 = vsyncpa [#allocation22 + $0x1], 0 }
  0x5c   :  { %99 = vsyncpa [#allocation25], 0 }
  0x5d   :  { %101 = vsyncpa [#allocation25 + $0x1], 0 }
  0x5e   :  { %102 = vsyncpa [#allocation28], 0 }
  0x5f   :  { %104 = vsyncpa [#allocation28 + $0x1], 0 }
  0x60   :  { %105 = vsyncpa [#allocation31], 0 }
  0x61   :  { %107 = vsyncpa [#allocation31 + $0x1], 0 }
  0x62   :  { %108 = vsyncpa [#allocation6], 0 }
  0x63   :  { %110 = vsyncpa [#allocation6 + $0x1], 0  ;;  %s7956_s0 = smov 0   ;;  %s7958_s7 = smov 0  }
  0x64   :  { %s7960_s10 = smov 0   ;;  %s7962_s11 = smov 0  }
  0x65   :  { %s7964_s15 = smov 0   ;;  %s7966_s16 = smov 0  }
  0x66   :  { %s7968_s18 = smov 0   ;;  %s7970_s22 = smov 0  }
  0x67   :  { %s7972_s23 = smov 0   ;;  %s7974_s26 = smov 0  }
  0x68   :  { %s7976_s28 = smov 0  }
  0x69 LB: > { %s9302_s30 = sld [smem:[#allocation65_spill]]  ;;  %s9303_s27 = sld [smem:[#allocation61_spill]]  ;;  %s7685_s28 = sphi %s7976_s28, %s116_s28   ;;  %s7681_s26 = sphi %s7974_s26, %s9457_s26   ;;  %s7677_s23 = sphi %s7972_s23, %s9456_s23   ;;  %s7673_s22 = sphi %s7970_s22, %s9455_s22   ;;  %s7669_s18 = sphi %s7968_s18, %s9454_s18   ;;  %s7665_s16 = sphi %s7966_s16, %s9453_s16   ;;  %s7661_s15 = sphi %s7964_s15, %s9452_s15   ;;  %s7657_s11 = sphi %s7962_s11, %s9451_s11   ;;  %s7653_s10 = sphi %s7960_s10, %s9450_s10   ;;  %s7649_s7 = sphi %s7958_s7, %s9449_s7   ;;  %s7645_s0 = sphi %s7956_s0, %s9448_s0  }
  0x6a   : > { %s9304_s25 = sld [smem:[#allocation73_spill]]  ;;  %s9305_s20 = sld [smem:[#allocation60_spill]] }
  0x6b   : > { %s9306_s14 = sld [smem:[#allocation54_spill]]  ;;  %s9308_s6 = sld [smem:[#allocation68_spill]] }
  0x6c   : > { %s9307_s8 = sld [smem:[#allocation70_spill]]  ;;  %s9310_s3 = sld [smem:[#allocation75_spill]] }
  0x6d   : > { %s9309_s5 = sld [smem:[#allocation78_spill]]  ;;  %s9311_s4 = sld [smem:[#allocation66_spill]] }
  0x6e   : > { %s9312_s19 = sld [smem:[#allocation55_spill]]  ;;  %9313 = sst [smem:[#allocation83_spill]] %s7645_s0 }
  0x6f   : > { %9314 = sst [smem:[#allocation84_spill]] %s7649_s7  ;;  %s8010_s1 = sadd.s32 4294967295, %s7685_s28  }
  0x70   : > { %9315 = sst [smem:[#allocation85_spill]] %s7653_s10  ;;  %s6081_s2 = sadd.s32 4294967294, %s7685_s28  }
  0x71   : > { %9316 = sst [smem:[#allocation86_spill]] %s7661_s15  ;;  %s125_s29 = sadd.s32 1, %s7677_s23 }
  0x72   : > { %9317 = sst [smem:[#allocation87_spill]] %s7665_s16  ;;  %s128_s9 = sadd.s32 1, %s7681_s26 }
  0x73   : > { %9318 = sst [smem:[#allocation88_spill]] %s7669_s18  ;;  %p126_p0 = scmp.ge.s32.totalorder %s125_s29, 8 }
  0x74   : > { %9319 = sst [smem:[#allocation89_spill]] %s7673_s22  ;;  %s364_s13 = sadd.s32 1, %s7665_s16 }
  0x75   : > { %9320 = sst [smem:[#allocation90_spill]] %s7677_s23  ;;  %p371_p1 = scmp.ne.s32.totalorder %s7665_s16, %s7661_s15 }
  0x76   : > { %9321 = sst [smem:[#allocation91_spill]] %s7681_s26  ;;  %p372_p2 = scmp.eq.s32.totalorder %s7685_s28, 0 }
  0x77   : > { %9322 = sst [smem:[#allocation92_spill]] %s7685_s28  ;;  %s9459_s29 = smov (%p126_p0, %s125_s29), 0 }
  0x78   : > { %9323 = sst [smem:[#allocation93_spill]] %s9459_s29  ;;  %s9461_s9 = smov (!%p126_p0, %s128_s9), %s7681_s26 }
  0x79   : > { %s361_s18 = ssub.s32 %s7677_s23, %s9459_s29  ;;  %p8024_p3 = por %p372_p2, %p371_p1 }
  0x7a   : > { %p130_p4 = scmp.ge.s32.totalorder %s9461_s9, 2  ;;  %p362_p5 = scmp.eq.s32.totalorder %s361_s18, 0 }
  0x7b   : > { %s9324_s22 = scalar_select %p8024_p3, 1, 0 }
  0x7c   : > { %p377_p6 = scmp.ne.s32.totalorder %s7661_s15, %s7657_s11  ;;  %p9212_p7 = scmp.eq.s32.totalorder %s8010_s1, 0 }
  0x7d   : > { %s9463_s9 = smov (%p130_p4, %s9461_s9), 0  ;;  %s9326_s21 = sld [smem:[#allocation49_spill]] }
  0x7e   : > { %9325 = sst [smem:[#allocation94_spill]] %s9463_s9  ;;  %p8037_p8 = por %p9212_p7, %p377_p6 }
  0x7f   : > { %s8033_s17 = scalar_select %p362_p5, %s7665_s16, %s364_s13  }
  0x80   : > { %s9328_s29 = scalar_select %p8037_p8, 1, 0 }
  0x81   : > { %9327 = sst [smem:[#allocation95_spill]] %s8033_s17  ;;  %s1079_s24 = ssub.s32 %s7681_s26, %s9463_s9 }
  0x82   : > { %p1080_p9 = scmp.eq.s32.totalorder %s1079_s24, 0  ;;  %s1082_s12 = sadd.s32 1, %s7653_s10 }
  0x83   : > { %p1092_p10 = scmp.ne.s32.totalorder %s7653_s10, %s7649_s7  ;;  %p1093_p11 = scmp.eq.s32.totalorder %s8010_s1, 15 }
  0x84   : > { %s8048_s18 = scalar_select %p1080_p9, %s7653_s10, %s1082_s12  }
  0x85   : > { %p8050_p12 = por %p1093_p11, %p1092_p10  ;;  %p1098_p13 = scmp.ne.s32.totalorder %s7649_s7, %s7645_s0 }
  0x86   : > { %9329 = sst [smem:[#allocation96_spill]] %s8048_s18  ;;  %p1099_p0 = scmp.eq.s32.totalorder %s6081_s2, 15 }
  0x87   : > { %s9330_s11 = scalar_select %p8050_p12, 1, 0 }
  0x88   : > { %p6082_p1 = scmp.ge.s32.totalorder %s7685_s28, 1  ;;  %p1106_p2 = scmp.lt.s32.totalorder %s7685_s28, 17 }
  0x89   : > { %9331 = sst [smem:[#allocation97_spill]] %s9330_s11  ;;  %p8058_p4 = por %p1099_p0, %p1098_p13 }
  0x8a   : > { %p8062_p5 = pnand %p6082_p1, %p1106_p2  ;;  %s1119_s24 = sshll.u32 %s9326_s21, 4  ;;  %s1120_s24 = int_to_ptr.vmem [resolvable:$true] %s1119_s24 }
  0x8b   : > { %s9332_s13 = scalar_select %p8058_p4, 1, 0 }
  0x8c   : > { %s9334_s9 = scalar_select %p8062_p5, 1, 0 }
  0x8d   : > { %9333 = sst [smem:[#allocation98_spill]] %s9332_s13  ;;  %p6828_p6 = pneg %p8062_p5 }
  0x8e   : > { %s7036_s12 = scalar_lea.vmem %s1120_s24, 32  ;;  %p7044_p13 = scmp.lt.s32.totalorder %s1120_s24, %s1120_s24 }
  0x8f   : > { %p6829_p9 = pnand %p6828_p6, %p9212_p7  ;;  %p7037_p10 = scmp.ne.s32.totalorder %s1120_s24, %s7036_s12 }
  0x90   : > { %p7045_p0 = scmp.lt.s32.totalorder %s7036_s12, %s7036_s12 }
  0x91   : > { %p7038_p11 = pneg %p6829_p9 }
  0x92   : > { %p7046_p3 = por %p7045_p0, %p7044_p13 }
  0x93   : > { %p7039_p12 = pnand %p7038_p11, %p7037_p10 }
  0x95   : > { %p7040_p8 = pneg %p7039_p12 }
  0x97   : > { %p7047_p4 = pnand %p7046_p3, %p7040_p8 }
  0x99   : > { %7050 = shalt.err (!%p7047_p4)
}
  0x9a   : > { %s7724_s2 = smov [#allocation4]   ;;  %p6084_p1 = scmp.ge.s32.totalorder %s7685_s28, 16 }
  0x9b   : > { %6831 = dma.vmem_to_smem (!%p6829_p9), %s1120_s24, 32, %s7724_s2, [#allocation7]  }
  0x9c   : > { %1132 = sbr.rel (%p6084_p1) target bundleno = 569 (0x239), region = 28  ;;  %s8073_s21 = sand.u32 (!%p6084_p1), 1, %s7665_s16  }
  0x9d   : > { %s8076_s26 = sshll.u32 (!%p6084_p1), %s7677_s23, 9  ;;  %s8079_s12 = sshll.u32 (!%p6084_p1), %s8073_s21, 5 }
  0x9e   : > { %s8082_s24 = sand.u32 (!%p6084_p1), 1, %s7685_s28   ;;  %s8086_s2 = scalar_lea.hbm (!%p6084_p1), %s9312_s19, %s8076_s26 }
  0x9f   : > { %s1215_s17 = scalar_lea.vmem (!%p6084_p1), [#allocation9], %s8079_s12  ;;  %s7051_s10 = scalar_lea.hbm (!%p6084_p1), %s8086_s2, 512 }
  0xa0   : > { %s1222_s18 = sshll.u32 (!%p6084_p1), %s1215_s17, 4  ;;  %p7052_p3 = scmp.ne.s32.totalorder (!%p6084_p1), %s8086_s2, %s7051_s10  ;;  %s8089_s18 = int_to_ptr.vmem [resolvable:$true] %s1222_s18 }
  0xa1   : > { %p9335_p8 = scmp.ne.s32.totalorder (!%p6084_p1), %s9324_s22, 0  ;;  %s7055_s13 = scalar_lea.hbm (!%p6084_p1), %s9312_s19, 4096 }
  0xa2   : > { %p7056_p4 = scmp.lt.u32.totalorder (!%p6084_p1), %s8086_s2, %s9312_s19  ;;  %p7057_p6 = scmp.lt.u32.totalorder (!%p6084_p1), %s7055_s13, %s7051_s10 }
  0xa3   : > { %p7053_p12 = pnand %p7052_p3, %p9335_p8  ;;  %p7059_p10 = scmp.lt.u32.totalorder %s7051_s10, %s8086_s2 }
  0xa4   : > { %p7058_p9 = por %p7057_p6, %p7056_p4 }
  0xa5   : > { %p7054_p2 = pneg %p7053_p12 }
  0xa6   : > { %p7060_p11 = por %p7059_p10, %p7058_p9 }
  0xa8   : > { %p7061_p13 = pnand %p7060_p11, %p7054_p2 }
  0xaa   : > { %7064 = shalt.err (!%p7061_p13)
}
  0xab   : > { %s7065_s17 = scalar_lea.vmem %s8089_s18, 512  ;;  %s7725_s16 = smov [#allocation9]  }
  0xac   : > { %p7066_p0 = scmp.ne.s32.totalorder %s8089_s18, %s7065_s17  ;;  %s7069_s0 = sshll.u32 %s7725_s16, 4  ;;  %s7070_s0 = int_to_ptr.vmem [resolvable:$false] %s7069_s0 }
  0xad   : > { %s7071_s28 = scalar_lea.vmem %s7070_s0, 1024  ;;  %p7072_p3 = scmp.lt.s32.totalorder %s8089_s18, %s7070_s0 }
  0xae   : > { %p7067_p1 = pnand %p7066_p0, %p9335_p8  ;;  %p7073_p12 = scmp.lt.s32.totalorder %s7071_s28, %s7065_s17 }
  0xb0   : > { %p7068_p7 = pneg %p7067_p1  ;;  %p7074_p4 = por %p7073_p12, %p7072_p3 }
  0xb2   : > { %p7075_p6 = pnand %p7074_p4, %p7068_p7 }
  0xb4   : > { %7078 = shalt.err (!%p7075_p6)
}
  0xb5   : > { %s7726_s10 = smov 128   ;;  %s7727_s16 = smov 8  }
  0xb6   : > { %s9336_s0 = scalar_lea.sflag [#allocation10], %s8082_s24  ;;  %s8116_s28 = scalar_lea.hbm %s9303_s27, %s8076_s26 }
  0xb7   : > { %6791 = dma.hbm_to_vmem [thread:$0]  (%p9335_p8), %s8086_s2, 512, %s8089_s18, %s9336_s0, %s7726_s10, %s7726_s10, %s7727_s16  }
  0xb8   : > { %s1283_s13 = scalar_lea.vmem [#allocation12], %s8079_s12  ;;  %s9221_s19 = scalar_lea.sflag [#allocation13], %s8082_s24 }
  0xb9   : > { %s1290_s17 = sshll.u32 %s1283_s13, 4  ;;  %s7079_s11 = scalar_lea.hbm %s8116_s28, 512  ;;  %s8119_s17 = int_to_ptr.vmem [resolvable:$true] %s1290_s17 }
  0xba   : > { %p7080_p7 = scmp.ne.s32.totalorder %s8116_s28, %s7079_s11  ;;  %s7083_s7 = scalar_lea.hbm %s9303_s27, 4096 }
  0xbb   : > { %p7084_p10 = scmp.lt.u32.totalorder %s8116_s28, %s9303_s27  ;;  %p7085_p11 = scmp.lt.u32.totalorder %s7083_s7, %s7079_s11 }
  0xbc   : > { %p7081_p2 = pnand %p7080_p7, %p9335_p8  ;;  %p7087_p0 = scmp.lt.u32.totalorder %s7079_s11, %s8116_s28 }
  0xbd   : > { %p7086_p13 = por %p7085_p11, %p7084_p10 }
  0xbe   : > { %p7082_p9 = pneg %p7081_p2 }
  0xbf   : > { %p7088_p1 = por %p7087_p0, %p7086_p13 }
  0xc1   : > { %p7089_p3 = pnand %p7088_p1, %p7082_p9 }
  0xc3   : > { %7092 = shalt.err (!%p7089_p3)
}
  0xc4   : > { %s7093_s18 = scalar_lea.vmem %s8119_s17, 512  ;;  %s7728_s2 = smov [#allocation12]  }
  0xc5   : > { %p7094_p12 = scmp.ne.s32.totalorder %s8119_s17, %s7093_s18  ;;  %s7097_s0 = sshll.u32 %s7728_s2, 4  ;;  %s7098_s0 = int_to_ptr.vmem [resolvable:$false] %s7097_s0 }
  0xc6   : > { %s7099_s13 = scalar_lea.vmem %s7098_s0, 1024  ;;  %p7100_p7 = scmp.lt.s32.totalorder %s8119_s17, %s7098_s0 }
  0xc7   : > { %p7095_p4 = pnand %p7094_p12, %p9335_p8  ;;  %p7101_p2 = scmp.lt.s32.totalorder %s7099_s13, %s7093_s18 }
  0xc9   : > { %p7096_p6 = pneg %p7095_p4  ;;  %p7102_p10 = por %p7101_p2, %p7100_p7 }
  0xcb   : > { %p7103_p11 = pnand %p7102_p10, %p7096_p6 }
  0xcd   : > { %7106 = shalt.err (!%p7103_p11)
}
  0xce   : > { %6793 = dma.hbm_to_vmem [thread:$0]  (%p9335_p8), %s8116_s28, 512, %s8119_s17, %s9221_s19, %s7726_s10, %s7726_s10, %s7727_s16  }
  0xcf   : > { %s8146_s7 = scalar_lea.hbm %s9311_s4, %s8076_s26  ;;  %s1343_s11 = scalar_lea.vmem [#allocation15], %s8079_s12 }
  0xd0   : > { %s1350_s18 = sshll.u32 %s1343_s11, 4  ;;  %s9223_s2 = scalar_lea.sflag [#allocation16], %s8082_s24  ;;  %s8149_s18 = int_to_ptr.vmem [resolvable:$true] %s1350_s18 }
  0xd1   : > { %s7107_s0 = scalar_lea.hbm %s8146_s7, 512  ;;  %s7111_s13 = scalar_lea.hbm %s9311_s4, 4096 }
  0xd2   : > { %p7108_p9 = scmp.ne.s32.totalorder %s8146_s7, %s7107_s0  ;;  %p7112_p1 = scmp.lt.u32.totalorder %s8146_s7, %s9311_s4 }
  0xd3   : > { %p7113_p3 = scmp.lt.u32.totalorder %s7111_s13, %s7107_s0  ;;  %p7115_p4 = scmp.lt.u32.totalorder %s7107_s0, %s8146_s7 }
  0xd4   : > { %p7109_p13 = pnand %p7108_p9, %p9335_p8 }
  0xd5   : > { %p7114_p12 = por %p7113_p3, %p7112_p1 }
  0xd6   : > { %p7110_p0 = pneg %p7109_p13 }
  0xd7   : > { %p7116_p6 = por %p7115_p4, %p7114_p12 }
  0xd9   : > { %p7117_p7 = pnand %p7116_p6, %p7110_p0 }
  0xdb   : > { %7120 = shalt.err (!%p7117_p7)
}
  0xdc   : > { %s7121_s28 = scalar_lea.vmem %s8149_s18, 512  ;;  %s7729_s17 = smov [#allocation15]  }
  0xdd   : > { %p7122_p2 = scmp.ne.s32.totalorder %s8149_s18, %s7121_s28  ;;  %s7125_s11 = sshll.u32 %s7729_s17, 4  ;;  %s7126_s11 = int_to_ptr.vmem [resolvable:$false] %s7125_s11 }
  0xde   : > { %s7127_s19 = scalar_lea.vmem %s7126_s11, 1024  ;;  %p7128_p9 = scmp.lt.s32.totalorder %s8149_s18, %s7126_s11 }
  0xdf   : > { %p7123_p10 = pnand %p7122_p2, %p9335_p8  ;;  %p7129_p13 = scmp.lt.s32.totalorder %s7127_s19, %s7121_s28 }
  0xe1   : > { %p7124_p11 = pneg %p7123_p10  ;;  %p7130_p1 = por %p7129_p13, %p7128_p9 }
  0xe3   : > { %p7131_p3 = pnand %p7130_p1, %p7124_p11 }
  0xe5   : > { %7134 = shalt.err (!%p7131_p3)
}
  0xe6   : > { %6795 = dma.hbm_to_vmem [thread:$0]  (%p9335_p8), %s8146_s7, 512, %s8149_s18, %s9223_s2, %s7726_s10, %s7726_s10, %s7727_s16  }
  0xe7   : > { %s8175_s19 = sshll.u32 %s7677_s23, 4  ;;  %s1384_s13 = scalar_lea.vmem [#allocation18], %s8073_s21 }
  0xe8   : > { %s8179_s0 = scalar_lea.hbm %s9308_s6, %s8175_s19  ;;  %s1391_s28 = sshll.u32 %s1384_s13, 4  ;;  %s1392_s28 = int_to_ptr.vmem [resolvable:$true] %s1391_s28 }
  0xe9   : > { %s9225_s17 = scalar_lea.sflag [#allocation19], %s8082_s24  ;;  %s7135_s11 = scalar_lea.hbm %s8179_s0, 16 }
  0xea   : > { %p7136_p0 = scmp.ne.s32.totalorder %s8179_s0, %s7135_s11  ;;  %s7139_s4 = scalar_lea.hbm %s9308_s6, 128 }
  0xeb   : > { %p7140_p6 = scmp.lt.u32.totalorder %s8179_s0, %s9308_s6  ;;  %p7141_p7 = scmp.lt.u32.totalorder %s7139_s4, %s7135_s11 }
  0xec   : > { %p7137_p12 = pnand %p7136_p0, %p9335_p8  ;;  %p7143_p10 = scmp.lt.u32.totalorder %s7135_s11, %s8179_s0 }
  0xed   : > { %p7142_p2 = por %p7141_p7, %p7140_p6 }
  0xee   : > { %p7138_p4 = pneg %p7137_p12 }
  0xef   : > { %p7144_p11 = por %p7143_p10, %p7142_p2 }
  0xf1   : > { %p7145_p9 = pnand %p7144_p11, %p7138_p4 }
  0xf3   : > { %7148 = shalt.err (!%p7145_p9)
}
  0xf4   : > { %s7149_s7 = scalar_lea.vmem %s1392_s28, 16  ;;  %s7730_s18 = smov [#allocation18]  }
  0xf5   : > { %p7150_p13 = scmp.ne.s32.totalorder %s1392_s28, %s7149_s7  ;;  %s7153_s13 = sshll.u32 %s7730_s18, 4  ;;  %s7154_s13 = int_to_ptr.vmem [resolvable:$false] %s7153_s13 }
  0xf6   : > { %s7155_s2 = scalar_lea.vmem %s7154_s13, 32  ;;  %p7156_p0 = scmp.lt.s32.totalorder %s1392_s28, %s7154_s13 }
  0xf7   : > { %p7151_p1 = pnand %p7150_p13, %p9335_p8  ;;  %p7157_p12 = scmp.lt.s32.totalorder %s7155_s2, %s7149_s7 }
  0xf9   : > { %p7152_p3 = pneg %p7151_p1  ;;  %p7158_p5 = por %p7157_p12, %p7156_p0 }
  0xfb   : > { %p7159_p6 = pnand %p7158_p5, %p7152_p3 }
  0xfd   : > { %7162 = shalt.err (!%p7159_p6)
}
  0xfe   : > { %6797 = dma.hbm_to_vmem [thread:$0]  (%p9335_p8), %s8179_s0, 16, %s1392_s28, %s9225_s17  }
  0xff   : > { %s8200_s4 = scalar_lea.hbm %s9307_s8, %s8175_s19  ;;  %s1422_s2 = scalar_lea.vmem [#allocation21], %s8073_s21 }
 0x100   : > { %s1429_s11 = sshll.u32 %s1422_s2, 4  ;;  %s9226_s7 = scalar_lea.sflag [#allocation22], %s8082_s24  ;;  %s1430_s11 = int_to_ptr.vmem [resolvable:$true] %s1429_s11 }
 0x101   : > { %s7163_s18 = scalar_lea.hbm %s8200_s4, 16  ;;  %s7167_s13 = scalar_lea.hbm %s9307_s8, 128 }
 0x102   : > { %p7164_p5 = scmp.ne.s32.totalorder %s8200_s4, %s7163_s18  ;;  %p7168_p2 = scmp.lt.u32.totalorder %s8200_s4, %s9307_s8 }
 0x103   : > { %p7169_p10 = scmp.lt.u32.totalorder %s7167_s13, %s7163_s18  ;;  %p7171_p9 = scmp.lt.u32.totalorder %s7163_s18, %s8200_s4 }
 0x104   : > { %p7165_p4 = pnand %p7164_p5, %p9335_p8 }
 0x105   : > { %p7170_p11 = por %p7169_p10, %p7168_p2 }
 0x106   : > { %p7166_p7 = pneg %p7165_p4 }
 0x107   : > { %p7172_p13 = por %p7171_p9, %p7170_p11 }
 0x109   : > { %p7173_p1 = pnand %p7172_p13, %p7166_p7 }
 0x10b   : > { %7176 = shalt.err (!%p7173_p1)
}
 0x10c   : > { %s7177_s0 = scalar_lea.vmem %s1430_s11, 16  ;;  %s7731_s28 = smov [#allocation21]  }
 0x10d   : > { %p7178_p3 = scmp.ne.s32.totalorder %s1430_s11, %s7177_s0  ;;  %s7181_s2 = sshll.u32 %s7731_s28, 4  ;;  %s7182_s2 = int_to_ptr.vmem [resolvable:$false] %s7181_s2 }
 0x10e   : > { %s7183_s17 = scalar_lea.vmem %s7182_s2, 32  ;;  %p7184_p6 = scmp.lt.s32.totalorder %s1430_s11, %s7182_s2 }
 0x10f   : > { %p7179_p0 = pnand %p7178_p3, %p9335_p8  ;;  %p7185_p5 = scmp.lt.s32.totalorder %s7183_s17, %s7177_s0 }
 0x111   : > { %p7180_p12 = pneg %p7179_p0  ;;  %p7186_p4 = por %p7185_p5, %p7184_p6 }
 0x113   : > { %p7187_p2 = pnand %p7186_p4, %p7180_p12 }
 0x115   : > { %7190 = shalt.err (!%p7187_p2)
}
 0x116   : > { %6799 = dma.hbm_to_vmem [thread:$0]  (%p9335_p8), %s8200_s4, 16, %s1430_s11, %s9226_s7  }
 0x117   : > { %s8221_s18 = scalar_lea.hbm %s9304_s25, %s8175_s19  ;;  %s1464_s17 = scalar_lea.vmem [#allocation24], %s8073_s21 }
 0x118   : > { %s1471_s13 = sshll.u32 %s1464_s17, 4  ;;  %s9227_s0 = scalar_lea.sflag [#allocation25], %s8082_s24  ;;  %s1472_s13 = int_to_ptr.vmem [resolvable:$true] %s1471_s13 }
 0x119   : > { %s7191_s28 = scalar_lea.hbm %s8221_s18, 16  ;;  %s7195_s2 = scalar_lea.hbm %s9304_s25, 128 }
 0x11a   : > { %p7192_p7 = scmp.ne.s32.totalorder %s8221_s18, %s7191_s28  ;;  %p7196_p9 = scmp.lt.u32.totalorder %s8221_s18, %s9304_s25 }
 0x11b   : > { %p7197_p13 = scmp.lt.u32.totalorder %s7195_s2, %s7191_s28  ;;  %p7199_p3 = scmp.lt.u32.totalorder %s7191_s28, %s8221_s18 }
 0x11c   : > { %p7193_p10 = pnand %p7192_p7, %p9335_p8 }
 0x11d   : > { %p7198_p1 = por %p7197_p13, %p7196_p9 }
 0x11e   : > { %p7194_p11 = pneg %p7193_p10 }
 0x11f   : > { %p7200_p0 = por %p7199_p3, %p7198_p1 }
 0x121   : > { %p7201_p12 = pnand %p7200_p0, %p7194_p11 }
 0x123   : > { %7204 = shalt.err (!%p7201_p12)
}
 0x124   : > { %s7205_s4 = scalar_lea.vmem %s1472_s13, 16  ;;  %s7732_s11 = smov [#allocation24]  }
 0x125   : > { %p7206_p6 = scmp.ne.s32.totalorder %s1472_s13, %s7205_s4  ;;  %s7209_s17 = sshll.u32 %s7732_s11, 4  ;;  %s7210_s17 = int_to_ptr.vmem [resolvable:$false] %s7209_s17 }
 0x126   : > { %s7211_s7 = scalar_lea.vmem %s7210_s17, 32  ;;  %p7212_p2 = scmp.lt.s32.totalorder %s1472_s13, %s7210_s17 }
 0x127   : > { %p7207_p5 = pnand %p7206_p6, %p9335_p8  ;;  %p7213_p7 = scmp.lt.s32.totalorder %s7211_s7, %s7205_s4 }
 0x129   : > { %p7208_p4 = pneg %p7207_p5  ;;  %p7214_p10 = por %p7213_p7, %p7212_p2 }
 0x12b   : > { %p7215_p9 = pnand %p7214_p10, %p7208_p4 }
 0x12d   : > { %7218 = shalt.err (!%p7215_p9)
}
 0x12e   : > { %6801 = dma.hbm_to_vmem [thread:$0]  (%p9335_p8), %s8221_s18, 16, %s1472_s13, %s9227_s0  }
 0x12f   : > { %s8242_s28 = scalar_lea.hbm %s9310_s3, %s8175_s19  ;;  %s1498_s7 = scalar_lea.vmem [#allocation27], %s8073_s21 }
 0x130   : > { %s1505_s2 = sshll.u32 %s1498_s7, 4  ;;  %s9228_s4 = scalar_lea.sflag [#allocation28], %s8082_s24  ;;  %s1506_s2 = int_to_ptr.vmem [resolvable:$true] %s1505_s2 }
 0x131   : > { %s7219_s11 = scalar_lea.hbm %s8242_s28, 16  ;;  %s7223_s17 = scalar_lea.hbm %s9310_s3, 128 }
 0x132   : > { %p7220_p11 = scmp.ne.s32.totalorder %s8242_s28, %s7219_s11  ;;  %p7224_p3 = scmp.lt.u32.totalorder %s8242_s28, %s9310_s3 }
 0x133   : > { %p7225_p0 = scmp.lt.u32.totalorder %s7223_s17, %s7219_s11  ;;  %p7227_p6 = scmp.lt.u32.totalorder %s7219_s11, %s8242_s28 }
 0x134   : > { %p7221_p13 = pnand %p7220_p11, %p9335_p8 }
 0x135   : > { %p7226_p12 = por %p7225_p0, %p7224_p3 }
 0x136   : > { %p7222_p1 = pneg %p7221_p13 }
 0x137   : > { %p7228_p5 = por %p7227_p6, %p7226_p12 }
 0x139   : > { %p7229_p4 = pnand %p7228_p5, %p7222_p1 }
 0x13b   : > { %7232 = shalt.err (!%p7229_p4)
}
 0x13c   : > { %s7233_s18 = scalar_lea.vmem %s1506_s2, 16  ;;  %s7733_s13 = smov [#allocation27]  }
 0x13d   : > { %p7234_p2 = scmp.ne.s32.totalorder %s1506_s2, %s7233_s18  ;;  %s7237_s7 = sshll.u32 %s7733_s13, 4  ;;  %s7238_s7 = int_to_ptr.vmem [resolvable:$false] %s7237_s7 }
 0x13e   : > { %s7239_s0 = scalar_lea.vmem %s7238_s7, 32  ;;  %p7240_p9 = scmp.lt.s32.totalorder %s1506_s2, %s7238_s7 }
 0x13f   : > { %p7235_p7 = pnand %p7234_p2, %p9335_p8  ;;  %p7241_p11 = scmp.lt.s32.totalorder %s7239_s0, %s7233_s18 }
 0x141   : > { %p7236_p10 = pneg %p7235_p7  ;;  %p7242_p13 = por %p7241_p11, %p7240_p9 }
 0x143   : > { %p7243_p0 = pnand %p7242_p13, %p7236_p10 }
 0x145   : > { %7246 = shalt.err (!%p7243_p0)
}
 0x146   : > { %6803 = dma.hbm_to_vmem [thread:$0]  (%p9335_p8), %s8242_s28, 16, %s1506_s2, %s9228_s4  }
 0x147   : > { %s8263_s11 = scalar_lea.hbm %s9309_s5, %s8076_s26  ;;  %s1543_s0 = scalar_lea.vmem [#allocation30], %s8079_s12 }
 0x148   : > { %s1550_s17 = sshll.u32 %s1543_s0, 4  ;;  %s9230_s18 = scalar_lea.sflag [#allocation31], %s8082_s24  ;;  %s8266_s17 = int_to_ptr.vmem [resolvable:$true] %s1550_s17 }
 0x149   : > { %s7247_s13 = scalar_lea.hbm %s8263_s11, 512  ;;  %s7251_s7 = scalar_lea.hbm %s9309_s5, 4096 }
 0x14a   : > { %p7248_p1 = scmp.ne.s32.totalorder %s8263_s11, %s7247_s13  ;;  %p7252_p6 = scmp.lt.u32.totalorder %s8263_s11, %s9309_s5 }
 0x14b   : > { %p7253_p5 = scmp.lt.u32.totalorder %s7251_s7, %s7247_s13  ;;  %p7255_p2 = scmp.lt.u32.totalorder %s7247_s13, %s8263_s11 }
 0x14c   : > { %p7249_p3 = pnand %p7248_p1, %p9335_p8 }
 0x14d   : > { %p7254_p4 = por %p7253_p5, %p7252_p6 }
 0x14e   : > { %p7250_p12 = pneg %p7249_p3 }
 0x14f   : > { %p7256_p7 = por %p7255_p2, %p7254_p4 }
 0x151   : > { %p7257_p10 = pnand %p7256_p7, %p7250_p12 }
 0x153   : > { %7260 = shalt.err (!%p7257_p10)
}
 0x154   : > { %s7261_s28 = scalar_lea.vmem %s8266_s17, 512  ;;  %s7734_s2 = smov [#allocation30]  }
 0x155   : > { %p7262_p9 = scmp.ne.s32.totalorder %s8266_s17, %s7261_s28  ;;  %s7265_s0 = sshll.u32 %s7734_s2, 4  ;;  %s7266_s0 = int_to_ptr.vmem [resolvable:$false] %s7265_s0 }
 0x156   : > { %s7267_s4 = scalar_lea.vmem %s7266_s0, 1024  ;;  %p7268_p0 = scmp.lt.s32.totalorder %s8266_s17, %s7266_s0 }
 0x157   : > { %p7263_p11 = pnand %p7262_p9, %p9335_p8  ;;  %p7269_p1 = scmp.lt.s32.totalorder %s7267_s4, %s7261_s28 }
 0x159   : > { %p7264_p13 = pneg %p7263_p11  ;;  %p7270_p3 = por %p7269_p1, %p7268_p0 }
 0x15b   : > { %p7271_p6 = pnand %p7270_p3, %p7264_p13 }
 0x15d   : > { %7274 = shalt.err (!%p7271_p6)
}
 0x15e   : > { %6805 = dma.hbm_to_vmem [thread:$0]  (%p9335_p8), %s8263_s11, 512, %s8266_s17, %s9230_s18, %s7726_s10, %s7726_s10, %s7727_s16  }
 0x15f   : > { %s8293_s4 = scalar_lea.hbm %s9306_s14, %s8076_s26  ;;  %s1194_s13 = scalar_lea.vmem [#allocation8], %s8079_s12 }
 0x160   : > { %s1201_s7 = sshll.u32 %s1194_s13, 4  ;;  %s8300_s28 = scalar_lea.hbm %s9305_s20, %s8076_s26  ;;  %s8296_s7 = int_to_ptr.vmem [resolvable:$true] %s1201_s7 }
 0x161   : > { %s1191_s2 = scalar_lea.sflag [#allocation5], %s8073_s21  ;;  %s7275_s0 = scalar_lea.hbm %s8293_s4, 512 }
 0x162   : > { %p7276_p12 = scmp.ne.s32.totalorder %s8293_s4, %s7275_s0  ;;  %s7279_s3 = scalar_lea.hbm %s9306_s14, 4096 }
 0x163   : > { %p7280_p2 = scmp.lt.u32.totalorder %s8293_s4, %s9306_s14  ;;  %p7281_p7 = scmp.lt.u32.totalorder %s7279_s3, %s7275_s0 }
 0x164   : > { %p7277_p5 = pnand %p7276_p12, %p9335_p8  ;;  %p7283_p9 = scmp.lt.u32.totalorder %s7275_s0, %s8293_s4 }
 0x165   : > { %p7282_p10 = por %p7281_p7, %p7280_p2 }
 0x166   : > { %p7278_p4 = pneg %p7277_p5 }
 0x167   : > { %p7284_p11 = por %p7283_p9, %p7282_p10 }
 0x169   : > { %p7285_p13 = pnand %p7284_p11, %p7278_p4 }
 0x16b   : > { %7288 = shalt.err (!%p7285_p13)
}
 0x16c   : > { %s7289_s11 = scalar_lea.vmem %s8296_s7, 512  ;;  %s7735_s17 = smov [#allocation8]  }
 0x16d   : > { %p7290_p0 = scmp.ne.s32.totalorder %s8296_s7, %s7289_s11  ;;  %s7293_s13 = sshll.u32 %s7735_s17, 4  ;;  %s7294_s13 = int_to_ptr.vmem [resolvable:$false] %s7293_s13 }
 0x16e   : > { %s7295_s18 = scalar_lea.vmem %s7294_s13, 1024  ;;  %p7296_p6 = scmp.lt.s32.totalorder %s8296_s7, %s7294_s13 }
 0x16f   : > { %p7291_p1 = pnand %p7290_p0, %p9335_p8  ;;  %p7297_p12 = scmp.lt.s32.totalorder %s7295_s18, %s7289_s11 }
 0x171   : > { %p7292_p3 = pneg %p7291_p1  ;;  %p7298_p5 = por %p7297_p12, %p7296_p6 }
 0x173   : > { %p7299_p2 = pnand %p7298_p5, %p7292_p3 }
 0x175   : > { %7302 = shalt.err (!%p7299_p2)
}
 0x176   : > { %6790 = dma.hbm_to_vmem [thread:$0]  (%p9335_p8), %s8293_s4, 512, %s8296_s7, %s1191_s2, %s7726_s10, %s7726_s10, %s7727_s16  }
 0x177   : > { %s1262_s3 = scalar_lea.vmem [#allocation11], %s8079_s12  ;;  %s8330_s0 = scalar_lea.hbm %s9302_s30, %s8076_s26 }
 0x178   : > { %s1269_s18 = sshll.u32 %s1262_s3, 4  ;;  %s7303_s11 = scalar_lea.hbm %s8300_s28, 512  ;;  %s8326_s18 = int_to_ptr.vmem [resolvable:$true] %s1269_s18 }
 0x179   : > { %p7304_p4 = scmp.ne.s32.totalorder %s8300_s28, %s7303_s11  ;;  %s7307_s17 = scalar_lea.hbm %s9305_s20, 4096 }
 0x17a   : > { %p7308_p9 = scmp.lt.u32.totalorder %s8300_s28, %s9305_s20  ;;  %p7309_p11 = scmp.lt.u32.totalorder %s7307_s17, %s7303_s11 }
 0x17b   : > { %p7305_p7 = pnand %p7304_p4, %p9335_p8  ;;  %p7311_p0 = scmp.lt.u32.totalorder %s7303_s11, %s8300_s28 }
 0x17c   : > { %p7310_p13 = por %p7309_p11, %p7308_p9 }
 0x17d   : > { %p7306_p10 = pneg %p7305_p7 }
 0x17e   : > { %p7312_p1 = por %p7311_p0, %p7310_p13 }
 0x180   : > { %p7313_p3 = pnand %p7312_p1, %p7306_p10 }
 0x182   : > { %7316 = shalt.err (!%p7313_p3)
}
 0x183   : > { %s7317_s4 = scalar_lea.vmem %s8326_s18, 512  ;;  %s7736_s7 = smov [#allocation11]  }
 0x184   : > { %p7318_p6 = scmp.ne.s32.totalorder %s8326_s18, %s7317_s4  ;;  %s7321_s2 = sshll.u32 %s7736_s7, 4  ;;  %s7322_s2 = int_to_ptr.vmem [resolvable:$false] %s7321_s2 }
 0x185   : > { %s7323_s13 = scalar_lea.vmem %s7322_s2, 1024  ;;  %p7324_p2 = scmp.lt.s32.totalorder %s8326_s18, %s7322_s2 }
 0x186   : > { %p7319_p12 = pnand %p7318_p6, %p9335_p8  ;;  %p7325_p4 = scmp.lt.s32.totalorder %s7323_s13, %s7317_s4 }
 0x188   : > { %p7320_p5 = pneg %p7319_p12  ;;  %p7326_p7 = por %p7325_p4, %p7324_p2 }
 0x18a   : > { %p7327_p9 = pnand %p7326_p7, %p7320_p5 }
 0x18c   : > { %7330 = shalt.err (!%p7327_p9)
}
 0x18d   : > { %s9337_s3 = scalar_lea.sflag [#allocation10], %s8082_s24  ;;  %s9338_s11 = sld [smem:[#allocation67_spill]] }
 0x18e   : > { %6792 = dma.hbm_to_vmem [thread:$0]  (%p9335_p8), %s8300_s28, 512, %s8326_s18, %s9337_s3, %s7726_s10, %s7726_s10, %s7727_s16  }
 0x18f   : > { %s1322_s4 = scalar_lea.vmem [#allocation14], %s8079_s12  ;;  %s7331_s13 = scalar_lea.hbm %s8330_s0, 512 }
 0x190   : > { %s1329_s7 = sshll.u32 %s1322_s4, 4  ;;  %p7332_p10 = scmp.ne.s32.totalorder %s8330_s0, %s7331_s13  ;;  %s8355_s7 = int_to_ptr.vmem [resolvable:$true] %s1329_s7 }
 0x191   : > { %s7335_s5 = scalar_lea.hbm %s9302_s30, 4096  ;;  %p7336_p0 = scmp.lt.u32.totalorder %s8330_s0, %s9302_s30 }
 0x192   : > { %p7333_p11 = pnand %p7332_p10, %p9335_p8  ;;  %p7337_p1 = scmp.lt.u32.totalorder %s7335_s5, %s7331_s13 }
 0x193   : > { %s9339_s17 = smov %s9338_s11  ;;  %s8359_s2 = scalar_lea.hbm %s9338_s11, %s8076_s26 }
 0x194   : > { %p7334_p13 = pneg %p7333_p11  ;;  %p7338_p3 = por %p7337_p1, %p7336_p0 }
 0x195   : > { %p7339_p6 = scmp.lt.u32.totalorder %s7331_s13, %s8330_s0 }
 0x197   : > { %p7340_p12 = por %p7339_p6, %p7338_p3 }
 0x199   : > { %p7341_p5 = pnand %p7340_p12, %p7334_p13 }
 0x19b   : > { %7344 = shalt.err (!%p7341_p5)
}
 0x19c   : > { %s7345_s28 = scalar_lea.vmem %s8355_s7, 512  ;;  %s7737_s18 = smov [#allocation14]  }
 0x19d   : > { %p7346_p2 = scmp.ne.s32.totalorder %s8355_s7, %s7345_s28  ;;  %s7349_s3 = sshll.u32 %s7737_s18, 4  ;;  %s7350_s3 = int_to_ptr.vmem [resolvable:$false] %s7349_s3 }
 0x19e   : > { %s7351_s11 = scalar_lea.vmem %s7350_s3, 1024  ;;  %p7352_p9 = scmp.lt.s32.totalorder %s8355_s7, %s7350_s3 }
 0x19f   : > { %p7347_p4 = pnand %p7346_p2, %p9335_p8  ;;  %p7353_p10 = scmp.lt.s32.totalorder %s7351_s11, %s7345_s28 }
 0x1a1   : > { %p7348_p7 = pneg %p7347_p4  ;;  %p7354_p11 = por %p7353_p10, %p7352_p9 }
 0x1a3   : > { %p7355_p0 = pnand %p7354_p11, %p7348_p7 }
 0x1a5   : > { %7358 = shalt.err (!%p7355_p0)
}
 0x1a6   : > { %s9340_s5 = scalar_lea.sflag [#allocation13], %s8082_s24  ;;  %s9341_s4 = sld [smem:[#allocation69_spill]] }
 0x1a7   : > { %6794 = dma.hbm_to_vmem [thread:$0]  (%p9335_p8), %s8330_s0, 512, %s8355_s7, %s9340_s5, %s7726_s10, %s7726_s10, %s7727_s16  }
 0x1a8   : > { %s1364_s13 = scalar_lea.vmem [#allocation17], %s8079_s12  ;;  %s7359_s3 = scalar_lea.hbm %s8359_s2, 512 }
 0x1a9   : > { %s1371_s28 = sshll.u32 %s1364_s13, 4  ;;  %p7360_p13 = scmp.ne.s32.totalorder %s8359_s2, %s7359_s3  ;;  %s8384_s28 = int_to_ptr.vmem [resolvable:$true] %s1371_s28 }
 0x1aa   : > { %s7363_s11 = scalar_lea.hbm %s9339_s17, 4096  ;;  %p7364_p6 = scmp.lt.u32.totalorder %s8359_s2, %s9339_s17 }
 0x1ab   : > { %p7361_p1 = pnand %p7360_p13, %p9335_p8  ;;  %p7365_p12 = scmp.lt.u32.totalorder %s7363_s11, %s7359_s3 }
 0x1ac   : > { %s8388_s18 = scalar_lea.hbm %s9341_s4, %s8076_s26  ;;  %p7367_p2 = scmp.lt.u32.totalorder %s7359_s3, %s8359_s2 }
 0x1ad   : > { %p7362_p3 = pneg %p7361_p1  ;;  %p7366_p5 = por %p7365_p12, %p7364_p6 }
 0x1af   : > { %p7368_p4 = por %p7367_p2, %p7366_p5 }
 0x1b1   : > { %p7369_p7 = pnand %p7368_p4, %p7362_p3 }
 0x1b3   : > { %7372 = shalt.err (!%p7369_p7)
}
 0x1b4   : > { %s7373_s0 = scalar_lea.vmem %s8384_s28, 512  ;;  %s7738_s7 = smov [#allocation17]  }
 0x1b5   : > { %p7374_p9 = scmp.ne.s32.totalorder %s8384_s28, %s7373_s0  ;;  %s7377_s5 = sshll.u32 %s7738_s7, 4  ;;  %s7378_s5 = int_to_ptr.vmem [resolvable:$false] %s7377_s5 }
 0x1b6   : > { %s7379_s13 = scalar_lea.vmem %s7378_s5, 1024  ;;  %p7380_p0 = scmp.lt.s32.totalorder %s8384_s28, %s7378_s5 }
 0x1b7   : > { %p7375_p10 = pnand %p7374_p9, %p9335_p8  ;;  %p7381_p13 = scmp.lt.s32.totalorder %s7379_s13, %s7373_s0 }
 0x1b9   : > { %p7376_p11 = pneg %p7375_p10  ;;  %p7382_p1 = por %p7381_p13, %p7380_p0 }
 0x1bb   : > { %p7383_p6 = pnand %p7382_p1, %p7376_p11 }
 0x1bd   : > { %7386 = shalt.err (!%p7383_p6)
}
 0x1be   : > { %s9342_s3 = scalar_lea.sflag [#allocation16], %s8082_s24  ;;  %s9343_s11 = sld [smem:[#allocation72_spill]] }
 0x1bf   : > { %6796 = dma.hbm_to_vmem [thread:$0]  (%p9335_p8), %s8359_s2, 512, %s8384_s28, %s9342_s3, %s7726_s10, %s7726_s10, %s7727_s16  }
 0x1c0   : > { %s1402_s0 = scalar_lea.vmem [#allocation20], %s8079_s12  ;;  %s7387_s13 = scalar_lea.hbm %s8388_s18, 512 }
 0x1c1   : > { %s1409_s7 = sshll.u32 %s1402_s0, 4  ;;  %p7388_p3 = scmp.ne.s32.totalorder %s8388_s18, %s7387_s13  ;;  %s8413_s7 = int_to_ptr.vmem [resolvable:$true] %s1409_s7 }
 0x1c2   : > { %s7391_s8 = scalar_lea.hbm %s9341_s4, 4096  ;;  %p7392_p2 = scmp.lt.u32.totalorder %s8388_s18, %s9341_s4 }
 0x1c3   : > { %p7389_p12 = pnand %p7388_p3, %p9335_p8  ;;  %p7393_p4 = scmp.lt.u32.totalorder %s7391_s8, %s7387_s13 }
 0x1c4   : > { %s9344_s6 = smov %s9343_s11  ;;  %s8417_s5 = scalar_lea.hbm %s9343_s11, %s8175_s19 }
 0x1c5   : > { %p7390_p5 = pneg %p7389_p12  ;;  %p7394_p7 = por %p7393_p4, %p7392_p2 }
 0x1c6   : > { %p7395_p9 = scmp.lt.u32.totalorder %s7387_s13, %s8388_s18 }
 0x1c8   : > { %p7396_p10 = por %p7395_p9, %p7394_p7 }
 0x1ca   : > { %p7397_p11 = pnand %p7396_p10, %p7390_p5 }
 0x1cc   : > { %7400 = shalt.err (!%p7397_p11)
}
 0x1cd   : > { %s7401_s2 = scalar_lea.vmem %s8413_s7, 512  ;;  %s7739_s28 = smov [#allocation20]  }
 0x1ce   : > { %p7402_p0 = scmp.ne.s32.totalorder %s8413_s7, %s7401_s2  ;;  %s7405_s3 = sshll.u32 %s7739_s28, 4  ;;  %s7406_s3 = int_to_ptr.vmem [resolvable:$false] %s7405_s3 }
 0x1cf   : > { %s7407_s11 = scalar_lea.vmem %s7406_s3, 1024  ;;  %p7408_p6 = scmp.lt.s32.totalorder %s8413_s7, %s7406_s3 }
 0x1d0   : > { %p7403_p13 = pnand %p7402_p0, %p9335_p8  ;;  %p7409_p3 = scmp.lt.s32.totalorder %s7407_s11, %s7401_s2 }
 0x1d2   : > { %p7404_p1 = pneg %p7403_p13  ;;  %p7410_p12 = por %p7409_p3, %p7408_p6 }
 0x1d4   : > { %p7411_p2 = pnand %p7410_p12, %p7404_p1 }
 0x1d6   : > { %7414 = shalt.err (!%p7411_p2)
}
 0x1d7   : > { %s9345_s8 = scalar_lea.sflag [#allocation19], %s8082_s24  ;;  %s9346_s0 = sld [smem:[#allocation74_spill]] }
 0x1d8   : > { %6798 = dma.hbm_to_vmem [thread:$0]  (%p9335_p8), %s8388_s18, 512, %s8413_s7, %s9345_s8, %s7726_s10, %s7726_s10, %s7727_s16  }
 0x1d9   : > { %s1447_s2 = scalar_lea.vmem [#allocation23], %s8073_s21  ;;  %s7415_s11 = scalar_lea.hbm %s8417_s5, 16 }
 0x1da   : > { %s1454_s28 = sshll.u32 %s1447_s2, 4  ;;  %p7416_p5 = scmp.ne.s32.totalorder %s8417_s5, %s7415_s11  ;;  %s1455_s28 = int_to_ptr.vmem [resolvable:$true] %s1454_s28 }
 0x1db   : > { %s7419_s4 = scalar_lea.hbm %s9344_s6, 128  ;;  %p7420_p9 = scmp.lt.u32.totalorder %s8417_s5, %s9344_s6 }
 0x1dc   : > { %p7417_p4 = pnand %p7416_p5, %p9335_p8  ;;  %p7421_p10 = scmp.lt.u32.totalorder %s7419_s4, %s7415_s11 }
 0x1dd   : > { %s9347_s13 = smov %s9346_s0  ;;  %s8444_s3 = scalar_lea.hbm %s9346_s0, %s8175_s19 }
 0x1de   : > { %p7418_p7 = pneg %p7417_p4  ;;  %p7422_p11 = por %p7421_p10, %p7420_p9 }
 0x1df   : > { %p7423_p0 = scmp.lt.u32.totalorder %s7415_s11, %s8417_s5 }
 0x1e1   : > { %p7424_p13 = por %p7423_p0, %p7422_p11 }
 0x1e3   : > { %p7425_p1 = pnand %p7424_p13, %p7418_p7 }
 0x1e5   : > { %7428 = shalt.err (!%p7425_p1)
}
 0x1e6   : > { %s7429_s14 = scalar_lea.vmem %s1455_s28, 16  ;;  %s7740_s19 = smov [#allocation23]  }
 0x1e7   : > { %p7430_p6 = scmp.ne.s32.totalorder %s1455_s28, %s7429_s14  ;;  %s7433_s18 = sshll.u32 %s7740_s19, 4  ;;  %s7434_s18 = int_to_ptr.vmem [resolvable:$false] %s7433_s18 }
 0x1e8   : > { %s7435_s7 = scalar_lea.vmem %s7434_s18, 32  ;;  %p7436_p2 = scmp.lt.s32.totalorder %s1455_s28, %s7434_s18 }
 0x1e9   : > { %p7431_p3 = pnand %p7430_p6, %p9335_p8  ;;  %p7437_p5 = scmp.lt.s32.totalorder %s7435_s7, %s7429_s14 }
 0x1eb   : > { %p7432_p12 = pneg %p7431_p3  ;;  %p7438_p4 = por %p7437_p5, %p7436_p2 }
 0x1ed   : > { %p7439_p9 = pnand %p7438_p4, %p7432_p12 }
 0x1ef   : > { %7442 = shalt.err (!%p7439_p9)
}
 0x1f0   : > { %s9348_s4 = scalar_lea.sflag [#allocation22], %s8082_s24  ;;  %s9349_s8 = sld [smem:[#allocation77_spill]] }
 0x1f1   : > { %6800 = dma.hbm_to_vmem [thread:$0]  (%p9335_p8), %s8417_s5, 16, %s1455_s28, %s9348_s4  }
 0x1f2   : > { %s1481_s14 = scalar_lea.vmem [#allocation26], %s8073_s21  ;;  %s7443_s11 = scalar_lea.hbm %s8444_s3, 16 }
 0x1f3   : > { %s1488_s0 = sshll.u32 %s1481_s14, 4  ;;  %p7444_p7 = scmp.ne.s32.totalorder %s8444_s3, %s7443_s11  ;;  %s1489_s0 = int_to_ptr.vmem [resolvable:$true] %s1488_s0 }
 0x1f4   : > { %s7447_s19 = scalar_lea.hbm %s9347_s13, 128  ;;  %p7448_p0 = scmp.lt.u32.totalorder %s8444_s3, %s9347_s13 }
 0x1f5   : > { %p7445_p10 = pnand %p7444_p7, %p9335_p8  ;;  %p7449_p13 = scmp.lt.u32.totalorder %s7447_s19, %s7443_s11 }
 0x1f6   : > { %s8464_s2 = scalar_lea.hbm %s9349_s8, %s8076_s26  ;;  %p7451_p6 = scmp.lt.u32.totalorder %s7443_s11, %s8444_s3 }
 0x1f7   : > { %p7446_p11 = pneg %p7445_p10  ;;  %p7450_p1 = por %p7449_p13, %p7448_p0 }
 0x1f9   : > { %p7452_p3 = por %p7451_p6, %p7450_p1 }
 0x1fb   : > { %p7453_p12 = pnand %p7452_p3, %p7446_p11 }
 0x1fd   : > { %7456 = shalt.err (!%p7453_p12)
}
 0x1fe   : > { %s7457_s18 = scalar_lea.vmem %s1489_s0, 16  ;;  %s7741_s21 = smov [#allocation26]  }
 0x1ff   : > { %p7458_p2 = scmp.ne.s32.totalorder %s1489_s0, %s7457_s18  ;;  %s7461_s5 = sshll.u32 %s7741_s21, 4  ;;  %s7462_s5 = int_to_ptr.vmem [resolvable:$false] %s7461_s5 }
 0x200   : > { %s7463_s28 = scalar_lea.vmem %s7462_s5, 32  ;;  %p7464_p9 = scmp.lt.s32.totalorder %s1489_s0, %s7462_s5 }
 0x201   : > { %p7459_p5 = pnand %p7458_p2, %p9335_p8  ;;  %p7465_p7 = scmp.lt.s32.totalorder %s7463_s28, %s7457_s18 }
 0x203   : > { %p7460_p4 = pneg %p7459_p5  ;;  %p7466_p10 = por %p7465_p7, %p7464_p9 }
 0x205   : > { %p7467_p0 = pnand %p7466_p10, %p7460_p4 }
 0x207   : > { %7470 = shalt.err (!%p7467_p0)
}
 0x208   : > { %s9350_s7 = scalar_lea.sflag [#allocation25], %s8082_s24  ;;  %s9351_s4 = sld [smem:[#allocation79_spill]] }
 0x209   : > { %6802 = dma.hbm_to_vmem [thread:$0]  (%p9335_p8), %s8444_s3, 16, %s1489_s0, %s9350_s7  }
 0x20a   : > { %s1522_s14 = scalar_lea.vmem [#allocation29], %s8079_s12  ;;  %s7471_s18 = scalar_lea.hbm %s8464_s2, 512 }
 0x20b   : > { %s1529_s11 = sshll.u32 %s1522_s14, 4  ;;  %p7472_p11 = scmp.ne.s32.totalorder %s8464_s2, %s7471_s18  ;;  %s8482_s11 = int_to_ptr.vmem [resolvable:$true] %s1529_s11 }
 0x20c   : > { %s7475_s21 = scalar_lea.hbm %s9349_s8, 4096  ;;  %p7476_p6 = scmp.lt.u32.totalorder %s8464_s2, %s9349_s8 }
 0x20d   : > { %p7473_p13 = pnand %p7472_p11, %p9335_p8  ;;  %p7477_p3 = scmp.lt.u32.totalorder %s7475_s21, %s7471_s18 }
 0x20e   : > { %s8486_s19 = scalar_lea.hbm %s9351_s4, %s8076_s26  ;;  %p7479_p2 = scmp.lt.u32.totalorder %s7471_s18, %s8464_s2 }
 0x20f   : > { %p7474_p1 = pneg %p7473_p13  ;;  %p7478_p12 = por %p7477_p3, %p7476_p6 }
 0x211   : > { %p7480_p5 = por %p7479_p2, %p7478_p12 }
 0x213   : > { %p7481_p4 = pnand %p7480_p5, %p7474_p1 }
 0x215   : > { %7484 = shalt.err (!%p7481_p4)
}
 0x216   : > { %s7485_s3 = scalar_lea.vmem %s8482_s11, 512  ;;  %s7742_s26 = smov [#allocation29]  }
 0x217   : > { %p7486_p9 = scmp.ne.s32.totalorder %s8482_s11, %s7485_s3  ;;  %s7489_s0 = sshll.u32 %s7742_s26, 4  ;;  %s7490_s0 = int_to_ptr.vmem [resolvable:$false] %s7489_s0 }
 0x218   : > { %s7491_s5 = scalar_lea.vmem %s7490_s0, 1024  ;;  %p7492_p0 = scmp.lt.s32.totalorder %s8482_s11, %s7490_s0 }
 0x219   : > { %p7487_p7 = pnand %p7486_p9, %p9335_p8  ;;  %p7493_p11 = scmp.lt.s32.totalorder %s7491_s5, %s7485_s3 }
 0x21b   : > { %p7488_p10 = pneg %p7487_p7  ;;  %p7494_p13 = por %p7493_p11, %p7492_p0 }
 0x21d   : > { %p7495_p6 = pnand %p7494_p13, %p7488_p10 }
 0x21f   : > { %7498 = shalt.err (!%p7495_p6)
}
 0x220   : > { %s9352_s28 = scalar_lea.sflag [#allocation28], %s8082_s24  ;;  %s1564_s7 = scalar_lea.vmem [#allocation32], %s8079_s12 }
 0x221   : > { %6804 = dma.hbm_to_vmem [thread:$0]  (%p9335_p8), %s8464_s2, 512, %s8482_s11, %s9352_s28, %s7726_s10, %s7726_s10, %s7727_s16  }
 0x222   : > { %s1571_s14 = sshll.u32 %s1564_s7, 4  ;;  %s7499_s18 = scalar_lea.hbm %s8486_s19, 512  ;;  %s8511_s14 = int_to_ptr.vmem [resolvable:$true] %s1571_s14 }
 0x223   : > { %p7500_p1 = scmp.ne.s32.totalorder %s8486_s19, %s7499_s18  ;;  %s7503_s21 = scalar_lea.hbm %s9351_s4, 4096 }
 0x224   : > { %p7504_p2 = scmp.lt.u32.totalorder %s8486_s19, %s9351_s4  ;;  %p7505_p5 = scmp.lt.u32.totalorder %s7503_s21, %s7499_s18 }
 0x225   : > { %p7501_p3 = pnand %p7500_p1, %p9335_p8  ;;  %p7507_p9 = scmp.lt.u32.totalorder %s7499_s18, %s8486_s19 }
 0x226   : > { %p7506_p4 = por %p7505_p5, %p7504_p2 }
 0x227   : > { %p7502_p12 = pneg %p7501_p3 }
 0x228   : > { %p7508_p7 = por %p7507_p9, %p7506_p4 }
 0x22a   : > { %p7509_p10 = pnand %p7508_p7, %p7502_p12 }
 0x22c   : > { %7512 = shalt.err (!%p7509_p10)
}
 0x22d   : > { %s7513_s12 = scalar_lea.vmem %s8511_s14, 512  ;;  %s7743_s2 = smov [#allocation32]  }
 0x22e   : > { %p7514_p0 = scmp.ne.s32.totalorder %s8511_s14, %s7513_s12  ;;  %s7517_s11 = sshll.u32 %s7743_s2, 4  ;;  %s7518_s11 = int_to_ptr.vmem [resolvable:$false] %s7517_s11 }
 0x22f   : > { %s7519_s3 = scalar_lea.vmem %s7518_s11, 1024  ;;  %p7520_p6 = scmp.lt.s32.totalorder %s8511_s14, %s7518_s11 }
 0x230   : > { %p7515_p11 = pnand %p7514_p0, %p9335_p8  ;;  %p7521_p1 = scmp.lt.s32.totalorder %s7519_s3, %s7513_s12 }
 0x232   : > { %p7516_p13 = pneg %p7515_p11  ;;  %p7522_p3 = por %p7521_p1, %p7520_p6 }
 0x234   : > { %p7523_p2 = pnand %p7522_p3, %p7516_p13 }
 0x236   : > { %7526 = shalt.err (!%p7523_p2)
}
 0x237   : > { %s9353_s26 = scalar_lea.sflag [#allocation31], %s8082_s24 }
 0x238   : > { %6806 = dma.hbm_to_vmem [thread:$0]  (%p9335_p8), %s8486_s19, 512, %s8511_s14, %s9353_s26, %s7726_s10, %s7726_s10, %s7727_s16  }
 0x239 PF: > { %p9354_p12 = scmp.ne.s32.totalorder %s9334_s9, 0 }
 0x23b   : > { %1583 = sbr.rel (%p9354_p12) target bundleno = 7485 (0x1d3d), region = 168 }
 0x242   : > { %p9355_p5 = scmp.eq.s32.totalorder %s8010_s1, 0 }
 0x244   : > { %7600 = dma.done.wait (%p9355_p5), [#allocation7], 32   ;;  %p9356_p4 = pmov %p9355_p5 }
 0x245   : > { %s8542_s22 = sand.u32 1, %s7661_s15   ;;  %p9359_p8 = scmp.ne.s32.totalorder %s9328_s29, 0 }
 0x246   : > { %7602 = vsyncadd (%p9356_p4), [#allocation7], 4294967264  ;;  %9357 = sst [smem:[#allocation99_spill]] %s8542_s22  ;;  %s8545_s24 = sshll.u32 %s8542_s22, 5 }
 0x247   : > { %s1590_s10 = scalar_lea.sflag [#allocation5], %s8542_s22  ;;  %s8549_s16 = scalar_lea.vmem [#allocation8], %s8545_s24 }
 0x248   : > { %9358 = sst [smem:[#allocation100_spill]] %s8549_s16 }
 0x249   : > { %7604 = dma.done.wait (%p9359_p8), %s1590_s10, 512  }
 0x24a   : > { %7606 = vsyncadd (%p9359_p8), %s1590_s10, 4294966784  ;;  %s8556_s9 = sand.u32 1, %s8010_s1   ;;  %s8560_s0 = scalar_lea.vmem [#allocation9], %s8545_s24 }
 0x24b   : > { %s1599_s19 = scalar_lea.sflag [#allocation10], %s8556_s9  ;;  %9360 = sst [smem:[#allocation101_spill]] %s8560_s0 }
 0x24c   : > { %7608 = dma.done.wait (%p9359_p8), %s1599_s19, 1024  }
 0x24d   : > { %7610 = vsyncadd (%p9359_p8), %s1599_s19, 4294966272  ;;  %s8567_s5 = scalar_lea.vmem [#allocation11], %s8545_s24  ;;  %s1617_s28 = scalar_lea.sflag [#allocation13], %s8556_s9 }
 0x24e   : > { %9361 = sst [smem:[#allocation102_spill]] %s8567_s5  ;;  %s8571_s7 = scalar_lea.vmem [#allocation12], %s8545_s24 }
 0x24f   : > { %9362 = sst [smem:[#allocation103_spill]] %s8571_s7 }
 0x250   : > { %7612 = dma.done.wait (%p9359_p8), %s1617_s28, 1024  }
 0x251   : > { %7614 = vsyncadd (%p9359_p8), %s1617_s28, 4294966272  ;;  %s8578_s1 = scalar_lea.vmem [#allocation14], %s8545_s24  ;;  %s1635_s14 = scalar_lea.sflag [#allocation16], %s8556_s9 }
 0x252   : > { %9363 = sst [smem:[#allocation104_spill]] %s8578_s1  ;;  %s8582_s18 = scalar_lea.vmem [#allocation15], %s8545_s24 }
 0x253   : > { %9364 = sst [smem:[#allocation105_spill]] %s8582_s18 }
 0x254   : > { %7616 = dma.done.wait (%p9359_p8), %s1635_s14, 1024  }
 0x255   : > { %7618 = vsyncadd (%p9359_p8), %s1635_s14, 4294966272  ;;  %s8589_s21 = scalar_lea.vmem [#allocation17], %s8545_s24  ;;  %s1653_s12 = scalar_lea.sflag [#allocation19], %s8556_s9 }
 0x256   : > { %9365 = sst [smem:[#allocation106_spill]] %s8589_s21 }
 0x257   : > { %7620 = dma.done.wait (%p9359_p8), %s1653_s12, 528  }
 0x258   : > { %7622 = vsyncadd (%p9359_p8), %s1653_s12, 4294966768  ;;  %s8598_s11 = scalar_lea.vmem [#allocation20], %s8545_s24  ;;  %s1670_s3 = scalar_lea.sflag [#allocation22], %s8556_s9 }
 0x259   : > { %9366 = sst [smem:[#allocation107_spill]] %s8598_s11 }
 0x25a   : > { %7624 = dma.done.wait (%p9359_p8), %s1670_s3, 32  }
 0x25b   : > { %7626 = vsyncadd (%p9359_p8), %s1670_s3, 4294967264  ;;  %s1686_s19 = scalar_lea.sflag [#allocation25], %s8556_s9 }
 0x25c   : > { %7628 = dma.done.wait (%p9359_p8), %s1686_s19, 32  }
 0x25d   : > { %7630 = vsyncadd (%p9359_p8), %s1686_s19, 4294967264  ;;  %s1702_s12 = scalar_lea.sflag [#allocation28], %s8556_s9 }
 0x25e   : > { %7632 = dma.done.wait (%p9359_p8), %s1702_s12, 528  }
 0x25f   : > { %7634 = vsyncadd (%p9359_p8), %s1702_s12, 4294966768  ;;  %s8621_s3 = scalar_lea.vmem [#allocation29], %s8545_s24  ;;  %s1719_s2 = scalar_lea.sflag [#allocation31], %s8556_s9 }
 0x260   : > { %9367 = sst [smem:[#allocation108_spill]] %s8621_s3  ;;  %s8625_s19 = scalar_lea.vmem [#allocation30], %s8545_s24 }
 0x261   : > { %9368 = sst [smem:[#allocation109_spill]] %s8625_s19 }
 0x262   : > { %7636 = dma.done.wait (%p9359_p8), %s1719_s2, 1024  }
 0x263   : > { %7638 = vsyncadd (%p9359_p8), %s1719_s2, 4294966272  ;;  %s8632_s14 = scalar_lea.vmem [#allocation32], %s8545_s24 }
 0x264   : > { %9369 = sst [smem:[#allocation110_spill]] %s8632_s14 }
 0x265   : > { %1736 = sfence }
 0x266   : > { %s9370_s26 = sld [smem:[#allocation84_spill]]  ;;  %s9371_s12 = sld [smem:[#allocation89_spill]] }
 0x267   : > { %s9372_s10 = sld [smem:[#allocation88_spill]]  ;;  %s9373_s28 = sld [smem:[#allocation45_spill]] }
 0x268   : > { %s9376_s6 = sld [smem:[#allocation48_spill]]  ;;  %s9378_s13 = sld [smem:[#allocation51_spill]] }
 0x269   : > { %s9379_s17 = sld [smem:[#allocation52_spill]]  ;;  %s9380_s29 = sld [smem:[#allocation53_spill]] }
 0x26a   : > { %s9381_s24 = sld [smem:[#allocation56_spill]]  ;;  %s9382_s25 = sld [smem:[#allocation57_spill]] }
 0x26b   : > { %s9383_s27 = sld [smem:[#allocation58_spill]]  ;;  %s9384_s23 = sld [smem:[#allocation62_spill]] }
 0x26c   : > { %s9246_s20 = sand.u32 1, %s9370_s26   ;;  %p1958_p9 = scmp.lt.s32.totalorder %s9371_s12, 1 }
 0x26d   : > { %s8638_s2 = sshll.u32 %s9246_s20, 3  ;;  %p1974_p7 = scmp.lt.s32.totalorder %s9372_s10, 7 }
 0x26e   : > { %s9465_s12 = smov (!%p1958_p9, %s9371_s12), 1  ;;  %s9386_s20 = sld [smem:[#allocation59_spill]] }
 0x26f   : > { %s8643_s30 = scalar_select %p1974_p7, %s9372_s10, 7 }
 0x270   : > { %s8645_s26 = sshll.u32 %s9465_s12, 3  ;;  %s6141_s15 = sshll.u32 %s9465_s12, 2 }
 0x271   : > { %9385 = sst [smem:[#allocation111_spill]] %s8645_s26  ;;  %s1961_s3 = scalar_lea.vmem %s9373_s28, %s8645_s26 }
 0x272   : > { %s9387_s11 = sld [smem:[#allocation63_spill]]  ;;  %s9388_s16 = sld [smem:[#allocation64_spill]] }
 0x273   : > { %s9389_s14 = sld [smem:[#allocation71_spill]]  ;;  %s9390_s1 = sld [smem:[#allocation76_spill]] }
 0x274   : > { %s8654_s21 = scalar_lea.vmem %s9376_s6, %s6141_s15  ;;  %s1979_s5 = scalar_lea.vmem %s9378_s13, %s8643_s30 }
 0x275   : > { %9391 = sst [smem:[#allocation112_spill]] %s8654_s21  ;;  %s1982_s22 = scalar_lea.vmem %s9379_s17, %s8643_s30 }
 0x276   : > { %s6251_s7 = sshll.u32 %s8643_s30, 5  ;;  %s1990_s12 = scalar_lea.vmem %s9381_s24, %s8643_s30 }
 0x277   : > { %s8664_s10 = scalar_lea.vmem %s9380_s29, %s6251_s7  ;;  %s1993_s28 = scalar_lea.vmem %s9382_s25, %s8643_s30 }
 0x278   : > { %s1996_s0 = scalar_lea.vmem %s9383_s27, %s8643_s30  ;;  %s6252_s4 = sshll.u32 %s8643_s30, 6 }
 0x279   : > { %s2004_s9 = scalar_lea.vmem %s9384_s23, %s8643_s30  ;;  %s8676_s18 = scalar_lea.vmem %s9386_s20, %s6252_s4 }
 0x27a   : > { %s2007_s26 = scalar_lea.vmem %s9387_s11, %s8643_s30  ;;  %s2010_s6 = scalar_lea.vmem %s9388_s16, %s8643_s30 }
 0x27b   : > { %s8683_s15 = scalar_lea.vmem %s9389_s14, %s6252_s4  ;;  %s2018_s21 = scalar_lea.vmem %s9390_s1, %s8643_s30 }
 0x27c   : > { %s1957_s8 = scalar_lea.vmem [#allocation33], %s8638_s2  ;;  %s9392_s19 = sld [smem:[#allocation88_spill]] }
 0x282   : > { %p6148_p10 = scmp.ne.s32.totalorder %s9392_s19, 0 }
 0x283   : > { %v2023_v0 = vld [vmem:[%s1961_s3] sm:$0xff] (!%p6148_p10)  ;;  %vm2024_vm0 = vcmask (!%p6148_p10), 261120  }
 0x284   : > { %2022 = sbr.rel (%p6148_p10) target bundleno = 651 (0x28b), region = 244  ;;  %2025 = vst.msk [vmem:[#allocation2] sm:$0xff] (!%p6148_p10), %vm2024_vm0, %v2023_v0 }
 0x28b PF: > { %v2026_v1 = vld [vmem:[#allocation2] sm:$0xff]  ;;  %vm2029_vm1 = vcmask 261120   ;;  %s9393_s25 = sld [smem:[#allocation103_spill]]  ;;  %v2144_v9 = vld [vmem:[%s8676_s18 + $0x8] sm:$0xff]  ;;  %v7744_v11 = vmov 0.0|0.0   ;;  %v2145_v12 = vld [vmem:[%s8676_s18 + $0x10] sm:$0xff] }
 0x28c   : > { %v2030_v2 = vsel %vm2029_vm1, %v2026_v1, 0.0  ;;  %v2143_v8 = vld [vmem:[%s8676_s18] sm:$0xff]  ;;  %6692 = vmatprep.subr.bf16.mxu1 %v7744_v11  ;;  %6686 = vmatprep.subr.bf16.mxu0 %v7744_v11  ;;  %v2146_v13 = vld [vmem:[%s8676_s18 + $0x18] sm:$0xff]  ;;  %v2148_v16 = vld [vmem:[%s8676_s18 + $0x28] sm:$0xff]  ;;  %vm7745_vm2 = vmmov 0   ;;  %v7746_v19 = vmov 0.0  }
 0x28d   : > { %2031 = vadd.xlane.f32.xlu0 %v2030_v2  ;;  %v6693_v10 = vpack.c.bf16 %v2144_v9, %v2143_v8  ;;  %v6696_v14 = vpack.c.bf16 %v2146_v13, %v2145_v12  ;;  %v2147_v15 = vld [vmem:[%s8676_s18 + $0x20] sm:$0xff]  ;;  %6412 = vmatprep.mubr.msk.f32.mxu1 %vm7745_vm2, %v7746_v19  ;;  %s9394_s20 = sld [smem:[#allocation46_spill]]  ;;  %s9395_s27 = sld [smem:[#allocation111_spill]]  ;;  %v2149_v24 = vld [vmem:[%s8676_s18 + $0x30] sm:$0xff]  ;;  %v2150_v25 = vld [vmem:[%s8676_s18 + $0x38] sm:$0xff]  ;;  %vm2158_vm3 = vcmask 523264  }
 0x28e   : > { %6393 = vmatprep.mubr.msk.f32.mxu0 %vm7745_vm2, %v7746_v19  ;;  %v6699_v20 = vpack.c.bf16 %v2148_v16, %v2147_v15  ;;  %s9396_s23 = sld [smem:[#allocation99_spill]]  ;;  %v6702_v27 = vpack.c.bf16 %v2150_v25, %v2149_v24  ;;  %v6153_v38 = vld [vmem:[%s1990_s12] ss:$0 sm:$0xff]  ;;  %s7747_s18 = smov 96   ;;  %vm2232_vm4 = vcmask 64512   ;;  %vm2327_vm5 = vcmask 1044480  }
 0x28f   : > { %6694 = vmatpush3.bf16.msra.mxu1 %v6693_v10  ;;  %v6151_v42 = vld [vmem:[%s1996_s0] ss:$0 sm:$0xff]  ;;  %vm2310_vm6 = vcmask 39936   ;;  %s7748_s0 = smov 120   ;;  %s7749_s11 = smov 112   ;;  %vm2914_vm7 = vcmask 130048  }
 0x290   : > { %6695 = vmatprep.subr.bf16.mxu1 %v7744_v11  ;;  %s7750_s14 = smov 104   ;;  %s7751_s3 = smov 88   ;;  %vm2916_vm8 = vcmask 195584   ;;  %vm3329_vm9 = vcmask 56320   ;;  %vm3346_vm10 = vcmask 1046528   ;;  %vm4340_vm11 = vcmask 31744  }
 0x291   : > { %v2059_v17 = vld [vmem:[%s9393_s25] sm:$0xff]  ;;  %v2060_v18 = vld [vmem:[%s9393_s25 + $0x8] sm:$0xff]  ;;  %v2061_v22 = vld [vmem:[%s9393_s25 + $0x10] sm:$0xff]  ;;  %s7752_s19 = smov 72   ;;  %s7753_s29 = smov 8   ;;  %vm4357_vm12 = vcmask 1043456  }
 0x292   : > { %v6687_v21 = vpack.c.bf16 %v2060_v18, %v2059_v17  ;;  %v2062_v23 = vld [vmem:[%s9393_s25 + $0x18] sm:$0xff]  ;;  %s7754_s24 = smov 80   ;;  %s9402_s12 = sld [smem:[#allocation102_spill]] }
 0x293   : > { %6697 = vmatpush3.bf16.msra.mxu1 %v6696_v14  ;;  %v6690_v26 = vpack.c.bf16 %v2062_v23, %v2061_v22  ;;  %s9397_s17 = scalar_lea.vmem %s9394_s20, %s9395_s27  ;;  %s9403_s4 = sld [smem:[#allocation109_spill]] }
 0x294   : > { %6698 = vmatprep.subr.bf16.mxu1 %v7744_v11  ;;  %6688 = vmatpush3.bf16.msra.mxu0 %v6687_v21  ;;  %v2058_v28 = vld [vmem:[%s9397_s17] sm:$0x1f]  ;;  %s9399_s16 = scalar_lea.vmem [#allocation24], %s9396_s23  ;;  %s9401_s1 = scalar_lea.vmem [#allocation23], %s9396_s23 }
 0x295   : > { %6689 = vmatprep.subr.bf16.mxu0 %v7744_v11  ;;  %v6149_v33 = vld [vmem:[%s9399_s16] ss:$0 sm:$0xff]  ;;  %s7755_s25 = smov 16   ;;  %s9404_s20 = sld [smem:[#allocation106_spill]] }
 0x296   : > { %v6150_v35 = vld [vmem:[%s9401_s1] ss:$0 sm:$0xff]  ;;  %s7756_s17 = smov 24   ;;  %s9405_s13 = sld [smem:[#allocation104_spill]] }
 0x297   : > { %6700 = vmatpush3.bf16.msra.mxu1 %v6699_v20  ;;  %s9408_s1 = sld [smem:[#allocation47_spill]] }
 0x298   : > { %6701 = vmatprep.subr.bf16.mxu1 %v7744_v11  ;;  %6691 = vmatpush3.bf16.msra.mxu0 %v6690_v26 }
 0x299   : > { %6415 = vmatprep.subr.mxu0 %v7746_v19 }
 0x29b   : > { %6703 = vmatpush3.bf16.msra.mxu1 %v6702_v27 }
 0x29c   : > { %6440 = vmatprep.subr.mxu1 %v7746_v19 }
 0x29e   : > { %6413 = vmatmul.mubr.msk.f32.vlgmr.msra.gmra.mrb[0].mxu1 %vm2158_vm3, %v2058_v28 }
 0x29f   : > { %6442 = vmatprep.mubr.msk.f32.mxu1 %vm7745_vm2, %v7746_v19 }
 0x31a   : > { %v2032_v3 = vpop.xlane.xlu0 %2031 }
 0x31b   : > { %v2034_v4 = vmul.f32 0.03125, %v2032_v3 }
 0x31d   : > { %v2035_v5 = vsub.f32 %v2026_v1, %v2034_v4 }
 0x31f   : > { %v2036_v6 = vmul.f32 %v2035_v5, %v2035_v5 }
 0x321   : > { %v2037_v7 = vsel %vm2029_vm1, %v2036_v6, 0.0 }
 0x322   : > { %2038 = vadd.xlane.f32.xlu0 %v2037_v7 }
 0x371   : > { %v2228_v39 = vpop.f32.mrb[0].mxu1 }
 0x372   : > { %v8734_v40 = vadd.f32 %v6153_v38, %v2228_v39  ;;  %v6414_v41 = vpop.f32.mrb[1].mxu1 }
 0x374   : > { %2322 = vrot.lane.b32.xlu0 %v8734_v40, %s7747_s18 }
 0x3af   : > { %v2039_v29 = vpop.xlane.xlu0 %2038 }
 0x3b0   : > { %v2040_v30 = vmul.f32 0.03125, %v2039_v29 }
 0x3b2   : > { %v2041_v31 = vadd.f32 1e-05, %v2040_v30 }
 0x3b4   : > { %6983 = vrsqrt.f32 %v2041_v31 }
 0x3be   : > { %v6984_v32 = vpop.eup %6983 }
 0x3bf   : > { %v2043_v34 = vmul.f32 %v6984_v32, %v2035_v5 }
 0x3c1   : > { %v2050_v36 = vmul.f32 %v6149_v33, %v2043_v34 }
 0x3c3   : > { %v8725_v37 = vadd.f32 %v6150_v35, %v2050_v36 }
 0x3c5   : > { %6394 = vmatmul.mubr.msk.f32.vlgmr.msra.gmra.mrb[0].mxu0 %vm2029_vm1, %v8725_v37 }
 0x3c6   : > { %6417 = vmatprep.mubr.msk.f32.mxu0 %vm7745_vm2, %v7746_v19  ;;  %6416 = vmatpush3.xpose.msk.msra.mxu0 %vm2232_vm4, %v8734_v40 }
 0x3c7   : > { %6420 = vmatprep.subr.mxu0 %v7746_v19 }
 0x3e6   : > { %v2323_v46 = vpop.permute.xlu0 %2322 }
 0x498   : > { %v2139_v43 = vpop.f32.mrb[0].mxu0 }
 0x499   : > { %v2140_v44 = vadd.f32 %v6151_v42, %v2139_v43  ;;  %v6395_v45 = vpop.f32.mrb[1].mxu0 }
 0x49b   : > { %6418 = vmatmul.mubr.msk.f32.vlgmr.msra.gmra.mrb[2].mxu0 %vm2232_vm4, %v2140_v44 }
 0x49c   : > { %6421 = vmatpush3.msk.msra.mxu0 %vm2327_vm5, %v2323_v46  ;;  %6422 = vmatprep.mubr.msk.f32.mxu0 %vm7745_vm2, %v7746_v19 }
 0x49d   : > { %6425 = vmatprep.subr.mxu0 %v7746_v19 }
 0x56e   : > { %v2305_v47 = vpop.f32.mrb[2].mxu0 }
 0x56f   : > { %v2309_v48 = vmul.f32 0.35355338, %v2305_v47  ;;  %v6419_v49 = vpop.f32.mrb[3].mxu0  ;;  %v2918_v47 = vld [vmem:[%s9402_s12] sm:$0xff] }
 0x571   : > { %v2311_v50 = vsel %vm2310_vm6, %v2309_v48, -inf }
 0x572   : > { %2312 = vmax.xlane.f32.xlu1 %v2311_v50  ;;  %v2920_v50 = vld [vmem:[%s9402_s12 + $0x10] sm:$0xff] }
 0x583   : > { %2402 = vrot.lane.b32.xlu1 %v8734_v40, %s7748_s0 }
 0x5ff   : > { %v2313_v51 = vpop.xlane.xlu1 %2312 }
 0x600   : > { %v2314_v52 = vsub.f32 %v2309_v48, %v2313_v51  ;;  %v2919_v48 = vld [vmem:[%s9402_s12 + $0x8] sm:$0xff]  ;;  %v2921_v51 = vld [vmem:[%s9402_s12 + $0x18] sm:$0xff] }
 0x601   : > { %v6705_v49 = vpack.c.bf16 %v2919_v48, %v2918_v47 }
 0x602   : > { %v2315_v53 = vmul.f32 1.442695, %v2314_v52  ;;  %v6708_v52 = vpack.c.bf16 %v2921_v51, %v2920_v50 }
 0x603   : > { %v2403_v56 = vpop.permute.xlu1 %2402 }
 0x604   : > { %6985 = vpow2.f32 %v2315_v53 }
 0x60e   : > { %v6986_v54 = vpop.eup %6985 }
 0x60f   : > { %v2317_v55 = vsel %vm2310_vm6, %v6986_v54, 0.0 }
 0x610   : > { %2318 = vadd.xlane.f32.xlu1 %v2317_v55  ;;  %v3002_v55 = vld [vmem:[%s9403_s4] sm:$0xff] }
 0x621   : > { %2400 = vrot.lane.b32.xlu1 %v2140_v44, %s7748_s0 }
 0x69d   : > { %v2319_v57 = vpop.xlane.xlu1 %2318 }
 0x69e   : > { %6987 = vrcp.f32 %v2319_v57  ;;  %v3004_v57 = vld [vmem:[%s9403_s4 + $0x10] sm:$0xff] }
 0x6a1   : > { %v2401_v60 = vpop.permute.xlu1 %2400 }
 0x6a8   : > { %v6988_v58 = vpop.eup %6987 }
 0x6a9   : > { %v2321_v59 = vmul.f32 %v6988_v58, %v6986_v54 }
 0x6ab   : > { %6423 = vmatmul.mubr.msk.f32.vlgmr.msra.gmra.mrb[4].mxu0 %vm2310_vm6, %v2321_v59  ;;  %v3005_v59 = vld [vmem:[%s9403_s4 + $0x18] sm:$0xff] }
 0x6ac   : > { %6426 = vmatpush3.xpose.msk.msra.mxu0 %vm2232_vm4, %v2403_v56  ;;  %6427 = vmatprep.mubr.msk.f32.mxu0 %vm7745_vm2, %v7746_v19  ;;  %v3003_v56 = vld [vmem:[%s9403_s4 + $0x8] sm:$0xff] }
 0x6ad   : > { %6430 = vmatprep.subr.mxu0 %v7746_v19  ;;  %v6711_v58 = vpack.c.bf16 %v3003_v56, %v3002_v55 }
 0x6af   : > { %6428 = vmatmul.mubr.msk.f32.vlgmr.msra.gmra.mrb[6].mxu0 %vm2232_vm4, %v2401_v60 }
 0x6b0   : > { %6432 = vmatprep.mubr.msk.f32.mxu0 %vm7745_vm2, %v7746_v19 }
 0x77e   : > { %v8762_v61 = vpop.f32.mrb[4].mxu0 }
 0x77f   : > { %v6424_v62 = vpop.f32.mrb[5].mxu0 }
 0x780   : > { %v6714_v62 = vpack.c.bf16 %v3005_v59, %v3004_v57 }
 0x782   : > { %v2474_v63 = vpop.f32.mrb[6].mxu0 }
 0x783   : > { %v2478_v0 = vmul.f32 0.35355338, %v2474_v63  ;;  %v6429_v1 = vpop.f32.mrb[7].mxu0 }
 0x784   : > { %v3087_v1 = vld [vmem:[%s9404_s20] sm:$0xff] }
 0x785   : > { %v2479_v2 = vsel %vm2310_vm6, %v2478_v0, -inf }
 0x786   : > { %2480 = vmax.xlane.f32.xlu1 %v2479_v2  ;;  %v3088_v2 = vld [vmem:[%s9404_s20 + $0x8] sm:$0xff] }
 0x797   : > { %2569 = vrot.lane.b32.xlu1 %v8734_v40, %s7749_s11 }
 0x79b   : > { %2567 = vrot.lane.b32.xlu1 %v2140_v44, %s7749_s11 }
 0x79f   : > { %2734 = vrot.lane.b32.xlu1 %v2140_v44, %s7750_s14 }
 0x813   : > { %v2481_v3 = vpop.xlane.xlu1 %2480 }
 0x814   : > { %v2482_v4 = vsub.f32 %v2478_v0, %v2481_v3 }
 0x816   : > { %v2483_v5 = vmul.f32 1.442695, %v2482_v4 }
 0x817   : > { %v2570_v10 = vpop.permute.xlu1 %2569 }
 0x818   : > { %6989 = vpow2.f32 %v2483_v5  ;;  %v6717_v5 = vpack.c.bf16 %v3088_v2, %v3087_v1 }
 0x81b   : > { %v2568_v14 = vpop.permute.xlu1 %2567 }
 0x81f   : > { %v2735_v16 = vpop.permute.xlu1 %2734 }
 0x822   : > { %v6990_v6 = vpop.eup %6989 }
 0x823   : > { %v2485_v7 = vsel %vm2310_vm6, %v6990_v6, 0.0 }
 0x824   : > { %2486 = vadd.xlane.f32.xlu0 %v2485_v7 }
 0x83a   : > { %2490 = vrot.lane.b32.xlu0 %v8734_v40, %s7751_s3 }
 0x83e   : > { %2736 = vrot.lane.b32.xlu0 %v8734_v40, %s7750_s14 }
 0x8b1   : > { %v2487_v8 = vpop.xlane.xlu0 %2486 }
 0x8b2   : > { %6991 = vrcp.f32 %v2487_v8  ;;  %v3089_v8 = vld [vmem:[%s9404_s20 + $0x10] sm:$0xff] }
 0x8b5   : > { %v2491_v9 = vpop.permute.xlu0 %2490 }
 0x8b6   : > { %6431 = vmatpush3.msk.msra.mxu0 %vm2327_vm5, %v2491_v9  ;;  %v3090_v9 = vld [vmem:[%s9404_s20 + $0x18] sm:$0xff] }
 0x8b7   : > { %6435 = vmatprep.subr.mxu0 %v7746_v19 }
 0x8b9   : > { %v2737_v15 = vpop.permute.xlu0 %2736 }
 0x8bc   : > { %v6992_v12 = vpop.eup %6991 }
 0x8bd   : > { %v2489_v13 = vmul.f32 %v6992_v12, %v6990_v6  ;;  %v6720_v12 = vpack.c.bf16 %v3090_v9, %v3089_v8 }
 0x8bf   : > { %6433 = vmatmul.mubr.msk.f32.vlgmr.msra.gmra.mrb[8].mxu0 %vm2310_vm6, %v2489_v13  ;;  %v3169_v13 = vld [vmem:[%s9405_s13 + $0x8] sm:$0xff] }
 0x8c0   : > { %6436 = vmatpush3.xpose.msk.msra.mxu0 %vm2232_vm4, %v2570_v10  ;;  %6437 = vmatprep.mubr.msk.f32.mxu0 %vm7745_vm2, %v7746_v19 }
 0x8c1   : > { %6445 = vmatprep.subr.mxu0 %v7746_v19 }
 0x8c3   : > { %6438 = vmatmul.mubr.msk.f32.vlgmr.msra.gmra.mrb[10].mxu0 %vm2232_vm4, %v2568_v14  ;;  %v6171_v14 = vld [vmem:[%s1993_s28] ss:$0 sm:$0xff]  ;;  %s9410_s28 = scalar_lea.vmem %s9408_s1, %s9395_s27  ;;  %s9413_s27 = sld [smem:[#allocation101_spill]] }
 0x8c4   : > { %6446 = vmatpush3.xpose.msk.msra.mxu0 %vm2232_vm4, %v2737_v15  ;;  %6447 = vmatprep.mubr.msk.f32.mxu0 %vm7745_vm2, %v7746_v19 }
 0x8c5   : > { %6704 = vmatprep.subr.bf16.mxu0 %v7744_v11 }
 0x8c7   : > { %6448 = vmatmul.mubr.msk.f32.vlgmr.msra.gmra.mrb[12].mxu0 %vm2232_vm4, %v2735_v16 }
 0x8c8   : > { %6463 = vmatprep.mubr.msk.f32.mxu0 %vm7745_vm2, %v7746_v19  ;;  %6706 = vmatpush3.bf16.msra.mxu0 %v6705_v49 }
 0x8c9   : > { %6707 = vmatprep.subr.bf16.mxu0 %v7744_v11 }
 0x8cc   : > { %6709 = vmatpush3.bf16.msra.mxu0 %v6708_v52 }
 0x8cd   : > { %6716 = vmatprep.subr.bf16.mxu0 %v7744_v11 }
 0x992   : > { %v2563_v17 = vpop.f32.mrb[8].mxu0 }
 0x993   : > { %v6434_v18 = vpop.f32.mrb[9].mxu0 }
 0x996   : > { %v2641_v20 = vpop.f32.mrb[10].mxu0 }
 0x997   : > { %v2645_v21 = vmul.f32 0.35355338, %v2641_v20  ;;  %v6439_v22 = vpop.f32.mrb[11].mxu0  ;;  %v3170_v20 = vld [vmem:[%s9405_s13 + $0x10] sm:$0xff] }
 0x999   : > { %v2646_v23 = vsel %vm2310_vm6, %v2645_v21, -inf }
 0x99a   : > { %2647 = vmax.xlane.f32.xlu0 %v2646_v23  ;;  %v2808_v24 = vpop.f32.mrb[12].mxu0  ;;  %v6175_v23 = vld [vmem:[%s2010_s6] ss:$0 sm:$0xff]  ;;  %s9412_s6 = sld [smem:[#allocation110_spill]] }
 0x99b   : > { %v2812_v25 = vmul.f32 0.35355338, %v2808_v24  ;;  %v6449_v26 = vpop.f32.mrb[13].mxu0 }
 0x99d   : > { %v2813_v27 = vsel %vm2310_vm6, %v2812_v25, -inf }
 0x99e   : > { %2814 = vmax.xlane.f32.xlu1 %v2813_v27 }
 0x9af   : > { %2824 = vrot.lane.b32.xlu1 %v8734_v40, %s7752_s19 }
 0x9b3   : > { %2902 = vrot.lane.b32.xlu1 %v2563_v17, %s7753_s29 }
 0xa27   : > { %v2648_v28 = vpop.xlane.xlu0 %2647 }
 0xa28   : > { %v2649_v29 = vsub.f32 %v2645_v21, %v2648_v28  ;;  %v3171_v21 = vld [vmem:[%s9405_s13 + $0x18] sm:$0xff] }
 0xa29   : > { %v6726_v22 = vpack.c.bf16 %v3171_v21, %v3170_v20 }
 0xa2a   : > { %v2650_v30 = vmul.f32 1.442695, %v2649_v29 }
 0xa2b   : > { %v2815_v31 = vpop.xlane.xlu1 %2814 }
 0xa2c   : > { %6993 = vpow2.f32 %v2650_v30  ;;  %v2816_v32 = vsub.f32 %v2812_v25, %v2815_v31  ;;  %v3086_v25 = vld [vmem:[%s9410_s28] sm:$0x7f] }
 0xa2d   : > { %v6177_v30 = vld [vmem:[%s2004_s9] ss:$0 sm:$0xff]  ;;  %s9411_s9 = sld [smem:[#allocation105_spill]] }
 0xa2e   : > { %v2817_v33 = vmul.f32 1.442695, %v2816_v32 }
 0xa2f   : > { %v2825_v45 = vpop.permute.xlu1 %2824 }
 0xa30   : > { %6995 = vpow2.f32 %v2817_v33 }
 0xa33   : > { %v2903_v0 = vpop.permute.xlu1 %2902 }
 0xa34   : > { %v2913_v4 = vsel %vm2232_vm4, %v8762_v61, %v2903_v0  ;;  %v3168_v61 = vld [vmem:[%s9405_s13] sm:$0xff]  ;;  %s9416_s13 = sld [smem:[#allocation112_spill]] }
 0xa35   : > { %v6723_v16 = vpack.c.bf16 %v3169_v13, %v3168_v61 }
 0xa36   : > { %v6994_v34 = vpop.eup %6993 }
 0xa37   : > { %v2652_v35 = vsel %vm2310_vm6, %v6994_v34, 0.0 }
 0xa38   : > { %2653 = vadd.xlane.f32.xlu0 %v2652_v35 }
 0xa3a   : > { %v6996_v36 = vpop.eup %6995 }
 0xa3b   : > { %v2819_v38 = vsel %vm2310_vm6, %v6996_v36, 0.0 }
 0xa3c   : > { %2820 = vadd.xlane.f32.xlu0 %v2819_v38 }
 0xa52   : > { %2657 = vrot.lane.b32.xlu0 %v8734_v40, %s7754_s24 }
 0xac5   : > { %v2654_v39 = vpop.xlane.xlu0 %2653 }
 0xac6   : > { %6997 = vrcp.f32 %v2654_v39 }
 0xac9   : > { %v2821_v41 = vpop.xlane.xlu0 %2820 }
 0xaca   : > { %6999 = vrcp.f32 %v2821_v41 }
 0xacd   : > { %v2658_v42 = vpop.permute.xlu0 %2657 }
 0xace   : > { %6441 = vmatpush3.msk.msra.mxu1 %vm2327_vm5, %v2658_v42 }
 0xacf   : > { %6450 = vmatprep.subr.mxu1 %v7746_v19 }
 0xad0   : > { %v6998_v43 = vpop.eup %6997 }
 0xad1   : > { %v2656_v44 = vmul.f32 %v6998_v43, %v6994_v34 }
 0xad3   : > { %6443 = vmatmul.mubr.msk.f32.vlgmr.msra.gmra.mrb[2].mxu1 %vm2310_vm6, %v2656_v44 }
 0xad4   : > { %v7000_v46 = vpop.eup %6999  ;;  %6451 = vmatpush3.msk.msra.mxu1 %vm2327_vm5, %v2825_v45  ;;  %6452 = vmatprep.mubr.msk.f32.mxu1 %vm7745_vm2, %v7746_v19 }
 0xad5   : > { %v2823_v40 = vmul.f32 %v7000_v46, %v6996_v36  ;;  %6710 = vmatprep.subr.bf16.mxu1 %v7744_v11 }
 0xad7   : > { %6453 = vmatmul.mubr.msk.f32.vlgmr.msra.gmra.mrb[4].mxu1 %vm2310_vm6, %v2823_v40 }
 0xad8   : > { %6474 = vmatprep.mubr.msk.f32.mxu1 %vm7745_vm2, %v7746_v19  ;;  %6712 = vmatpush3.bf16.msra.mxu1 %v6711_v58 }
 0xad9   : > { %6713 = vmatprep.subr.bf16.mxu1 %v7744_v11 }
 0xadc   : > { %6715 = vmatpush3.bf16.msra.mxu1 %v6714_v62 }
 0xadd   : > { %6722 = vmatprep.subr.bf16.mxu1 %v7744_v11 }
 0xba6   : > { %v2730_v53 = vpop.f32.mrb[2].mxu1 }
 0xba7   : > { %2906 = vrot.lane.b32.xlu1 %v2730_v53, %s7755_s25  ;;  %v6444_v54 = vpop.f32.mrb[3].mxu1 }
 0xbaa   : > { %v2897_v60 = vpop.f32.mrb[4].mxu1 }
 0xbab   : > { %2910 = vrot.lane.b32.xlu0 %v2897_v60, %s7756_s17  ;;  %v6454_v63 = vpop.f32.mrb[5].mxu1 }
 0xc19   : > { %v2907_v3 = vpop.permute.xlu1 %2906 }
 0xc1a   : > { %v2915_v6 = vsel %vm2914_vm7, %v2913_v4, %v2907_v3 }
 0xc1d   : > { %v2911_v7 = vpop.permute.xlu0 %2910 }
 0xc1e   : > { %v2917_v10 = vsel %vm2916_vm8, %v2915_v6, %v2911_v7 }
 0xc1f   : > { %6464 = vmatmul.mubr.msk.f32.vlgmr.msra.gmra.mrb[14].mxu0 %vm2029_vm1, %v2917_v10 }
 0xc20   : > { %6718 = vmatpush3.bf16.msra.mxu0 %v6717_v5  ;;  %6485 = vmatprep.mubr.msk.f32.mxu0 %vm7745_vm2, %v7746_v19 }
 0xc21   : > { %6719 = vmatprep.subr.bf16.mxu0 %v7744_v11 }
 0xc24   : > { %6721 = vmatpush3.bf16.msra.mxu0 %v6720_v12 }
 0xc25   : > { %6499 = vmatprep.subr.mxu0 %v7746_v19 }
 0xc27   : > { %6486 = vmatmul.mubr.msk.f32.vlgmr.msra.gmra.mrb[16].mxu0 %vm2029_vm1, %v8725_v37 }
 0xc28   : > { %6501 = vmatprep.mubr.msk.f32.mxu0 %vm7745_vm2, %v7746_v19 }
 0xcf2   : > { %v2998_v15 = vpop.f32.mrb[14].mxu0 }
 0xcf3   : > { %v2999_v17 = vadd.f32 %v6171_v14, %v2998_v15  ;;  %v6465_v18 = vpop.f32.mrb[15].mxu0 }
 0xcf5   : > { %6475 = vmatmul.mubr.msk.f32.vlgmr.msra.gmra.mrb[6].mxu1 %vm2029_vm1, %v2999_v17 }
 0xcf6   : > { %6724 = vmatpush3.bf16.msra.mxu1 %v6723_v16  ;;  %6496 = vmatprep.mubr.msk.f32.mxu1 %vm7745_vm2, %v7746_v19 }
 0xcf7   : > { %6725 = vmatprep.subr.bf16.mxu1 %v7744_v11 }
 0xcfa   : > { %v3164_v24 = vpop.f32.mrb[16].mxu0  ;;  %6727 = vmatpush3.bf16.msra.mxu1 %v6726_v22 }
 0xcfb   : > { %v3165_v26 = vadd.f32 %v6175_v23, %v3164_v24  ;;  %v6487_v27 = vpop.f32.mrb[17].mxu0  ;;  %6504 = vmatprep.subr.mxu1 %v7746_v19 }
 0xcfd   : > { %6497 = vmatmul.mubr.msk.f32.vlgmr.msra.gmra.mrb[8].mxu1 %vm2029_vm1, %v3086_v25  ;;  %3419 = vrot.lane.b32.xlu0 %v3165_v26, %s7748_s0 }
 0xcfe   : > { %6506 = vmatprep.mubr.msk.f32.mxu1 %vm7745_vm2, %v7746_v19 }
 0xd01   : > { %3586 = vrot.lane.b32.xlu0 %v3165_v26, %s7749_s11 }
 0xd05   : > { %3753 = vrot.lane.b32.xlu0 %v3165_v26, %s7750_s14 }
 0xd6f   : > { %v3420_v34 = vpop.permute.xlu0 %3419 }
 0xd73   : > { %v3587_v38 = vpop.permute.xlu0 %3586 }
 0xd77   : > { %v3754_v41 = vpop.permute.xlu0 %3753 }
 0xdc8   : > { %v8863_v28 = vpop.f32.mrb[6].mxu1 }
 0xdc9   : > { %v6476_v29 = vpop.f32.mrb[7].mxu1 }
 0xdd0   : > { %v3248_v31 = vpop.f32.mrb[8].mxu1 }
 0xdd1   : > { %v8868_v32 = vadd.f32 %v6177_v30, %v3248_v31  ;;  %v6498_v33 = vpop.f32.mrb[9].mxu1 }
 0xdd3   : > { %3421 = vrot.lane.b32.xlu1 %v8868_v32, %s7748_s0  ;;  %6500 = vmatpush3.xpose.msk.msra.mxu0 %vm2232_vm4, %v8868_v32 }
 0xdd4   : > { %6509 = vmatprep.subr.mxu0 %v7746_v19 }
 0xdd6   : > { %6502 = vmatmul.mubr.msk.f32.vlgmr.msra.gmra.mrb[18].mxu0 %vm2232_vm4, %v3165_v26 }
 0xdd7   : > { %3588 = vrot.lane.b32.xlu1 %v8868_v32, %s7749_s11  ;;  %6511 = vmatprep.mubr.msk.f32.mxu0 %vm7745_vm2, %v7746_v19 }
 0xddb   : > { %3755 = vrot.lane.b32.xlu1 %v8868_v32, %s7750_s14 }
 0xe45   : > { %v3422_v35 = vpop.permute.xlu1 %3421 }
 0xe46   : > { %6510 = vmatpush3.xpose.msk.msra.mxu0 %vm2232_vm4, %v3422_v35  ;;  %v3936_v35 = vld [vmem:[%s9411_s9 + $0x8] sm:$0xff] }
 0xe47   : > { %6519 = vmatprep.subr.mxu0 %v7746_v19 }
 0xe49   : > { %v3589_v36 = vpop.permute.xlu1 %3588  ;;  %6512 = vmatmul.mubr.msk.f32.vlgmr.msra.gmra.mrb[20].mxu0 %vm2232_vm4, %v3420_v34  ;;  %v3935_v34 = vld [vmem:[%s9411_s9] sm:$0xff] }
 0xe4a   : > { %6520 = vmatpush3.xpose.msk.msra.mxu0 %vm2232_vm4, %v3589_v36  ;;  %6521 = vmatprep.mubr.msk.f32.mxu0 %vm7745_vm2, %v7746_v19  ;;  %v6729_v36 = vpack.c.bf16 %v3936_v35, %v3935_v34 }
 0xe4b   : > { %6529 = vmatprep.subr.mxu0 %v7746_v19 }
 0xe4d   : > { %v3756_v39 = vpop.permute.xlu1 %3755  ;;  %6522 = vmatmul.mubr.msk.f32.vlgmr.msra.gmra.mrb[22].mxu0 %vm2232_vm4, %v3587_v38  ;;  %v3937_v38 = vld [vmem:[%s9411_s9 + $0x10] sm:$0xff] }
 0xe4e   : > { %6530 = vmatpush3.xpose.msk.msra.mxu0 %vm2232_vm4, %v3756_v39  ;;  %6531 = vmatprep.mubr.msk.f32.mxu0 %vm7745_vm2, %v7746_v19  ;;  %v3938_v39 = vld [vmem:[%s9411_s9 + $0x18] sm:$0xff] }
 0xe4f   : > { %6728 = vmatprep.subr.bf16.mxu0 %v7744_v11 }
 0xe51   : > { %6532 = vmatmul.mubr.msk.f32.vlgmr.msra.gmra.mrb[24].mxu0 %vm2232_vm4, %v3754_v41  ;;  %v6732_v41 = vpack.c.bf16 %v3938_v39, %v3937_v38 }
 0xe52   : > { %6547 = vmatprep.mubr.msk.f32.mxu0 %vm7745_vm2, %v7746_v19  ;;  %6730 = vmatpush3.bf16.msra.mxu0 %v6729_v36 }
 0xe53   : > { %6731 = vmatprep.subr.bf16.mxu0 %v7744_v11 }
 0xe56   : > { %6733 = vmatpush3.bf16.msra.mxu0 %v6732_v41 }
 0xe57   : > { %6740 = vmatprep.subr.bf16.mxu0 %v7744_v11 }
 0xea9   : > { %v3324_v42 = vpop.f32.mrb[18].mxu0 }
 0xeaa   : > { %v3328_v43 = vmul.f32 0.35355338, %v3324_v42  ;;  %v6503_v44 = vpop.f32.mrb[19].mxu0 }
 0xeac   : > { %v3330_v45 = vsel %vm3329_vm9, %v3328_v43, -inf }
 0xead   : > { %3331 = vmax.xlane.f32.xlu1 %v3330_v45 }
 0xebe   : > { %3341 = vrot.lane.b32.xlu1 %v8868_v32, %s7747_s18 }
 0xf1c   : > { %v3493_v46 = vpop.f32.mrb[20].mxu0 }
 0xf1d   : > { %v3497_v40 = vmul.f32 0.35355338, %v3493_v46  ;;  %v6513_v47 = vpop.f32.mrb[21].mxu0  ;;  %v4019_v46 = vld [vmem:[%s9412_s6] sm:$0xff] }
 0xf1e   : > { %v4021_v47 = vld [vmem:[%s9412_s6 + $0x10] sm:$0xff] }
 0xf1f   : > { %v3498_v48 = vsel %vm3329_vm9, %v3497_v40, -inf }
 0xf20   : > { %3499 = vmax.xlane.f32.xlu0 %v3498_v48  ;;  %v3660_v49 = vpop.f32.mrb[22].mxu0 }
 0xf21   : > { %v3664_v50 = vmul.f32 0.35355338, %v3660_v49  ;;  %v6523_v51 = vpop.f32.mrb[23].mxu0  ;;  %v4022_v49 = vld [vmem:[%s9412_s6 + $0x18] sm:$0xff] }
 0xf22   : > { %v6738_v51 = vpack.c.bf16 %v4022_v49, %v4021_v47 }
 0xf23   : > { %v3665_v52 = vsel %vm3329_vm9, %v3664_v50, -inf }
 0xf24   : > { %3666 = vmax.xlane.f32.xlu0 %v3665_v52  ;;  %v3827_v53 = vpop.f32.mrb[24].mxu0 }
 0xf25   : > { %v3831_v54 = vmul.f32 0.35355338, %v3827_v53  ;;  %v6533_v55 = vpop.f32.mrb[25].mxu0 }
 0xf26   : > { %v4099_v55 = vld [vmem:[%s9413_s27 + $0x8] sm:$0xff] }
 0xf27   : > { %v3832_v56 = vsel %vm3329_vm9, %v3831_v54, -inf }
 0xf28   : > { %3833 = vmax.xlane.f32.xlu0 %v3832_v56 }
 0xf3a   : > { %v3332_v57 = vpop.xlane.xlu1 %3331 }
 0xf3b   : > { %v3333_v58 = vsub.f32 %v3328_v43, %v3332_v57 }
 0xf3d   : > { %v3334_v59 = vmul.f32 1.442695, %v3333_v58 }
 0xf3e   : > { %v3342_v60 = vpop.permute.xlu1 %3341 }
 0xf3f   : > { %7001 = vpow2.f32 %v3334_v59  ;;  %6505 = vmatpush3.msk.msra.mxu1 %vm3346_vm10, %v3342_v60 }
 0xf40   : > { %6514 = vmatprep.subr.mxu1 %v7746_v19 }
 0xf49   : > { %v7002_v62 = vpop.eup %7001 }
 0xf4a   : > { %v3336_v63 = vsel %vm3329_vm9, %v7002_v62, 0.0 }
 0xf4b   : > { %3337 = vadd.xlane.f32.xlu1 %v3336_v63  ;;  %v4101_v63 = vld [vmem:[%s9413_s27 + $0x18] sm:$0xff] }
 0xfad   : > { %v3500_v0 = vpop.xlane.xlu0 %3499 }
 0xfae   : > { %v3501_v1 = vsub.f32 %v3497_v40, %v3500_v0  ;;  %v4020_v40 = vld [vmem:[%s9412_s6 + $0x8] sm:$0xff] }
 0xfaf   : > { %v6735_v48 = vpack.c.bf16 %v4020_v40, %v4019_v46 }
 0xfb0   : > { %v3502_v2 = vmul.f32 1.442695, %v3501_v1 }
 0xfb1   : > { %v3667_v3 = vpop.xlane.xlu0 %3666 }
 0xfb2   : > { %7003 = vpow2.f32 %v3502_v2  ;;  %v3668_v4 = vsub.f32 %v3664_v50, %v3667_v3  ;;  %v4179_v2 = vld [vmem:[%s8664_s10] sm:$0xff]  ;;  %v4180_v3 = vld [vmem:[%s8664_s10 + $0x8] sm:$0xff] }
 0xfb4   : > { %v3669_v5 = vmul.f32 1.442695, %v3668_v4  ;;  %v6195_v4 = vld [vmem:[%s2007_s26] ss:$0 sm:$0xff]  ;;  %s9418_s26 = sld [smem:[#allocation50_spill]] }
 0xfb5   : > { %v3834_v6 = vpop.xlane.xlu0 %3833 }
 0xfb6   : > { %7005 = vpow2.f32 %v3669_v5  ;;  %v3835_v7 = vsub.f32 %v3831_v54, %v3834_v6  ;;  %v4098_v54 = vld [vmem:[%s9413_s27] sm:$0xff]  ;;  %v6747_v6 = vpack.c.bf16 %v4180_v3, %v4179_v2 }
 0xfb7   : > { %v6741_v58 = vpack.c.bf16 %v4099_v55, %v4098_v54 }
 0xfb8   : > { %v3836_v8 = vmul.f32 1.442695, %v3835_v7 }
 0xfba   : > { %7007 = vpow2.f32 %v3836_v8 }
 0xfbc   : > { %v7004_v9 = vpop.eup %7003 }
 0xfbd   : > { %v3504_v10 = vsel %vm3329_vm9, %v7004_v9, 0.0 }
 0xfbe   : > { %3505 = vadd.xlane.f32.xlu0 %v3504_v10  ;;  %v4182_v10 = vld [vmem:[%s8664_s10 + $0x18] sm:$0xff] }
 0xfc0   : > { %v7006_v12 = vpop.eup %7005 }
 0xfc1   : > { %v3671_v61 = vsel %vm3329_vm9, %v7006_v12, 0.0 }
 0xfc2   : > { %3672 = vadd.xlane.f32.xlu1 %v3671_v61 }
 0xfc4   : > { %v7008_v13 = vpop.eup %7007 }
 0xfc5   : > { %v3838_v14 = vsel %vm3329_vm9, %v7008_v13, 0.0 }
 0xfc6   : > { %3839 = vadd.xlane.f32.xlu0 %v3838_v14 }
 0xfd3   : > { %3676 = vrot.lane.b32.xlu1 %v8868_v32, %s7754_s24 }
 0xfd7   : > { %3843 = vrot.lane.b32.xlu1 %v8868_v32, %s7752_s19 }
 0xfd8   : > { %v3338_v15 = vpop.xlane.xlu1 %3337 }
 0xfd9   : > { %7009 = vrcp.f32 %v3338_v15 }
 0xfdc   : > { %3509 = vrot.lane.b32.xlu0 %v8868_v32, %s7751_s3 }
 0xfe3   : > { %v7010_v16 = vpop.eup %7009 }
 0xfe4   : > { %v3340_v17 = vmul.f32 %v7010_v16, %v7002_v62  ;;  %v4100_v62 = vld [vmem:[%s9413_s27 + $0x10] sm:$0xff]  ;;  %v6173_v16 = vld [vmem:[%s2018_s21] ss:$0 sm:$0xff]  ;;  %s9420_s21 = sld [smem:[#allocation100_spill]] }
 0xfe5   : > { %v6744_v1 = vpack.c.bf16 %v4101_v63, %v4100_v62 }
 0xfe6   : > { %6507 = vmatmul.mubr.msk.f32.vlgmr.msra.gmra.mrb[10].mxu1 %vm3329_vm9, %v3340_v17  ;;  %v3083_v17 = vadd.f32 %v6173_v16, %v8863_v28 }
 0xfe7   : > { %6516 = vmatprep.mubr.msk.f32.mxu1 %vm7745_vm2, %v7746_v19 }
0x104b   : > { %v3506_v18 = vpop.xlane.xlu0 %3505 }
0x104c   : > { %7011 = vrcp.f32 %v3506_v18 }
0x104f   : > { %v3673_v20 = vpop.xlane.xlu1 %3672 }
0x1050   : > { %7013 = vrcp.f32 %v3673_v20 }
0x1053   : > { %v3840_v21 = vpop.xlane.xlu0 %3839  ;;  %v3677_v24 = vpop.permute.xlu1 %3676 }
0x1054   : > { %7015 = vrcp.f32 %v3840_v21 }
0x1056   : > { %v7012_v22 = vpop.eup %7011 }
0x1057   : > { %v3508_v23 = vmul.f32 %v7012_v22, %v7004_v9  ;;  %v3510_v25 = vpop.permute.xlu0 %3509  ;;  %v3844_v29 = vpop.permute.xlu1 %3843  ;;  %v4181_v9 = vld [vmem:[%s8664_s10 + $0x10] sm:$0xff]  ;;  %s9421_s10 = sld [smem:[#allocation108_spill]] }
0x1058   : > { %6515 = vmatpush3.msk.msra.mxu1 %vm3346_vm10, %v3510_v25 }
0x1059   : > { %6517 = vmatmul.mubr.msk.f32.vlgmr.msra.gmra.mrb[12].mxu1 %vm3329_vm9, %v3508_v23  ;;  %6524 = vmatprep.subr.mxu1 %v7746_v19 }
0x105a   : > { %v7014_v26 = vpop.eup %7013  ;;  %6525 = vmatpush3.msk.msra.mxu1 %vm3346_vm10, %v3677_v24  ;;  %6526 = vmatprep.mubr.msk.f32.mxu1 %vm7745_vm2, %v7746_v19 }
0x105b   : > { %v3675_v27 = vmul.f32 %v7014_v26, %v7006_v12  ;;  %6534 = vmatprep.subr.mxu1 %v7746_v19  ;;  %v6198_v12 = vld [vmem:[%s1982_s22] ss:$0 sm:$0xff]  ;;  %s9419_s22 = scalar_lea.vmem %s9418_s26, %s8643_s30  ;;  %s9424_s30 = scalar_lea.vmem [#allocation27], %s9396_s23 }
0x105c   : > { %v6200_v22 = vld [vmem:[%s9419_s22] ss:$0 sm:$0xff] }
0x105d   : > { %6527 = vmatmul.mubr.msk.f32.vlgmr.msra.gmra.mrb[14].mxu1 %vm3329_vm9, %v3675_v27 }
0x105e   : > { %v7016_v30 = vpop.eup %7015  ;;  %6535 = vmatpush3.msk.msra.mxu1 %vm3346_vm10, %v3844_v29  ;;  %6536 = vmatprep.mubr.msk.f32.mxu1 %vm7745_vm2, %v7746_v19 }
0x105f   : > { %v3842_v31 = vmul.f32 %v7016_v30, %v7008_v13  ;;  %6734 = vmatprep.subr.bf16.mxu1 %v7744_v11  ;;  %v4097_v13 = vld [vmem:[%s9416_s13] sm:$0xf] }
0x1061   : > { %6537 = vmatmul.mubr.msk.f32.vlgmr.msra.gmra.mrb[16].mxu1 %vm3329_vm9, %v3842_v31 }
0x1062   : > { %6558 = vmatprep.mubr.msk.f32.mxu1 %vm7745_vm2, %v7746_v19  ;;  %6736 = vmatpush3.bf16.msra.mxu1 %v6735_v48 }
0x1063   : > { %6737 = vmatprep.subr.bf16.mxu1 %v7744_v11 }
0x1066   : > { %6739 = vmatpush3.bf16.msra.mxu1 %v6738_v51 }
0x1067   : > { %6746 = vmatprep.subr.bf16.mxu1 %v7744_v11 }
0x10b9   : > { %v3415_v32 = vpop.f32.mrb[10].mxu1 }
0x10ba   : > { %v6508_v33 = vpop.f32.mrb[11].mxu1 }
0x112c   : > { %v3582_v42 = vpop.f32.mrb[12].mxu1 }
0x112d   : > { %3921 = vrot.lane.b32.xlu1 %v3582_v42, %s7753_s29  ;;  %v6518_v43 = vpop.f32.mrb[13].mxu1 }
0x1130   : > { %v3749_v44 = vpop.f32.mrb[14].mxu1 }
0x1131   : > { %3925 = vrot.lane.b32.xlu0 %v3749_v44, %s7755_s25  ;;  %v6528_v45 = vpop.f32.mrb[15].mxu1 }
0x1134   : > { %v3916_v50 = vpop.f32.mrb[16].mxu1 }
0x1135   : > { %3929 = vrot.lane.b32.xlu1 %v3916_v50, %s7756_s17  ;;  %v6538_v52 = vpop.f32.mrb[17].mxu1 }
0x119f   : > { %v3922_v53 = vpop.permute.xlu1 %3921 }
0x11a0   : > { %v3932_v57 = vsel %vm2232_vm4, %v3415_v32, %v3922_v53 }
0x11a3   : > { %v3926_v56 = vpop.permute.xlu0 %3925 }
0x11a4   : > { %v3933_v59 = vsel %vm2914_vm7, %v3932_v57, %v3926_v56 }
0x11a7   : > { %v3930_v60 = vpop.permute.xlu1 %3929 }
0x11a8   : > { %v3934_v0 = vsel %vm2916_vm8, %v3933_v59, %v3930_v60 }
0x11a9   : > { %6548 = vmatmul.mubr.msk.f32.vlgmr.msra.gmra.mrb[26].mxu0 %vm2029_vm1, %v3934_v0 }
0x11aa   : > { %6742 = vmatpush3.bf16.msra.mxu0 %v6741_v58  ;;  %6569 = vmatprep.mubr.msk.f32.mxu0 %vm7745_vm2, %v7746_v19 }
0x11ab   : > { %6743 = vmatprep.subr.bf16.mxu0 %v7744_v11 }
0x11ae   : > { %6745 = vmatpush3.bf16.msra.mxu0 %v6744_v1 }
0x11af   : > { %6583 = vmatprep.subr.mxu0 %v7746_v19 }
0x11b1   : > { %6570 = vmatmul.mubr.msk.f32.vlgmr.msra.gmra.mrb[28].mxu0 %vm2029_vm1, %v8725_v37  ;;  %v6750_v37 = vpack.c.bf16 %v4182_v10, %v4181_v9 }
0x11b2   : > { %6585 = vmatprep.mubr.msk.f32.mxu0 %vm7745_vm2, %v7746_v19 }
0x127c   : > { %v4015_v5 = vpop.f32.mrb[26].mxu0 }
0x127d   : > { %v4016_v7 = vadd.f32 %v6195_v4, %v4015_v5  ;;  %v6549_v8 = vpop.f32.mrb[27].mxu0 }
0x127f   : > { %6559 = vmatmul.mubr.msk.f32.vlgmr.msra.gmra.mrb[18].mxu1 %vm2029_vm1, %v4016_v7 }
0x1280   : > { %6748 = vmatpush3.bf16.msra.mxu1 %v6747_v6  ;;  %6580 = vmatprep.mubr.msk.f32.mxu1 %vm7745_vm2, %v7746_v19 }
0x1281   : > { %6749 = vmatprep.subr.bf16.mxu1 %v7744_v11 }
0x1284   : > { %v4175_v61 = vpop.f32.mrb[28].mxu0  ;;  %6751 = vmatpush3.bf16.msra.mxu1 %v6750_v37 }
0x1285   : > { %v4176_v14 = vadd.f32 %v6198_v12, %v4175_v61  ;;  %v6571_v15 = vpop.f32.mrb[29].mxu0  ;;  %6588 = vmatprep.subr.mxu1 %v7746_v19 }
0x1287   : > { %6581 = vmatmul.mubr.msk.f32.vlgmr.msra.gmra.mrb[20].mxu1 %vm2029_vm1, %v4097_v13  ;;  %4430 = vrot.lane.b32.xlu1 %v4176_v14, %s7748_s0 }
0x1288   : > { %6590 = vmatprep.mubr.msk.f32.mxu1 %vm7745_vm2, %v7746_v19 }
0x128b   : > { %4597 = vrot.lane.b32.xlu1 %v4176_v14, %s7749_s11 }
0x128f   : > { %4764 = vrot.lane.b32.xlu1 %v4176_v14, %s7750_s14 }
0x12f9   : > { %v4431_v28 = vpop.permute.xlu1 %4430 }
0x12fd   : > { %v4598_v29 = vpop.permute.xlu1 %4597 }
0x1301   : > { %v4765_v31 = vpop.permute.xlu1 %4764 }
0x1352   : > { %v4092_v18 = vpop.f32.mrb[18].mxu1 }
0x1353   : > { %v8990_v20 = vadd.f32 %v4092_v18, %v3083_v17  ;;  %v6560_v21 = vpop.f32.mrb[19].mxu1 }
0x135a   : > { %v4259_v23 = vpop.f32.mrb[20].mxu1 }
0x135b   : > { %v8995_v24 = vadd.f32 %v6200_v22, %v4259_v23  ;;  %v6582_v25 = vpop.f32.mrb[21].mxu1  ;;  %v4946_v23 = vld [vmem:[%s9420_s21] sm:$0xff] }
0x135c   : > { %v4948_v25 = vld [vmem:[%s9420_s21 + $0x10] sm:$0xff] }
0x135d   : > { %4432 = vrot.lane.b32.xlu0 %v8995_v24, %s7748_s0  ;;  %6584 = vmatpush3.xpose.msk.msra.mxu0 %vm2232_vm4, %v8995_v24  ;;  %s9423_s0 = sld [smem:[#allocation107_spill]] }
0x135e   : > { %6593 = vmatprep.subr.mxu0 %v7746_v19 }
0x1360   : > { %6586 = vmatmul.mubr.msk.f32.vlgmr.msra.gmra.mrb[30].mxu0 %vm2232_vm4, %v4176_v14 }
0x1361   : > { %4599 = vrot.lane.b32.xlu0 %v8995_v24, %s7749_s11  ;;  %6595 = vmatprep.mubr.msk.f32.mxu0 %vm7745_vm2, %v7746_v19  ;;  %s9426_s11 = scalar_lea.vmem [#allocation18], %s9396_s23 }
0x1365   : > { %4766 = vrot.lane.b32.xlu0 %v8995_v24, %s7750_s14  ;;  %s9427_s14 = scalar_lea.vmem [#allocation21], %s9396_s23 }
0x13cf   : > { %v4433_v26 = vpop.permute.xlu0 %4432 }
0x13d0   : > { %6594 = vmatpush3.xpose.msk.msra.mxu0 %vm2232_vm4, %v4433_v26  ;;  %v4949_v26 = vld [vmem:[%s9420_s21 + $0x18] sm:$0xff] }
0x13d1   : > { %6603 = vmatprep.subr.mxu0 %v7746_v19 }
0x13d3   : > { %v4600_v27 = vpop.permute.xlu0 %4599  ;;  %6596 = vmatmul.mubr.msk.f32.vlgmr.msra.gmra.mrb[32].mxu0 %vm2232_vm4, %v4431_v28 }
0x13d4   : > { %6604 = vmatpush3.xpose.msk.msra.mxu0 %vm2232_vm4, %v4600_v27  ;;  %6605 = vmatprep.mubr.msk.f32.mxu0 %vm7745_vm2, %v7746_v19  ;;  %v6756_v27 = vpack.c.bf16 %v4949_v26, %v4948_v25  ;;  %v5229_v25 = vld [vmem:[%s8683_s15 + $0x30] sm:$0xff] }
0x13d5   : > { %6613 = vmatprep.subr.mxu0 %v7746_v19 }
0x13d7   : > { %v4767_v30 = vpop.permute.xlu0 %4766  ;;  %6606 = vmatmul.mubr.msk.f32.vlgmr.msra.gmra.mrb[34].mxu0 %vm2232_vm4, %v4598_v29 }
0x13d8   : > { %6614 = vmatpush3.xpose.msk.msra.mxu0 %vm2232_vm4, %v4767_v30  ;;  %6615 = vmatprep.mubr.msk.f32.mxu0 %vm7745_vm2, %v7746_v19 }
0x13d9   : > { %6752 = vmatprep.subr.bf16.mxu0 %v7744_v11 }
0x13db   : > { %6616 = vmatmul.mubr.msk.f32.vlgmr.msra.gmra.mrb[36].mxu0 %vm2232_vm4, %v4765_v31 }
0x13dc   : > { %6631 = vmatprep.mubr.msk.f32.mxu0 %vm7745_vm2, %v7746_v19 }
0x1433   : > { %v4335_v32 = vpop.f32.mrb[30].mxu0 }
0x1434   : > { %v4339_v33 = vmul.f32 0.35355338, %v4335_v32  ;;  %v6587_v34 = vpop.f32.mrb[31].mxu0 }
0x1436   : > { %v4341_v35 = vsel %vm4340_vm11, %v4339_v33, -inf }
0x1437   : > { %4342 = vmax.xlane.f32.xlu0 %v4341_v35  ;;  %v5030_v35 = vld [vmem:[%s9421_s10] sm:$0xff] }
0x14a6   : > { %v4504_v36 = vpop.f32.mrb[32].mxu0 }
0x14a7   : > { %v4508_v38 = vmul.f32 0.35355338, %v4504_v36  ;;  %v6597_v39 = vpop.f32.mrb[33].mxu0  ;;  %v5031_v36 = vld [vmem:[%s9421_s10 + $0x8] sm:$0xff] }
0x14a9   : > { %v4509_v41 = vsel %vm4340_vm11, %v4508_v38, -inf }
0x14aa   : > { %4510 = vmax.xlane.f32.xlu1 %v4509_v41  ;;  %v4671_v42 = vpop.f32.mrb[34].mxu0 }
0x14ab   : > { %v4675_v43 = vmul.f32 0.35355338, %v4671_v42  ;;  %v6607_v44 = vpop.f32.mrb[35].mxu0 }
0x14ad   : > { %v4676_v45 = vsel %vm4340_vm11, %v4675_v43, -inf }
0x14ae   : > { %4677 = vmax.xlane.f32.xlu0 %v4676_v45  ;;  %v4838_v46 = vpop.f32.mrb[36].mxu0 }
0x14af   : > { %v4842_v40 = vmul.f32 0.35355338, %v4838_v46  ;;  %v6617_v47 = vpop.f32.mrb[37].mxu0 }
0x14b0   : > { %v5032_v47 = vld [vmem:[%s9421_s10 + $0x10] sm:$0xff] }
0x14b1   : > { %v4843_v48 = vsel %vm4340_vm11, %v4842_v40, -inf }
0x14b2   : > { %4844 = vmax.xlane.f32.xlu0 %v4843_v48  ;;  %v5033_v48 = vld [vmem:[%s9421_s10 + $0x18] sm:$0xff] }
0x14c4   : > { %v4343_v49 = vpop.xlane.xlu0 %4342 }
0x14c5   : > { %v4344_v50 = vsub.f32 %v4339_v33, %v4343_v49  ;;  %v6762_v49 = vpack.c.bf16 %v5033_v48, %v5032_v47 }
0x14c7   : > { %v4345_v51 = vmul.f32 1.442695, %v4344_v50  ;;  %v6218_v50 = vld [vmem:[%s1979_s5] ss:$0 sm:$0xff]  ;;  %s9425_s5 = scalar_lea.vmem [#allocation26], %s9396_s23 }
0x14c9   : > { %7017 = vpow2.f32 %v4345_v51 }
0x14d3   : > { %v7018_v52 = vpop.eup %7017 }
0x14d4   : > { %v4347_v53 = vsel %vm4340_vm11, %v7018_v52, 0.0 }
0x14d5   : > { %4348 = vadd.xlane.f32.xlu0 %v4347_v53 }
0x1537   : > { %v4511_v54 = vpop.xlane.xlu1 %4510 }
0x1538   : > { %v4512_v55 = vsub.f32 %v4508_v38, %v4511_v54  ;;  %v6759_v38 = vpack.c.bf16 %v5031_v36, %v5030_v35 }
0x153a   : > { %v4513_v56 = vmul.f32 1.442695, %v4512_v55 }
0x153b   : > { %v4678_v57 = vpop.xlane.xlu0 %4677 }
0x153c   : > { %7019 = vpow2.f32 %v4513_v56  ;;  %v4679_v58 = vsub.f32 %v4675_v43, %v4678_v57  ;;  %v7035_v57 = vld [vmem:[#allocation2] sm:$0xff] }
0x153e   : > { %v4680_v59 = vmul.f32 1.442695, %v4679_v58 }
0x153f   : > { %v4845_v1 = vpop.xlane.xlu0 %4844 }
0x1540   : > { %7021 = vpow2.f32 %v4680_v59  ;;  %v4846_v2 = vsub.f32 %v4842_v40, %v4845_v1  ;;  %v5139_v1 = vld [vmem:[%s9423_s0 + $0x8] sm:$0xff] }
0x1542   : > { %v4847_v3 = vmul.f32 1.442695, %v4846_v2 }
0x1544   : > { %7023 = vpow2.f32 %v4847_v3  ;;  %v5140_v3 = vld [vmem:[%s9423_s0 + $0x10] sm:$0xff] }
0x1546   : > { %v7020_v60 = vpop.eup %7019 }
0x1547   : > { %v4515_v62 = vsel %vm4340_vm11, %v7020_v60, 0.0 }
0x1548   : > { %4516 = vadd.xlane.f32.xlu1 %v4515_v62 }
0x154a   : > { %v7022_v63 = vpop.eup %7021 }
0x154b   : > { %v4682_v0 = vsel %vm4340_vm11, %v7022_v63, 0.0 }
0x154c   : > { %4683 = vadd.xlane.f32.xlu0 %v4682_v0 }
0x154e   : > { %v7024_v4 = vpop.eup %7023 }
0x154f   : > { %v4849_v5 = vsel %vm4340_vm11, %v7024_v4, 0.0 }
0x1559   : > { %4520 = vrot.lane.b32.xlu1 %v8995_v24, %s7751_s3  ;;  %s9428_s3 = sld [smem:[#allocation88_spill]] }
0x155d   : > { %4687 = vrot.lane.b32.xlu1 %v8995_v24, %s7754_s24 }
0x155f   : > { %p6227_p0 = scmp.ge.s32.totalorder %s9428_s3, 3 }
0x1562   : > { %4352 = vrot.lane.b32.xlu0 %v8995_v24, %s7747_s18  ;;  %v4349_v6 = vpop.xlane.xlu0 %4348 }
0x1563   : > { %7025 = vrcp.f32 %v4349_v6  ;;  %v5223_v6 = vld [vmem:[%s8683_s15] sm:$0xff] }
0x156d   : > { %v7026_v9 = vpop.eup %7025 }
0x156e   : > { %v4351_v10 = vmul.f32 %v7026_v9, %v7018_v52 }
0x1581   : > { %4850 = vadd.xlane.f32.xlu1 %v4849_v5 }
0x1592   : > { %4854 = vrot.lane.b32.xlu1 %v8995_v24, %s7752_s19  ;;  %v4947_v24 = vld [vmem:[%s9420_s21 + $0x8] sm:$0xff] }
0x1593   : > { %v6753_v28 = vpack.c.bf16 %v4947_v24, %v4946_v23 }
0x1595   : > { %6754 = vmatpush3.bf16.msra.mxu0 %v6753_v28  ;;  %v5230_v28 = vld [vmem:[%s8683_s15 + $0x38] sm:$0xff] }
0x1596   : > { %6755 = vmatprep.subr.bf16.mxu0 %v7744_v11  ;;  %v6780_v26 = vpack.c.bf16 %v5230_v28, %v5229_v25 }
0x1599   : > { %6757 = vmatpush3.bf16.msra.mxu0 %v6756_v27 }
0x159a   : > { %6764 = vmatprep.subr.bf16.mxu0 %v7744_v11 }
0x15d5   : > { %v4517_v7 = vpop.xlane.xlu1 %4516 }
0x15d6   : > { %7027 = vrcp.f32 %v4517_v7  ;;  %v5224_v7 = vld [vmem:[%s8683_s15 + $0x8] sm:$0xff] }
0x15d7   : > { %v6771_v9 = vpack.c.bf16 %v5224_v7, %v5223_v6 }
0x15d9   : > { %v4684_v8 = vpop.xlane.xlu0 %4683  ;;  %v4521_v37 = vpop.permute.xlu1 %4520 }
0x15da   : > { %7029 = vrcp.f32 %v4684_v8  ;;  %v5225_v8 = vld [vmem:[%s8683_s15 + $0x10] sm:$0xff] }
0x15dd   : > { %v4353_v12 = vpop.permute.xlu0 %4352  ;;  %v4688_v14 = vpop.permute.xlu1 %4687 }
0x15de   : > { %6589 = vmatpush3.msk.msra.mxu1 %vm4357_vm12, %v4353_v12  ;;  %v5227_v12 = vld [vmem:[%s8683_s15 + $0x20] sm:$0xff] }
0x15df   : > { %6591 = vmatmul.mubr.msk.f32.vlgmr.msra.gmra.mrb[22].mxu1 %vm4340_vm11, %v4351_v10  ;;  %6598 = vmatprep.subr.mxu1 %v7746_v19  ;;  %v5226_v10 = vld [vmem:[%s8683_s15 + $0x18] sm:$0xff] }
0x15e0   : > { %v7028_v61 = vpop.eup %7027  ;;  %6599 = vmatpush3.msk.msra.mxu1 %vm4357_vm12, %v4521_v37  ;;  %6600 = vmatprep.mubr.msk.f32.mxu1 %vm7745_vm2, %v7746_v19  ;;  %v6774_v37 = vpack.c.bf16 %v5226_v10, %v5225_v8 }
0x15e1   : > { %v4519_v13 = vmul.f32 %v7028_v61, %v7020_v60  ;;  %6608 = vmatprep.subr.mxu1 %v7746_v19  ;;  %v5228_v61 = vld [vmem:[%s8683_s15 + $0x28] sm:$0xff] }
0x15e3   : > { %6601 = vmatmul.mubr.msk.f32.vlgmr.msra.gmra.mrb[24].mxu1 %vm4340_vm11, %v4519_v13  ;;  %v6777_v13 = vpack.c.bf16 %v5228_v61, %v5227_v12 }
0x15e4   : > { %v7030_v15 = vpop.eup %7029  ;;  %6609 = vmatpush3.msk.msra.mxu1 %vm4357_vm12, %v4688_v14  ;;  %6610 = vmatprep.mubr.msk.f32.mxu1 %vm7745_vm2, %v7746_v19 }
0x15e5   : > { %v4686_v16 = vmul.f32 %v7030_v15, %v7022_v63  ;;  %6618 = vmatprep.subr.mxu1 %v7746_v19 }
0x15e7   : > { %6611 = vmatmul.mubr.msk.f32.vlgmr.msra.gmra.mrb[26].mxu1 %vm4340_vm11, %v4686_v16 }
0x15e8   : > { %6620 = vmatprep.mubr.msk.f32.mxu1 %vm7745_vm2, %v7746_v19 }
0x160e   : > { %v4851_v17 = vpop.xlane.xlu1 %4850 }
0x160f   : > { %7031 = vrcp.f32 %v4851_v17 }
0x1612   : > { %v4855_v18 = vpop.permute.xlu1 %4854 }
0x1613   : > { %6619 = vmatpush3.msk.msra.mxu1 %vm4357_vm12, %v4855_v18  ;;  %v6221_v18 = vld [vmem:[%s9424_s30] ss:$0 sm:$0xff] }
0x1614   : > { %6758 = vmatprep.subr.bf16.mxu1 %v7744_v11 }
0x1619   : > { %v7032_v21 = vpop.eup %7031 }
0x161a   : > { %v4853_v22 = vmul.f32 %v7032_v21, %v7024_v4  ;;  %v5141_v4 = vld [vmem:[%s9423_s0 + $0x18] sm:$0xff] }
0x161b   : > { %v6768_v5 = vpack.c.bf16 %v5141_v4, %v5140_v3 }
0x161c   : > { %6621 = vmatmul.mubr.msk.f32.vlgmr.msra.gmra.mrb[28].mxu1 %vm4340_vm11, %v4853_v22  ;;  %v6222_v22 = vld [vmem:[%s9425_s5] ss:$0 sm:$0xff] }
0x161d   : > { %6642 = vmatprep.mubr.msk.f32.mxu1 %vm7745_vm2, %v7746_v19  ;;  %6760 = vmatpush3.bf16.msra.mxu1 %v6759_v38 }
0x161e   : > { %6761 = vmatprep.subr.bf16.mxu1 %v7744_v11 }
0x1621   : > { %6763 = vmatpush3.bf16.msra.mxu1 %v6762_v49 }
0x1622   : > { %6770 = vmatprep.subr.bf16.mxu1 %v7744_v11 }
0x16b2   : > { %v4426_v29 = vpop.f32.mrb[22].mxu1 }
0x16b3   : > { %v6592_v30 = vpop.f32.mrb[23].mxu1 }
0x16b6   : > { %v4593_v31 = vpop.f32.mrb[24].mxu1 }
0x16b7   : > { %4932 = vrot.lane.b32.xlu0 %v4593_v31, %s7753_s29  ;;  %v6602_v32 = vpop.f32.mrb[25].mxu1 }
0x16ba   : > { %v4760_v33 = vpop.f32.mrb[26].mxu1 }
0x16bb   : > { %4936 = vrot.lane.b32.xlu1 %v4760_v33, %s7755_s25  ;;  %v6612_v34 = vpop.f32.mrb[27].mxu1  ;;  %v6226_v33 = vld [vmem:[%s9427_s14] ss:$0 sm:$0xff] }
0x16ef   : > { %v4927_v39 = vpop.f32.mrb[28].mxu1 }
0x16f0   : > { %4940 = vrot.lane.b32.xlu0 %v4927_v39, %s7756_s17  ;;  %v6622_v41 = vpop.f32.mrb[29].mxu1 }
0x1729   : > { %v4933_v42 = vpop.permute.xlu0 %4932 }
0x172a   : > { %v4943_v44 = vsel %vm2232_vm4, %v4426_v29, %v4933_v42 }
0x172d   : > { %v4937_v43 = vpop.permute.xlu1 %4936 }
0x172e   : > { %v4944_v45 = vsel %vm2914_vm7, %v4943_v44, %v4937_v43 }
0x1762   : > { %v4941_v46 = vpop.permute.xlu0 %4940 }
0x1763   : > { %v4945_v40 = vsel %vm2916_vm8, %v4944_v45, %v4941_v46 }
0x1764   : > { %6632 = vmatmul.mubr.msk.f32.vlgmr.msra.gmra.mrb[38].mxu0 %vm2029_vm1, %v4945_v40 }
0x1765   : > { %6653 = vmatprep.mubr.msk.f32.mxu0 %vm7745_vm2, %v7746_v19 }
0x1837   : > { %v5026_v51 = vpop.f32.mrb[38].mxu0 }
0x1838   : > { %v5027_v52 = vadd.f32 %v6218_v50, %v5026_v51  ;;  %v6633_v53 = vpop.f32.mrb[39].mxu0 }
0x183a   : > { %6643 = vmatmul.mubr.msk.f32.vlgmr.msra.gmra.mrb[30].mxu1 %vm2029_vm1, %v5027_v52 }
0x183b   : > { %6672 = vmatprep.mubr.msk.f32.mxu1 %vm7745_vm2, %v7746_v19  ;;  %6772 = vmatpush3.bf16.msra.mxu1 %v6771_v9 }
0x183c   : > { %6773 = vmatprep.subr.bf16.mxu1 %v7744_v11 }
0x183f   : > { %6775 = vmatpush3.bf16.msra.mxu1 %v6774_v37 }
0x1840   : > { %6776 = vmatprep.subr.bf16.mxu1 %v7744_v11 }
0x1843   : > { %6778 = vmatpush3.bf16.msra.mxu1 %v6777_v13 }
0x1844   : > { %6779 = vmatprep.subr.bf16.mxu1 %v7744_v11 }
0x1847   : > { %6781 = vmatpush3.bf16.msra.mxu1 %v6780_v26 }
0x190d   : > { %v5103_v54 = vpop.f32.mrb[30].mxu1 }
0x190e   : > { %v5107_v55 = vadd.f32 %v5103_v54, %v8990_v20  ;;  %v6644_v56 = vpop.f32.mrb[31].mxu1  ;;  %v5138_v20 = vld [vmem:[%s9423_s0] sm:$0xff] }
0x190f   : > { %v6765_v2 = vpack.c.bf16 %v5139_v1, %v5138_v20 }
0x1910   : > { %v5108_v58 = vadd.f32 %v7035_v57, %v5107_v55 }
0x1911   : > { %6766 = vmatpush3.bf16.msra.mxu0 %v6765_v2 }
0x1912   : > { %v5111_v59 = vsel %vm2029_vm1, %v5108_v58, 0.0  ;;  %6767 = vmatprep.subr.bf16.mxu0 %v7744_v11  ;;  %v6223_v11 = vld [vmem:[%s9426_s11] ss:$0 sm:$0xff] }
0x1913   : > { %5112 = vadd.xlane.f32.xlu1 %v5111_v59 }
0x1915   : > { %6769 = vmatpush3.bf16.msra.mxu0 %v6768_v5 }
0x19a0   : > { %v5113_v60 = vpop.xlane.xlu1 %5112 }
0x19a1   : > { %v5114_v62 = vmul.f32 0.03125, %v5113_v60 }
0x19a3   : > { %v5115_v63 = vsub.f32 %v5108_v58, %v5114_v62 }
0x19a5   : > { %v5116_v0 = vmul.f32 %v5115_v63, %v5115_v63 }
0x19a7   : > { %v5117_v19 = vsel %vm2029_vm1, %v5116_v0, 0.0 }
0x19a8   : > { %5118 = vadd.xlane.f32.xlu0 %v5117_v19 }
0x1a35   : > { %v5119_v14 = vpop.xlane.xlu0 %5118 }
0x1a36   : > { %v5120_v15 = vmul.f32 0.03125, %v5119_v14 }
0x1a38   : > { %v5121_v16 = vadd.f32 1e-05, %v5120_v15 }
0x1a3a   : > { %7033 = vrsqrt.f32 %v5121_v16 }
0x1a44   : > { %v7034_v17 = vpop.eup %7033 }
0x1a45   : > { %v5123_v21 = vmul.f32 %v7034_v17, %v5115_v63 }
0x1a47   : > { %v5130_v23 = vmul.f32 %v6221_v18, %v5123_v21 }
0x1a49   : > { %v5137_v24 = vadd.f32 %v6222_v22, %v5130_v23 }
0x1a4b   : > { %6654 = vmatmul.mubr.msk.f32.vlgmr.msra.gmra.mrb[40].mxu0 %vm2029_vm1, %v5137_v24 }
0x1b1e   : > { %v5218_v27 = vpop.f32.mrb[40].mxu0 }
0x1b1f   : > { %v5219_v29 = vadd.f32 %v6223_v11, %v5218_v27  ;;  %v6655_v30 = vpop.f32.mrb[41].mxu0 }
0x1b21   : > { %v5222_v31 = vmax.f32 %v5219_v29, 0.0 }
0x1b23   : > { %6673 = vmatmul.mubr.msk.f32.vlgmr.msra.gmra.mrb[32].mxu1 %vm2158_vm3, %v5222_v31 }
0x1bf3   : > { %5316 = sbr.rel (%p6227_p0) target bundleno = 7164 (0x1bfc), region = 248 }
0x1bf6   : > { %v5300_v32 = vpop.f32.mrb[32].mxu1 }
0x1bf7   : > { %v5304_v34 = vadd.f32 %v5300_v32, %v5137_v24  ;;  %v6674_v35 = vpop.f32.mrb[33].mxu1 }
0x1bf9   : > { %v5312_v36 = vadd.f32 %v6226_v33, %v5304_v34 }
0x1bfb   : > { %5317 = vst.msk [vmem:[#allocation2] sm:$0xff] %vm2029_vm1, %v5312_v36 }
0x1bfc PF: > { %s9429_s15 = sld [smem:[#allocation88_spill]] }
0x1c02   : > { %p6228_p11 = scmp.ne.s32.totalorder %s9429_s15, 3 }
0x1c03   : > { %s9430_s19 = sld [smem:[#allocation89_spill]] (!%p6228_p11) }
0x1c04   : > { %5321 = sbr.rel (%p6228_p11) target bundleno = 7188 (0x1c14), region = 252 }
0x1c09   : > { %s6229_s29 = sshll.u32 (!%p6228_p11), %s9430_s19, 7 }
0x1c0a   : > { %s5323_s24 = sld [smem:[#allocation4 + %s6229_s29]] (!%p6228_p11) }
0x1c10   : > { %v5324_v38 = vstv %s5323_s24 }
0x1c11   : > { %v5325_v39 = vmul.f32 %v5324_v38, %v5312_v36 }
0x1c13   : > { %5326 = vst.msk [vmem:[#allocation3] sm:$0xff] %vm2029_vm1, %v5325_v39 }
0x1c14 PF: > { %s9431_s23 = sld [smem:[#allocation88_spill]] }
0x1c1a   : > { %p6230_p13 = scmp.le.s32.totalorder %s9431_s23, 3 }
0x1c1b   : > { %s9432_s25 = sld [smem:[#allocation88_spill]] (!%p6230_p13)  ;;  %s9433_s17 = sld [smem:[#allocation89_spill]] (!%p6230_p13)  ;;  %v5331_v41 = vld [vmem:[#allocation3] sm:$0xff] (!%p6230_p13) }
0x1c1c   : > { %5330 = sbr.rel (%p6230_p13) target bundleno = 7218 (0x1c32), region = 256 }
0x1c21   : > { %s6231_s7 = sadd.s32 (!%p6230_p13), 4294967293, %s9432_s25 }
0x1c22   : > { %s5333_s1 = sshra.s32 (!%p6230_p13), %s6231_s7, 7  ;;  %s5338_s12 = sand.u32 (!%p6230_p13), 127, %s6231_s7 }
0x1c23   : > { %s5335_s28 = sadd.s32 %s9433_s17, %s5333_s1 }
0x1c24   : > { %s6232_s9 = sshll.u32 %s5335_s28, 7 }
0x1c25   : > { %s5339_s6 = sadd.s32 %s6232_s9, %s5338_s12 }
0x1c26   : > { %s5340_s27 = sld [smem:[#allocation4 + %s5339_s6]] }
0x1c2c   : > { %v5341_v42 = vstv %s5340_s27 }
0x1c2d   : > { %v5342_v43 = vmul.f32 %v5341_v42, %v5312_v36 }
0x1c2f   : > { %v5343_v44 = vadd.f32 %v5342_v43, %v5331_v41 }
0x1c31   : > { %5344 = vst.msk [vmem:[#allocation3] sm:$0xff] %vm2029_vm1, %v5343_v44 }
0x1c32 PF: > { %s9434_s4 = sld [smem:[#allocation88_spill]] }
0x1c38   : > { %p6233_p6 = scmp.ne.s32.totalorder %s9434_s4, 7 }
0x1c39   : > { %s9435_s20 = sld [smem:[#allocation80_spill]] (!%p6233_p6)  ;;  %s9436_s13 = sld [smem:[#allocation81_spill]] (!%p6233_p6)  ;;  %v7757_v47 = vmov (!%p6233_p6), 0.0|0.0   ;;  %vm7758_vm13 = vmmov (!%p6233_p6), 0   ;;  %v7759_v50 = vmov (!%p6233_p6), 0.0   ;;  %v5349_v52 = vld [vmem:[#allocation3] sm:$0xff] (!%p6233_p6) }
0x1c3a   : > { %5348 = sbr.rel (%p6233_p6) target bundleno = 7456 (0x1d20), region = 260  ;;  %6782 = vmatprep.subr.bf16.mxu0 (!%p6233_p6), %v7757_v47  ;;  %6683 = vmatprep.mubr.msk.f32.mxu0 (!%p6233_p6), %vm7758_vm13, %v7759_v50  ;;  %v5350_v53 = vmul.f32 (!%p6233_p6), 0.2, %v5349_v52 }
0x1c3f   : > { %v5351_v45 = vld [vmem:[%s9435_s20] sm:$0xff] (!%p6233_p6)  ;;  %v5352_v46 = vld [vmem:[%s9435_s20 + $0x8] sm:$0xff] (!%p6233_p6)  ;;  %v5353_v40 = vld [vmem:[%s9435_s20 + $0x10] sm:$0xff] (!%p6233_p6) }
0x1c40   : > { %v6783_v48 = vpack.c.bf16 (!%p6233_p6), %v5352_v46, %v5351_v45  ;;  %v5354_v49 = vld [vmem:[%s9435_s20 + $0x18] sm:$0xff] (!%p6233_p6)  ;;  %v6234_v54 = vld [vmem:[%s9436_s13] ss:$0 sm:$0xff] (!%p6233_p6) }
0x1c41   : > { %v6786_v51 = vpack.c.bf16 %v5354_v49, %v5353_v40 }
0x1c42   : > { %6784 = vmatpush3.bf16.msra.mxu0 %v6783_v48 }
0x1c43   : > { %6785 = vmatprep.subr.bf16.mxu0 %v7757_v47 }
0x1c46   : > { %6787 = vmatpush3.bf16.msra.mxu0 %v6786_v51 }
0x1c49   : > { %6684 = vmatmul.mubr.msk.f32.vlgmr.msra.gmra.mrb[0].mxu0 %vm2029_vm1, %v5350_v53 }
0x1d1c   : > { %v5431_v55 = vpop.f32.mrb[0].mxu0 }
0x1d1d   : > { %v5432_v56 = vadd.f32 %v6234_v54, %v5431_v55  ;;  %v6685_v57 = vpop.f32.mrb[1].mxu0 }
0x1d1f   : > { %5435 = vst [vmem:[%s1957_s8] sm:$0xff] %v5432_v56 }
0x1d20 PF: > { %s9437_s16 = sld [smem:[#allocation89_spill]]  ;;  %s9438_s26 = sld [smem:[#allocation82_spill]] }
0x1d21   : > { %s9440_s22 = sld [smem:[#allocation84_spill]]  ;;  %s9441_s10 = sld [smem:[#allocation97_spill]] }
0x1d22   : > { %s5450_s30 = sshll.u32 %s1957_s8, 4  ;;  %s7760_s3 = smov [#allocation33]   ;;  %s5451_s30 = int_to_ptr.vmem [resolvable:$true] %s5450_s30 }
0x1d23   : > { %s7527_s14 = scalar_lea.vmem %s5451_s30, 128  ;;  %s7531_s15 = sshll.u32 %s7760_s3, 4  ;;  %s7532_s15 = int_to_ptr.vmem [resolvable:$false] %s7531_s15 }
0x1d24   : > { %p7528_p1 = scmp.ne.s32.totalorder %s5451_s30, %s7527_s14  ;;  %s7533_s19 = scalar_lea.vmem %s7532_s15, 256 }
0x1d25   : > { %p7534_p5 = scmp.lt.s32.totalorder %s5451_s30, %s7532_s15  ;;  %p7535_p4 = scmp.lt.s32.totalorder %s7533_s19, %s7527_s14 }
0x1d26   : > { %s9439_s21 = smov %s9438_s26  ;;  %s6237_s18 = sshll.u32 %s9437_s16, 7 }
0x1d27   : > { %s9136_s0 = scalar_lea.hbm %s9438_s26, %s6237_s18  ;;  %s9442_s5 = sand.u32 1, %s9440_s22  }
0x1d28   : > { %s5437_s11 = scalar_lea.sflag [#allocation6], %s9442_s5  ;;  %p9443_p3 = scmp.ne.s32.totalorder %s9441_s10, 0 }
0x1d29   : > { %p7536_p8 = por %p7535_p4, %p7534_p5 }
0x1d2a   : > { %p7529_p2 = pnand %p7528_p1, %p9443_p3 }
0x1d2c   : > { %p7530_p12 = pneg %p7529_p2 }
0x1d2e   : > { %p7537_p9 = pnand %p7536_p8, %p7530_p12 }
0x1d30   : > { %7540 = shalt.err (!%p7537_p9)
}
0x1d31   : > { %s7541_s2 = scalar_lea.hbm %s9136_s0, 128  ;;  %s7545_s8 = scalar_lea.hbm %s9439_s21, 256 }
0x1d32   : > { %p7542_p7 = scmp.ne.s32.totalorder %s9136_s0, %s7541_s2  ;;  %p7546_p11 = scmp.lt.u32.totalorder %s9136_s0, %s9439_s21 }
0x1d33   : > { %p7547_p13 = scmp.lt.u32.totalorder %s7545_s8, %s7541_s2  ;;  %p7549_p1 = scmp.lt.u32.totalorder %s7541_s2, %s9136_s0 }
0x1d34   : > { %p7543_p10 = pnand %p7542_p7, %p9443_p3 }
0x1d35   : > { %p7548_p6 = por %p7547_p13, %p7546_p11 }
0x1d36   : > { %p7544_p0 = pneg %p7543_p10 }
0x1d37   : > { %p7550_p2 = por %p7549_p1, %p7548_p6 }
0x1d39   : > { %p7551_p12 = pnand %p7550_p2, %p7544_p0 }
0x1d3b   : > { %7554 = shalt.err (!%p7551_p12)
}
0x1d3c   : > { %6826 = dma.vmem_to_hbm [thread:$0]  (%p9443_p3), %s5451_s30, 128, %s9136_s0, %s5437_s11  }
0x1d3d PF: > { %s9444_s29 = sld [smem:[#allocation92_spill]]  ;;  %s9445_s24 = sld [smem:[#allocation83_spill]] }
0x1d3e   : > { %s9446_s23 = sld [smem:[#allocation98_spill]] }
0x1d43   : > { %p6838_p5 = scmp.ge.s32.totalorder %s9444_s29, 2  ;;  %s5462_s25 = sand.u32 1, %s9445_s24  }
0x1d44   : > { %p9447_p4 = scmp.ne.s32.totalorder %s9446_s23, 0  ;;  %s5463_s17 = scalar_lea.sflag [#allocation6], %s5462_s25 }
0x1d46   : > { %p6833_p8 = pnand %p6838_p5, %p9447_p4 }
0x1d48   : > { %7640 = dma.done.wait (!%p6833_p8), %s5463_s17, 128  }
0x1d49   : > { %7642 = vsyncadd (!%p6833_p8), %s5463_s17, 4294967168  ;;  %s116_s28 = sadd.s32 1, %s9444_s29   ;;  %s9448_s0 = sld [smem:[#allocation84_spill]] }
0x1d4a   : > { %p113_p9 = scmp.ge.s32.totalorder %s116_s28, 18   ;;  %s9449_s7 = sld [smem:[#allocation85_spill]] }
0x1d4b   : > { %s9450_s10 = sld [smem:[#allocation96_spill]]  ;;  %s9451_s11 = sld [smem:[#allocation86_spill]] }
0x1d4c   : > { %s9452_s15 = sld [smem:[#allocation87_spill]]  ;;  %s9453_s16 = sld [smem:[#allocation95_spill]] }
0x1d4d   : > { %s9454_s18 = sld [smem:[#allocation90_spill]]  ;;  %s9455_s22 = sld [smem:[#allocation91_spill]] }
0x1d4e   : > { %s9456_s23 = sld [smem:[#allocation93_spill]]  ;;  %s9457_s26 = sld [smem:[#allocation94_spill]] }
0x1d4f   :  { %115 = sbr.rel (!%p113_p9) target bundleno = 105 (0x69), region = 518 }
0x1d56   :  { %5468 = vsyncpa [#allocation5], 1 }
0x1d57   :  { %5470 = vsyncpa [#allocation5 + $0x1], 1 }
0x1d58   :  { %5471 = vsyncpa [#allocation10], 1 }
0x1d59   :  { %5473 = vsyncpa [#allocation10 + $0x1], 1 }
0x1d5a   :  { %5474 = vsyncpa [#allocation13], 1 }
0x1d5b   :  { %5476 = vsyncpa [#allocation13 + $0x1], 1 }
0x1d5c   :  { %5477 = vsyncpa [#allocation16], 1 }
0x1d5d   :  { %5479 = vsyncpa [#allocation16 + $0x1], 1 }
0x1d5e   :  { %5480 = vsyncpa [#allocation19], 1 }
0x1d5f   :  { %5482 = vsyncpa [#allocation19 + $0x1], 1 }
0x1d60   :  { %5483 = vsyncpa [#allocation22], 1 }
0x1d61   :  { %5485 = vsyncpa [#allocation22 + $0x1], 1 }
0x1d62   :  { %5486 = vsyncpa [#allocation25], 1 }
0x1d63   :  { %5488 = vsyncpa [#allocation25 + $0x1], 1 }
0x1d64   :  { %5489 = vsyncpa [#allocation28], 1 }
0x1d65   :  { %5491 = vsyncpa [#allocation28 + $0x1], 1 }
0x1d66   :  { %5492 = vsyncpa [#allocation31], 1 }
0x1d67   :  { %5494 = vsyncpa [#allocation31 + $0x1], 1 }
0x1d68   :  { %5495 = vsyncpa [#allocation6], 1 }
0x1d69   :  { %5497 = vsyncpa [#allocation6 + $0x1], 1 }
0x1d6a   :  { %5498 = vsyncpa [#allocation7], 1 }
0x1d6b   :  { %5500 = vsyncpa [#allocation7 + $0x1], 1 }

</bundles_post_ra>
